<compile_context>
chip_gen: v7x
topology: tpu7x:2x2x1
jax: 0.10.0
libtpu: 0.0.40
codegen_flags: <defaults>
</compile_context>

<pallas_src>
import functools
import math

import jax
import jax.numpy as jnp
from jax.experimental import pallas as pl
from jax.experimental.pallas import tpu as pltpu


def _cdiv(a, b):
    return -(-a // b)


def _fused_kernel(x_ref, w_ref, b_ref, p_ref, o_ref, *, s, co, c_in, w_sp, th):
    """One (batch, row-tile) grid step; writes the output tile in FINAL layout.

    x_ref: (C_in, TH*W)     input rows (NCHW), lanes = (row, w) flattened
    w_ref: (s*Co, s*C_in)   BN-scale-folded weight, rows (d, k), cols (a, ci)
    b_ref: (s*Co, s*W)      BN bias pre-broadcast, rows (d, k), cols (w, a)  [f32]
    p_ref: (s, W, s*W)      one-hot expansion: P[a, w, w*s + a] = 1
    o_ref: (Co, TH, s*s*W)  output tile, cols (d, w, a) flattened = final layout
    """
    sw = s * w_sp
    cdtype = x_ref.dtype
    for r in range(th):                                    # static unroll over image rows
        x_r = x_ref[:, r * w_sp:(r + 1) * w_sp]            # (C_in, W)
        acc = None
        for a in range(s):
            # Lane interleave on the (idle) MXU: column w -> output lane w*s + a.
            # One-hot selection => exact in any dtype.
            x_exp = jnp.dot(x_r, p_ref[a],
                            preferred_element_type=jnp.float32).astype(cdtype)
            part = jnp.dot(w_ref[:, a * c_in:(a + 1) * c_in], x_exp,
                           preferred_element_type=jnp.float32)    # (s*Co, s*W) f32
            acc = part if acc is None else acc + part
        y = jnp.maximum(acc + b_ref[...], 0.0)              # folded BN bias + ReLU (f32)
        for d in range(s):                                   # rows (d, k) -> out row h*s + d
            o_ref[:, r, d * sw:(d + 1) * sw] = (
                y[d * co:(d + 1) * co, :].astype(o_ref.dtype))


def _pick_block_rows(batch, height, width, target_rows=64):
    """Input-image rows per grid step.

    Must be a multiple of 8 with rows*W a multiple of 128 (the (8,128) tiling rule on the
    flattened input block and the output block) OR cover the whole H (block == full dim
    is always legal).  Also guarantees >= 2 grid steps on a 'parallel' axis when B == 1
    (feed both v7x TensorCores) and balances tile sizes (no near-empty ragged tail).
    """
    granule = max(8, 128 // math.gcd(width, 128))
    if granule >= height:
        return height
    want_tiles = max(2 if batch == 1 else 1, _cdiv(height, target_rows))
    rows = granule * max(1, _cdiv(_cdiv(height, want_tiles), granule))
    return min(rows, height)


def pixel_shuffle_v3(x, w, bn_scale, bn_bias, *, scale=2, target_rows=64, out_dtype=None):
    """Full fused forward.

    x: (B, C_in, H, W) NCHW (f32 or bf16); w: (C_in, C_mid) == conv.weight[:, :, 0, 0].T;
    bn_scale / bn_bias: (C_mid,) folded eval-mode BatchNorm.
    Returns (B, C_mid // scale**2, H*scale, W*scale), matching PixelShuffle_v3.forward.
    """
    B, C_in, H, W = x.shape
    C_mid = w.shape[1]
    s = scale
    assert C_mid % (s * s) == 0
    Co = C_mid // (s * s)
    cdtype = x.dtype
    out_dtype = cdtype if out_dtype is None else out_dtype

    # ---- host-side (one-time, tiny) parameter re-layout ------------------------------
    wf = w.astype(jnp.float32) * bn_scale[None, :].astype(jnp.float32)   # fold BN scale
    # Wcat[d*Co + k, a*C_in + ci] = wf[ci, (a*s + d)*Co + k]
    wcat = (wf.T.reshape(s, s, Co, C_in)       # (a, d, k, ci)
            .transpose(1, 2, 0, 3)             # (d, k, a, ci)
            .reshape(s * Co, s * C_in)
            .astype(cdtype))
    # bias_cat[d*Co + k, w*s + a] = bn_bias[(a*s + d)*Co + k]
    bcat = (bn_bias.astype(jnp.float32).reshape(s, s, Co)   # (a, d, k)
            .transpose(1, 2, 0)                              # (d, k, a)
            .reshape(s * Co, 1, s))
    bcat = jnp.broadcast_to(bcat, (s * Co, W, s)).reshape(s * Co, W * s)
    # Expansion one-hots: P[a, w, w*s + a] = 1
    lane = jnp.arange(W * s)[None, None, :]
    wi = jnp.arange(W)[None, :, None]
    ai = jnp.arange(s)[:, None, None]
    pmat = (lane == wi * s + ai).astype(cdtype)              # (s, W, s*W)

    x2 = x.reshape(B, C_in, H * W)          # free view of contiguous NCHW

    TH = _pick_block_rows(B, H, W, target_rows)
    grid = (B, pl.cdiv(H, TH))
    sW, ssW = s * W, s * s * W

    # VMEM budget sized from actual use (double-buffered blocks + resident params) with
    # headroom; capped below v7x's 64 MiB physical VMEM.
    itm_in = jnp.dtype(cdtype).itemsize
    itm_out = jnp.dtype(out_dtype).itemsize
    blk_bytes = C_in * TH * W * itm_in + Co * TH * ssW * itm_out
    resident = (wcat.size + pmat.size) * itm_in + bcat.size * 4
    vmem_limit = int(min(64 * 2**20, max(16 * 2**20, 4 * blk_bytes + resident)))

    kernel = functools.partial(_fused_kernel, s=s, co=Co, c_in=C_in, w_sp=W, th=TH)

    out4 = pl.pallas_call(
        kernel,
        out_shape=jax.ShapeDtypeStruct((B, Co, H, ssW), out_dtype),
        grid_spec=pltpu.PrefetchScalarGridSpec(
            num_scalar_prefetch=0,
            grid=grid,
            in_specs=[
                pl.BlockSpec((None, C_in, TH * W), lambda b, i: (b, 0, i)),
                pl.BlockSpec((s * Co, s * C_in), lambda b, i: (0, 0)),
                pl.BlockSpec((s * Co, sW), lambda b, i: (0, 0)),
                pl.BlockSpec((s, W, sW), lambda b, i: (0, 0, 0)),
            ],
            out_specs=pl.BlockSpec((None, Co, TH, ssW), lambda b, i: (b, 0, i, 0)),
        ),
        compiler_params=pltpu.CompilerParams(
            dimension_semantics=("parallel", "parallel"),
            vmem_limit_bytes=vmem_limit,
        ),
    )(x2, wcat, bcat, pmat)

    # (h, d) and (w, a) are already adjacent in memory: this reshape is a free view.
    return out4.reshape(B, Co, H * s, W * s)


def _reference_forward(x, w, bn_scale, bn_bias, s):
    """Pure-JAX mirror of the exact torch permute/view chain, for validation."""
    y = jnp.einsum('bchw,co->bohw', x.astype(jnp.float32), w,
                   precision=jax.lax.Precision.HIGHEST)            # 1x1 conv, no bias
    y = y * bn_scale[None, :, None, None] + bn_bias[None, :, None, None]
    y = jnp.maximum(y, 0.0)
    b, c, h, wd = y.shape
    y = jnp.transpose(y, (0, 2, 3, 1))                # permute(0,2,3,1).contiguous()
    y = y.reshape(b, h, wd * s, c // s)               # view
    y = jnp.transpose(y, (0, 2, 1, 3))                # permute(0,2,1,3).contiguous()
    y = y.reshape(b, wd * s, h * s, c // s // s)      # view
    y = jnp.transpose(y, (0, 3, 2, 1))                # permute(0,3,2,1).contiguous()
    return y


if __name__ == "__main__":
    # Small shapes consistent with the module.
    B, C_in, H, W = 2, 8, 16, 16
    out_channels, scale = 4, 2
    C_mid = out_channels * scale * scale  # 16
    eps = 1e-5

    key = jax.random.PRNGKey(0)
    kx, kw, kg, kb, km, kv = jax.random.split(key, 6)

    x = jax.random.normal(kx, (B, C_in, H, W), dtype=jnp.float32)
    # torch nn.Conv2d(in, out, 1) weight is (C_mid, C_in, 1, 1); stored here as (C_in, C_mid).
    w = jax.random.normal(kw, (C_in, C_mid), dtype=jnp.float32) * 0.1

    # Eval-mode BatchNorm2d params, folded into scale/bias.
    gamma = 1.0 + 0.1 * jax.random.normal(kg, (C_mid,), dtype=jnp.float32)
    beta = 0.05 * jax.random.normal(kb, (C_mid,), dtype=jnp.float32)
    running_mean = 0.1 * jax.random.normal(km, (C_mid,), dtype=jnp.float32)
    running_var = jnp.abs(1.0 + 0.1 * jax.random.normal(kv, (C_mid,), dtype=jnp.float32))
    bn_scale = gamma / jnp.sqrt(running_var + eps)
    bn_bias = beta - running_mean * bn_scale

    fwd = jax.jit(functools.partial(pixel_shuffle_v3, scale=scale))

    # f32 path
    out = jax.block_until_ready(fwd(x, w, bn_scale, bn_bias))
    assert out.shape == (B, out_channels, H * scale, W * scale), out.shape
    ref = jax.block_until_ready(_reference_forward(x, w, bn_scale, bn_bias, scale))
    err = float(jnp.max(jnp.abs(out.astype(jnp.float32) - ref)))
    assert err < 1e-3, err

    # bf16 I/O path (halves the kernel's HBM traffic; accumulation stays f32)
    out_bf = jax.block_until_ready(fwd(x.astype(jnp.bfloat16), w, bn_scale, bn_bias))
    err_bf = float(jnp.max(jnp.abs(out_bf.astype(jnp.float32) - ref)))
    assert err_bf < 5e-2, err_bf

    print("KERNEL_OK")
</pallas_src>

<mosaic_0001>
module attributes {stable_mosaic.version = 11 : i64} {
  func.func @_fused_kernel(%arg0: i32, %arg1: i32, %arg2: memref<1x8x256xf32, #tpu.memory_space<vmem>>, %arg3: memref<8x16xf32, #tpu.memory_space<vmem>>, %arg4: memref<8x32xf32, #tpu.memory_space<vmem>>, %arg5: memref<2x16x32xf32, #tpu.memory_space<vmem>>, %arg6: memref<1x4x16x64xf32, #tpu.memory_space<vmem>>) attributes {dimension_semantics = [#tpu.dimension_semantics<parallel>, #tpu.dimension_semantics<parallel>], iteration_bounds = array<i64: 2, 1>, scalar_prefetch = 0 : i64, scratch_operands = 0 : i64, tpu.core_type = #tpu.core_type<tc>, window_params = [{transform_indices = @transform_0, window_bounds = array<i64: 1, 8, 256>}, {pipeline_mode = #tpu.pipeline_mode<synchronous>, transform_indices = @transform_1, window_bounds = array<i64: 8, 16>}, {pipeline_mode = #tpu.pipeline_mode<synchronous>, transform_indices = @transform_2, window_bounds = array<i64: 8, 32>}, {pipeline_mode = #tpu.pipeline_mode<synchronous>, transform_indices = @transform_3, window_bounds = array<i64: 2, 16, 32>}, {transform_indices = @transform_4, window_bounds = array<i64: 1, 4, 16, 64>}]} {
    %c0 = arith.constant 0 : index
    %c0_0 = arith.constant 0 : index
    %c0_1 = arith.constant 0 : index
    %0 = vector.load %arg2[%c0, %c0_0, %c0_1] : memref<1x8x256xf32, #tpu.memory_space<vmem>>, vector<1x8x16xf32>
    %1 = vector.shape_cast %0 : vector<1x8x16xf32> to vector<8x16xf32>
    %c0_2 = arith.constant 0 : index
    %c0_3 = arith.constant 0 : index
    %c0_4 = arith.constant 0 : index
    %2 = vector.load %arg5[%c0_2, %c0_3, %c0_4] : memref<2x16x32xf32, #tpu.memory_space<vmem>>, vector<1x16x32xf32>
    %3 = vector.shape_cast %2 : vector<1x16x32xf32> to vector<16x32xf32>
    %cst = arith.constant dense<0.000000e+00> : vector<8x32xf32>
    %4 = tpu.matmul %1, %3, %cst {dimension_numbers = #tpu.dot_dimension_numbers<[1], [0], [0], [1], [0, 0, 1, 1], [], []>} : vector<8x16xf32>, vector<16x32xf32>, vector<8x32xf32> -> vector<8x32xf32>
    %c0_5 = arith.constant 0 : index
    %c0_6 = arith.constant 0 : index
    %5 = vector.load %arg3[%c0_5, %c0_6] : memref<8x16xf32, #tpu.memory_space<vmem>>, vector<8x8xf32>
    %cst_7 = arith.constant dense<0.000000e+00> : vector<8x32xf32>
    %6 = tpu.matmul %5, %4, %cst_7 {dimension_numbers = #tpu.dot_dimension_numbers<[1], [0], [0], [1], [0, 0, 1, 1], [], []>} : vector<8x8xf32>, vector<8x32xf32>, vector<8x32xf32> -> vector<8x32xf32>
    %c1 = arith.constant 1 : index
    %c0_8 = arith.constant 0 : index
    %c0_9 = arith.constant 0 : index
    %7 = vector.load %arg5[%c1, %c0_8, %c0_9] : memref<2x16x32xf32, #tpu.memory_space<vmem>>, vector<1x16x32xf32>
    %8 = vector.shape_cast %7 : vector<1x16x32xf32> to vector<16x32xf32>
    %cst_10 = arith.constant dense<0.000000e+00> : vector<8x32xf32>
    %9 = tpu.matmul %1, %8, %cst_10 {dimension_numbers = #tpu.dot_dimension_numbers<[1], [0], [0], [1], [0, 0, 1, 1], [], []>} : vector<8x16xf32>, vector<16x32xf32>, vector<8x32xf32> -> vector<8x32xf32>
    %c0_11 = arith.constant 0 : index
    %c8 = arith.constant 8 : index
    %10 = vector.load %arg3[%c0_11, %c8] : memref<8x16xf32, #tpu.memory_space<vmem>>, vector<8x8xf32>
    %cst_12 = arith.constant dense<0.000000e+00> : vector<8x32xf32>
    %11 = tpu.matmul %10, %9, %cst_12 {dimension_numbers = #tpu.dot_dimension_numbers<[1], [0], [0], [1], [0, 0, 1, 1], [], []>} : vector<8x8xf32>, vector<8x32xf32>, vector<8x32xf32> -> vector<8x32xf32>
    %12 = arith.addf %6, %11 : vector<8x32xf32>
    %c0_13 = arith.constant 0 : index
    %c0_14 = arith.constant 0 : index
    %13 = vector.load %arg4[%c0_13, %c0_14] : memref<8x32xf32, #tpu.memory_space<vmem>>, vector<8x32xf32>
    %14 = arith.addf %12, %13 : vector<8x32xf32>
    %cst_15 = arith.constant 0.000000e+00 : f32
    %15 = vector.broadcast %cst_15 : f32 to vector<8x32xf32>
    %16 = arith.maximumf %14, %15 : vector<8x32xf32>
    %17 = vector.extract_strided_slice %16 {offsets = [0, 0], sizes = [4, 32], strides = [1, 1]} : vector<8x32xf32> to vector<4x32xf32>
    %c0_16 = arith.constant 0 : index
    %c0_17 = arith.constant 0 : index
    %c0_18 = arith.constant 0 : index
    %c0_19 = arith.constant 0 : index
    %18 = vector.load %arg6[%c0_16, %c0_17, %c0_18, %c0_19] : memref<1x4x16x64xf32, #tpu.memory_space<vmem>>, vector<1x4x1x32xf32>
    %19 = vector.shape_cast %18 : vector<1x4x1x32xf32> to vector<4x32xf32>
    %20 = vector.shape_cast %17 : vector<4x32xf32> to vector<1x4x1x32xf32>
    tpu.vector_store %arg6[%c0_16, %c0_17, %c0_18, %c0_19], %20 {strides = array<i32>} : memref<1x4x16x64xf32, #tpu.memory_space<vmem>>, vector<1x4x1x32xf32>,
    %21 = vector.extract_strided_slice %16 {offsets = [4, 0], sizes = [4, 32], strides = [1, 1]} : vector<8x32xf32> to vector<4x32xf32>
    %c0_20 = arith.constant 0 : index
    %c0_21 = arith.constant 0 : index
    %c0_22 = arith.constant 0 : index
    %c32 = arith.constant 32 : index
    %22 = vector.load %arg6[%c0_20, %c0_21, %c0_22, %c32] : memref<1x4x16x64xf32, #tpu.memory_space<vmem>>, vector<1x4x1x32xf32>
    %23 = vector.shape_cast %22 : vector<1x4x1x32xf32> to vector<4x32xf32>
    %24 = vector.shape_cast %21 : vector<4x32xf32> to vector<1x4x1x32xf32>
    tpu.vector_store %arg6[%c0_20, %c0_21, %c0_22, %c32], %24 {strides = array<i32>} : memref<1x4x16x64xf32, #tpu.memory_space<vmem>>, vector<1x4x1x32xf32>,
    %c0_23 = arith.constant 0 : index
    %c0_24 = arith.constant 0 : index
    %c16 = arith.constant 16 : index
    %25 = vector.load %arg2[%c0_23, %c0_24, %c16] : memref<1x8x256xf32, #tpu.memory_space<vmem>>, vector<1x8x16xf32>
    %26 = vector.shape_cast %25 : vector<1x8x16xf32> to vector<8x16xf32>
    %c0_25 = arith.constant 0 : index
    %c0_26 = arith.constant 0 : index
    %c0_27 = arith.constant 0 : index
    %27 = vector.load %arg5[%c0_25, %c0_26, %c0_27] : memref<2x16x32xf32, #tpu.memory_space<vmem>>, vector<1x16x32xf32>
    %28 = vector.shape_cast %27 : vector<1x16x32xf32> to vector<16x32xf32>
    %cst_28 = arith.constant dense<0.000000e+00> : vector<8x32xf32>
    %29 = tpu.matmul %26, %28, %cst_28 {dimension_numbers = #tpu.dot_dimension_numbers<[1], [0], [0], [1], [0, 0, 1, 1], [], []>} : vector<8x16xf32>, vector<16x32xf32>, vector<8x32xf32> -> vector<8x32xf32>
    %c0_29 = arith.constant 0 : index
    %c0_30 = arith.constant 0 : index
    %30 = vector.load %arg3[%c0_29, %c0_30] : memref<8x16xf32, #tpu.memory_space<vmem>>, vector<8x8xf32>
    %cst_31 = arith.constant dense<0.000000e+00> : vector<8x32xf32>
    %31 = tpu.matmul %30, %29, %cst_31 {dimension_numbers = #tpu.dot_dimension_numbers<[1], [0], [0], [1], [0, 0, 1, 1], [], []>} : vector<8x8xf32>, vector<8x32xf32>, vector<8x32xf32> -> vector<8x32xf32>
    %c1_32 = arith.constant 1 : index
    %c0_33 = arith.constant 0 : index
    %c0_34 = arith.constant 0 : index
    %32 = vector.load %arg5[%c1_32, %c0_33, %c0_34] : memref<2x16x32xf32, #tpu.memory_space<vmem>>, vector<1x16x32xf32>
    %33 = vector.shape_cast %32 : vector<1x16x32xf32> to vector<16x32xf32>
    %cst_35 = arith.constant dense<0.000000e+00> : vector<8x32xf32>
    %34 = tpu.matmul %26, %33, %cst_35 {dimension_numbers = #tpu.dot_dimension_numbers<[1], [0], [0], [1], [0, 0, 1, 1], [], []>} : vector<8x16xf32>, vector<16x32xf32>, vector<8x32xf32> -> vector<8x32xf32>
    %c0_36 = arith.constant 0 : index
    %c8_37 = arith.constant 8 : index
    %35 = vector.load %arg3[%c0_36, %c8_37] : memref<8x16xf32, #tpu.memory_space<vmem>>, vector<8x8xf32>
    %cst_38 = arith.constant dense<0.000000e+00> : vector<8x32xf32>
    %36 = tpu.matmul %35, %34, %cst_38 {dimension_numbers = #tpu.dot_dimension_numbers<[1], [0], [0], [1], [0, 0, 1, 1], [], []>} : vector<8x8xf32>, vector<8x32xf32>, vector<8x32xf32> -> vector<8x32xf32>
    %37 = arith.addf %31, %36 : vector<8x32xf32>
    %c0_39 = arith.constant 0 : index
    %c0_40 = arith.constant 0 : index
    %38 = vector.load %arg4[%c0_39, %c0_40] : memref<8x32xf32, #tpu.memory_space<vmem>>, vector<8x32xf32>
    %39 = arith.addf %37, %38 : vector<8x32xf32>
    %cst_41 = arith.constant 0.000000e+00 : f32
    %40 = vector.broadcast %cst_41 : f32 to vector<8x32xf32>
    %41 = arith.maximumf %39, %40 : vector<8x32xf32>
    %42 = vector.extract_strided_slice %41 {offsets = [0, 0], sizes = [4, 32], strides = [1, 1]} : vector<8x32xf32> to vector<4x32xf32>
    %c0_42 = arith.constant 0 : index
    %c0_43 = arith.constant 0 : index
    %c1_44 = arith.constant 1 : index
    %c0_45 = arith.constant 0 : index
    %43 = vector.load %arg6[%c0_42, %c0_43, %c1_44, %c0_45] : memref<1x4x16x64xf32, #tpu.memory_space<vmem>>, vector<1x4x1x32xf32>
    %44 = vector.shape_cast %43 : vector<1x4x1x32xf32> to vector<4x32xf32>
    %45 = vector.shape_cast %42 : vector<4x32xf32> to vector<1x4x1x32xf32>
    tpu.vector_store %arg6[%c0_42, %c0_43, %c1_44, %c0_45], %45 {strides = array<i32>} : memref<1x4x16x64xf32, #tpu.memory_space<vmem>>, vector<1x4x1x32xf32>,
    %46 = vector.extract_strided_slice %41 {offsets = [4, 0], sizes = [4, 32], strides = [1, 1]} : vector<8x32xf32> to vector<4x32xf32>
    %c0_46 = arith.constant 0 : index
    %c0_47 = arith.constant 0 : index
    %c1_48 = arith.constant 1 : index
    %c32_49 = arith.constant 32 : index
    %47 = vector.load %arg6[%c0_46, %c0_47, %c1_48, %c32_49] : memref<1x4x16x64xf32, #tpu.memory_space<vmem>>, vector<1x4x1x32xf32>
    %48 = vector.shape_cast %47 : vector<1x4x1x32xf32> to vector<4x32xf32>
    %49 = vector.shape_cast %46 : vector<4x32xf32> to vector<1x4x1x32xf32>
    tpu.vector_store %arg6[%c0_46, %c0_47, %c1_48, %c32_49], %49 {strides = array<i32>} : memref<1x4x16x64xf32, #tpu.memory_space<vmem>>, vector<1x4x1x32xf32>,
    %c0_50 = arith.constant 0 : index
    %c0_51 = arith.constant 0 : index
    %c32_52 = arith.constant 32 : index
    %50 = vector.load %arg2[%c0_50, %c0_51, %c32_52] : memref<1x8x256xf32, #tpu.memory_space<vmem>>, vector<1x8x16xf32>
    %51 = vector.shape_cast %50 : vector<1x8x16xf32> to vector<8x16xf32>
    %c0_53 = arith.constant 0 : index
    %c0_54 = arith.constant 0 : index
    %c0_55 = arith.constant 0 : index
    %52 = vector.load %arg5[%c0_53, %c0_54, %c0_55] : memref<2x16x32xf32, #tpu.memory_space<vmem>>, vector<1x16x32xf32>
    %53 = vector.shape_cast %52 : vector<1x16x32xf32> to vector<16x32xf32>
    %cst_56 = arith.constant dense<0.000000e+00> : vector<8x32xf32>
    %54 = tpu.matmul %51, %53, %cst_56 {dimension_numbers = #tpu.dot_dimension_numbers<[1], [0], [0], [1], [0, 0, 1, 1], [], []>} : vector<8x16xf32>, vector<16x32xf32>, vector<8x32xf32> -> vector<8x32xf32>
    %c0_57 = arith.constant 0 : index
    %c0_58 = arith.constant 0 : index
    %55 = vector.load %arg3[%c0_57, %c0_58] : memref<8x16xf32, #tpu.memory_space<vmem>>, vector<8x8xf32>
    %cst_59 = arith.constant dense<0.000000e+00> : vector<8x32xf32>
    %56 = tpu.matmul %55, %54, %cst_59 {dimension_numbers = #tpu.dot_dimension_numbers<[1], [0], [0], [1], [0, 0, 1, 1], [], []>} : vector<8x8xf32>, vector<8x32xf32>, vector<8x32xf32> -> vector<8x32xf32>
    %c1_60 = arith.constant 1 : index
    %c0_61 = arith.constant 0 : index
    %c0_62 = arith.constant 0 : index
    %57 = vector.load %arg5[%c1_60, %c0_61, %c0_62] : memref<2x16x32xf32, #tpu.memory_space<vmem>>, vector<1x16x32xf32>
    %58 = vector.shape_cast %57 : vector<1x16x32xf32> to vector<16x32xf32>
    %cst_63 = arith.constant dense<0.000000e+00> : vector<8x32xf32>
    %59 = tpu.matmul %51, %58, %cst_63 {dimension_numbers = #tpu.dot_dimension_numbers<[1], [0], [0], [1], [0, 0, 1, 1], [], []>} : vector<8x16xf32>, vector<16x32xf32>, vector<8x32xf32> -> vector<8x32xf32>
    %c0_64 = arith.constant 0 : index
    %c8_65 = arith.constant 8 : index
    %60 = vector.load %arg3[%c0_64, %c8_65] : memref<8x16xf32, #tpu.memory_space<vmem>>, vector<8x8xf32>
    %cst_66 = arith.constant dense<0.000000e+00> : vector<8x32xf32>
    %61 = tpu.matmul %60, %59, %cst_66 {dimension_numbers = #tpu.dot_dimension_numbers<[1], [0], [0], [1], [0, 0, 1, 1], [], []>} : vector<8x8xf32>, vector<8x32xf32>, vector<8x32xf32> -> vector<8x32xf32>
    %62 = arith.addf %56, %61 : vector<8x32xf32>
    %c0_67 = arith.constant 0 : index
    %c0_68 = arith.constant 0 : index
    %63 = vector.load %arg4[%c0_67, %c0_68] : memref<8x32xf32, #tpu.memory_space<vmem>>, vector<8x32xf32>
    %64 = arith.addf %62, %63 : vector<8x32xf32>
    %cst_69 = arith.constant 0.000000e+00 : f32
    %65 = vector.broadcast %cst_69 : f32 to vector<8x32xf32>
    %66 = arith.maximumf %64, %65 : vector<8x32xf32>
    %67 = vector.extract_strided_slice %66 {offsets = [0, 0], sizes = [4, 32], strides = [1, 1]} : vector<8x32xf32> to vector<4x32xf32>
    %c0_70 = arith.constant 0 : index
    %c0_71 = arith.constant 0 : index
    %c2 = arith.constant 2 : index
    %c0_72 = arith.constant 0 : index
    %68 = vector.load %arg6[%c0_70, %c0_71, %c2, %c0_72] : memref<1x4x16x64xf32, #tpu.memory_space<vmem>>, vector<1x4x1x32xf32>
    %69 = vector.shape_cast %68 : vector<1x4x1x32xf32> to vector<4x32xf32>
    %70 = vector.shape_cast %67 : vector<4x32xf32> to vector<1x4x1x32xf32>
    tpu.vector_store %arg6[%c0_70, %c0_71, %c2, %c0_72], %70 {strides = array<i32>} : memref<1x4x16x64xf32, #tpu.memory_space<vmem>>, vector<1x4x1x32xf32>,
    %71 = vector.extract_strided_slice %66 {offsets = [4, 0], sizes = [4, 32], strides = [1, 1]} : vector<8x32xf32> to vector<4x32xf32>
    %c0_73 = arith.constant 0 : index
    %c0_74 = arith.constant 0 : index
    %c2_75 = arith.constant 2 : index
    %c32_76 = arith.constant 32 : index
    %72 = vector.load %arg6[%c0_73, %c0_74, %c2_75, %c32_76] : memref<1x4x16x64xf32, #tpu.memory_space<vmem>>, vector<1x4x1x32xf32>
    %73 = vector.shape_cast %72 : vector<1x4x1x32xf32> to vector<4x32xf32>
    %74 = vector.shape_cast %71 : vector<4x32xf32> to vector<1x4x1x32xf32>
    tpu.vector_store %arg6[%c0_73, %c0_74, %c2_75, %c32_76], %74 {strides = array<i32>} : memref<1x4x16x64xf32, #tpu.memory_space<vmem>>, vector<1x4x1x32xf32>,
    %c0_77 = arith.constant 0 : index
    %c0_78 = arith.constant 0 : index
    %c48 = arith.constant 48 : index
    %75 = vector.load %arg2[%c0_77, %c0_78, %c48] : memref<1x8x256xf32, #tpu.memory_space<vmem>>, vector<1x8x16xf32>
    %76 = vector.shape_cast %75 : vector<1x8x16xf32> to vector<8x16xf32>
    %c0_79 = arith.constant 0 : index
    %c0_80 = arith.constant 0 : index
    %c0_81 = arith.constant 0 : index
    %77 = vector.load %arg5[%c0_79, %c0_80, %c0_81] : memref<2x16x32xf32, #tpu.memory_space<vmem>>, vector<1x16x32xf32>
    %78 = vector.shape_cast %77 : vector<1x16x32xf32> to vector<16x32xf32>
    %cst_82 = arith.constant dense<0.000000e+00> : vector<8x32xf32>
    %79 = tpu.matmul %76, %78, %cst_82 {dimension_numbers = #tpu.dot_dimension_numbers<[1], [0], [0], [1], [0, 0, 1, 1], [], []>} : vector<8x16xf32>, vector<16x32xf32>, vector<8x32xf32> -> vector<8x32xf32>
    %c0_83 = arith.constant 0 : index
    %c0_84 = arith.constant 0 : index
    %80 = vector.load %arg3[%c0_83, %c0_84] : memref<8x16xf32, #tpu.memory_space<vmem>>, vector<8x8xf32>
    %cst_85 = arith.constant dense<0.000000e+00> : vector<8x32xf32>
    %81 = tpu.matmul %80, %79, %cst_85 {dimension_numbers = #tpu.dot_dimension_numbers<[1], [0], [0], [1], [0, 0, 1, 1], [], []>} : vector<8x8xf32>, vector<8x32xf32>, vector<8x32xf32> -> vector<8x32xf32>
    %c1_86 = arith.constant 1 : index
    %c0_87 = arith.constant 0 : index
    %c0_88 = arith.constant 0 : index
    %82 = vector.load %arg5[%c1_86, %c0_87, %c0_88] : memref<2x16x32xf32, #tpu.memory_space<vmem>>, vector<1x16x32xf32>
    %83 = vector.shape_cast %82 : vector<1x16x32xf32> to vector<16x32xf32>
    %cst_89 = arith.constant dense<0.000000e+00> : vector<8x32xf32>
    %84 = tpu.matmul %76, %83, %cst_89 {dimension_numbers = #tpu.dot_dimension_numbers<[1], [0], [0], [1], [0, 0, 1, 1], [], []>} : vector<8x16xf32>, vector<16x32xf32>, vector<8x32xf32> -> vector<8x32xf32>
    %c0_90 = arith.constant 0 : index
    %c8_91 = arith.constant 8 : index
    %85 = vector.load %arg3[%c0_90, %c8_91] : memref<8x16xf32, #tpu.memory_space<vmem>>, vector<8x8xf32>
    %cst_92 = arith.constant dense<0.000000e+00> : vector<8x32xf32>
    %86 = tpu.matmul %85, %84, %cst_92 {dimension_numbers = #tpu.dot_dimension_numbers<[1], [0], [0], [1], [0, 0, 1, 1], [], []>} : vector<8x8xf32>, vector<8x32xf32>, vector<8x32xf32> -> vector<8x32xf32>
    %87 = arith.addf %81, %86 : vector<8x32xf32>
    %c0_93 = arith.constant 0 : index
    %c0_94 = arith.constant 0 : index
    %88 = vector.load %arg4[%c0_93, %c0_94] : memref<8x32xf32, #tpu.memory_space<vmem>>, vector<8x32xf32>
    %89 = arith.addf %87, %88 : vector<8x32xf32>
    %cst_95 = arith.constant 0.000000e+00 : f32
    %90 = vector.broadcast %cst_95 : f32 to vector<8x32xf32>
    %91 = arith.maximumf %89, %90 : vector<8x32xf32>
    %92 = vector.extract_strided_slice %91 {offsets = [0, 0], sizes = [4, 32], strides = [1, 1]} : vector<8x32xf32> to vector<4x32xf32>
    %c0_96 = arith.constant 0 : index
    %c0_97 = arith.constant 0 : index
    %c3 = arith.constant 3 : index
    %c0_98 = arith.constant 0 : index
    %93 = vector.load %arg6[%c0_96, %c0_97, %c3, %c0_98] : memref<1x4x16x64xf32, #tpu.memory_space<vmem>>, vector<1x4x1x32xf32>
    %94 = vector.shape_cast %93 : vector<1x4x1x32xf32> to vector<4x32xf32>
    %95 = vector.shape_cast %92 : vector<4x32xf32> to vector<1x4x1x32xf32>
    tpu.vector_store %arg6[%c0_96, %c0_97, %c3, %c0_98], %95 {strides = array<i32>} : memref<1x4x16x64xf32, #tpu.memory_space<vmem>>, vector<1x4x1x32xf32>,
    %96 = vector.extract_strided_slice %91 {offsets = [4, 0], sizes = [4, 32], strides = [1, 1]} : vector<8x32xf32> to vector<4x32xf32>
    %c0_99 = arith.constant 0 : index
    %c0_100 = arith.constant 0 : index
    %c3_101 = arith.constant 3 : index
    %c32_102 = arith.constant 32 : index
    %97 = vector.load %arg6[%c0_99, %c0_100, %c3_101, %c32_102] : memref<1x4x16x64xf32, #tpu.memory_space<vmem>>, vector<1x4x1x32xf32>
    %98 = vector.shape_cast %97 : vector<1x4x1x32xf32> to vector<4x32xf32>
    %99 = vector.shape_cast %96 : vector<4x32xf32> to vector<1x4x1x32xf32>
    tpu.vector_store %arg6[%c0_99, %c0_100, %c3_101, %c32_102], %99 {strides = array<i32>} : memref<1x4x16x64xf32, #tpu.memory_space<vmem>>, vector<1x4x1x32xf32>,
    %c0_103 = arith.constant 0 : index
    %c0_104 = arith.constant 0 : index
    %c64 = arith.constant 64 : index
    %100 = vector.load %arg2[%c0_103, %c0_104, %c64] : memref<1x8x256xf32, #tpu.memory_space<vmem>>, vector<1x8x16xf32>
    %101 = vector.shape_cast %100 : vector<1x8x16xf32> to vector<8x16xf32>
    %c0_105 = arith.constant 0 : index
    %c0_106 = arith.constant 0 : index
    %c0_107 = arith.constant 0 : index
    %102 = vector.load %arg5[%c0_105, %c0_106, %c0_107] : memref<2x16x32xf32, #tpu.memory_space<vmem>>, vector<1x16x32xf32>
    %103 = vector.shape_cast %102 : vector<1x16x32xf32> to vector<16x32xf32>
    %cst_108 = arith.constant dense<0.000000e+00> : vector<8x32xf32>
    %104 = tpu.matmul %101, %103, %cst_108 {dimension_numbers = #tpu.dot_dimension_numbers<[1], [0], [0], [1], [0, 0, 1, 1], [], []>} : vector<8x16xf32>, vector<16x32xf32>, vector<8x32xf32> -> vector<8x32xf32>
    %c0_109 = arith.constant 0 : index
    %c0_110 = arith.constant 0 : index
    %105 = vector.load %arg3[%c0_109, %c0_110] : memref<8x16xf32, #tpu.memory_space<vmem>>, vector<8x8xf32>
    %cst_111 = arith.constant dense<0.000000e+00> : vector<8x32xf32>
    %106 = tpu.matmul %105, %104, %cst_111 {dimension_numbers = #tpu.dot_dimension_numbers<[1], [0], [0], [1], [0, 0, 1, 1], [], []>} : vector<8x8xf32>, vector<8x32xf32>, vector<8x32xf32> -> vector<8x32xf32>
    %c1_112 = arith.constant 1 : index
    %c0_113 = arith.constant 0 : index
    %c0_114 = arith.constant 0 : index
    %107 = vector.load %arg5[%c1_112, %c0_113, %c0_114] : memref<2x16x32xf32, #tpu.memory_space<vmem>>, vector<1x16x32xf32>
    %108 = vector.shape_cast %107 : vector<1x16x32xf32> to vector<16x32xf32>
    %cst_115 = arith.constant dense<0.000000e+00> : vector<8x32xf32>
    %109 = tpu.matmul %101, %108, %cst_115 {dimension_numbers = #tpu.dot_dimension_numbers<[1], [0], [0], [1], [0, 0, 1, 1], [], []>} : vector<8x16xf32>, vector<16x32xf32>, vector<8x32xf32> -> vector<8x32xf32>
    %c0_116 = arith.constant 0 : index
    %c8_117 = arith.constant 8 : index
    %110 = vector.load %arg3[%c0_116, %c8_117] : memref<8x16xf32, #tpu.memory_space<vmem>>, vector<8x8xf32>
    %cst_118 = arith.constant dense<0.000000e+00> : vector<8x32xf32>
    %111 = tpu.matmul %110, %109, %cst_118 {dimension_numbers = #tpu.dot_dimension_numbers<[1], [0], [0], [1], [0, 0, 1, 1], [], []>} : vector<8x8xf32>, vector<8x32xf32>, vector<8x32xf32> -> vector<8x32xf32>
    %112 = arith.addf %106, %111 : vector<8x32xf32>
    %c0_119 = arith.constant 0 : index
    %c0_120 = arith.constant 0 : index
    %113 = vector.load %arg4[%c0_119, %c0_120] : memref<8x32xf32, #tpu.memory_space<vmem>>, vector<8x32xf32>
    %114 = arith.addf %112, %113 : vector<8x32xf32>
    %cst_121 = arith.constant 0.000000e+00 : f32
    %115 = vector.broadcast %cst_121 : f32 to vector<8x32xf32>
    %116 = arith.maximumf %114, %115 : vector<8x32xf32>
    %117 = vector.extract_strided_slice %116 {offsets = [0, 0], sizes = [4, 32], strides = [1, 1]} : vector<8x32xf32> to vector<4x32xf32>
    %c0_122 = arith.constant 0 : index
    %c0_123 = arith.constant 0 : index
    %c4 = arith.constant 4 : index
    %c0_124 = arith.constant 0 : index
    %118 = vector.load %arg6[%c0_122, %c0_123, %c4, %c0_124] : memref<1x4x16x64xf32, #tpu.memory_space<vmem>>, vector<1x4x1x32xf32>
    %119 = vector.shape_cast %118 : vector<1x4x1x32xf32> to vector<4x32xf32>
    %120 = vector.shape_cast %117 : vector<4x32xf32> to vector<1x4x1x32xf32>
    tpu.vector_store %arg6[%c0_122, %c0_123, %c4, %c0_124], %120 {strides = array<i32>} : memref<1x4x16x64xf32, #tpu.memory_space<vmem>>, vector<1x4x1x32xf32>,
    %121 = vector.extract_strided_slice %116 {offsets = [4, 0], sizes = [4, 32], strides = [1, 1]} : vector<8x32xf32> to vector<4x32xf32>
    %c0_125 = arith.constant 0 : index
    %c0_126 = arith.constant 0 : index
    %c4_127 = arith.constant 4 : index
    %c32_128 = arith.constant 32 : index
    %122 = vector.load %arg6[%c0_125, %c0_126, %c4_127, %c32_128] : memref<1x4x16x64xf32, #tpu.memory_space<vmem>>, vector<1x4x1x32xf32>
    %123 = vector.shape_cast %122 : vector<1x4x1x32xf32> to vector<4x32xf32>
    %124 = vector.shape_cast %121 : vector<4x32xf32> to vector<1x4x1x32xf32>
    tpu.vector_store %arg6[%c0_125, %c0_126, %c4_127, %c32_128], %124 {strides = array<i32>} : memref<1x4x16x64xf32, #tpu.memory_space<vmem>>, vector<1x4x1x32xf32>,
    %c0_129 = arith.constant 0 : index
    %c0_130 = arith.constant 0 : index
    %c80 = arith.constant 80 : index
    %125 = vector.load %arg2[%c0_129, %c0_130, %c80] : memref<1x8x256xf32, #tpu.memory_space<vmem>>, vector<1x8x16xf32>
    %126 = vector.shape_cast %125 : vector<1x8x16xf32> to vector<8x16xf32>
    %c0_131 = arith.constant 0 : index
    %c0_132 = arith.constant 0 : index
    %c0_133 = arith.constant 0 : index
    %127 = vector.load %arg5[%c0_131, %c0_132, %c0_133] : memref<2x16x32xf32, #tpu.memory_space<vmem>>, vector<1x16x32xf32>
    %128 = vector.shape_cast %127 : vector<1x16x32xf32> to vector<16x32xf32>
    %cst_134 = arith.constant dense<0.000000e+00> : vector<8x32xf32>
    %129 = tpu.matmul %126, %128, %cst_134 {dimension_numbers = #tpu.dot_dimension_numbers<[1], [0], [0], [1], [0, 0, 1, 1], [], []>} : vector<8x16xf32>, vector<16x32xf32>, vector<8x32xf32> -> vector<8x32xf32>
    %c0_135 = arith.constant 0 : index
    %c0_136 = arith.constant 0 : index
    %130 = vector.load %arg3[%c0_135, %c0_136] : memref<8x16xf32, #tpu.memory_space<vmem>>, vector<8x8xf32>
    %cst_137 = arith.constant dense<0.000000e+00> : vector<8x32xf32>
    %131 = tpu.matmul %130, %129, %cst_137 {dimension_numbers = #tpu.dot_dimension_numbers<[1], [0], [0], [1], [0, 0, 1, 1], [], []>} : vector<8x8xf32>, vector<8x32xf32>, vector<8x32xf32> -> vector<8x32xf32>
    %c1_138 = arith.constant 1 : index
    %c0_139 = arith.constant 0 : index
    %c0_140 = arith.constant 0 : index
    %132 = vector.load %arg5[%c1_138, %c0_139, %c0_140] : memref<2x16x32xf32, #tpu.memory_space<vmem>>, vector<1x16x32xf32>
    %133 = vector.shape_cast %132 : vector<1x16x32xf32> to vector<16x32xf32>
    %cst_141 = arith.constant dense<0.000000e+00> : vector<8x32xf32>
    %134 = tpu.matmul %126, %133, %cst_141 {dimension_numbers = #tpu.dot_dimension_numbers<[1], [0], [0], [1], [0, 0, 1, 1], [], []>} : vector<8x16xf32>, vector<16x32xf32>, vector<8x32xf32> -> vector<8x32xf32>
    %c0_142 = arith.constant 0 : index
    %c8_143 = arith.constant 8 : index
    %135 = vector.load %arg3[%c0_142, %c8_143] : memref<8x16xf32, #tpu.memory_space<vmem>>, vector<8x8xf32>
    %cst_144 = arith.constant dense<0.000000e+00> : vector<8x32xf32>
    %136 = tpu.matmul %135, %134, %cst_144 {dimension_numbers = #tpu.dot_dimension_numbers<[1], [0], [0], [1], [0, 0, 1, 1], [], []>} : vector<8x8xf32>, vector<8x32xf32>, vector<8x32xf32> -> vector<8x32xf32>
    %137 = arith.addf %131, %136 : vector<8x32xf32>
    %c0_145 = arith.constant 0 : index
    %c0_146 = arith.constant 0 : index
    %138 = vector.load %arg4[%c0_145, %c0_146] : memref<8x32xf32, #tpu.memory_space<vmem>>, vector<8x32xf32>
    %139 = arith.addf %137, %138 : vector<8x32xf32>
    %cst_147 = arith.constant 0.000000e+00 : f32
    %140 = vector.broadcast %cst_147 : f32 to vector<8x32xf32>
    %141 = arith.maximumf %139, %140 : vector<8x32xf32>
    %142 = vector.extract_strided_slice %141 {offsets = [0, 0], sizes = [4, 32], strides = [1, 1]} : vector<8x32xf32> to vector<4x32xf32>
    %c0_148 = arith.constant 0 : index
    %c0_149 = arith.constant 0 : index
    %c5 = arith.constant 5 : index
    %c0_150 = arith.constant 0 : index
    %143 = vector.load %arg6[%c0_148, %c0_149, %c5, %c0_150] : memref<1x4x16x64xf32, #tpu.memory_space<vmem>>, vector<1x4x1x32xf32>
    %144 = vector.shape_cast %143 : vector<1x4x1x32xf32> to vector<4x32xf32>
    %145 = vector.shape_cast %142 : vector<4x32xf32> to vector<1x4x1x32xf32>
    tpu.vector_store %arg6[%c0_148, %c0_149, %c5, %c0_150], %145 {strides = array<i32>} : memref<1x4x16x64xf32, #tpu.memory_space<vmem>>, vector<1x4x1x32xf32>,
    %146 = vector.extract_strided_slice %141 {offsets = [4, 0], sizes = [4, 32], strides = [1, 1]} : vector<8x32xf32> to vector<4x32xf32>
    %c0_151 = arith.constant 0 : index
    %c0_152 = arith.constant 0 : index
    %c5_153 = arith.constant 5 : index
    %c32_154 = arith.constant 32 : index
    %147 = vector.load %arg6[%c0_151, %c0_152, %c5_153, %c32_154] : memref<1x4x16x64xf32, #tpu.memory_space<vmem>>, vector<1x4x1x32xf32>
    %148 = vector.shape_cast %147 : vector<1x4x1x32xf32> to vector<4x32xf32>
    %149 = vector.shape_cast %146 : vector<4x32xf32> to vector<1x4x1x32xf32>
    tpu.vector_store %arg6[%c0_151, %c0_152, %c5_153, %c32_154], %149 {strides = array<i32>} : memref<1x4x16x64xf32, #tpu.memory_space<vmem>>, vector<1x4x1x32xf32>,
    %c0_155 = arith.constant 0 : index
    %c0_156 = arith.constant 0 : index
    %c96 = arith.constant 96 : index
    %150 = vector.load %arg2[%c0_155, %c0_156, %c96] : memref<1x8x256xf32, #tpu.memory_space<vmem>>, vector<1x8x16xf32>
    %151 = vector.shape_cast %150 : vector<1x8x16xf32> to vector<8x16xf32>
    %c0_157 = arith.constant 0 : index
    %c0_158 = arith.constant 0 : index
    %c0_159 = arith.constant 0 : index
    %152 = vector.load %arg5[%c0_157, %c0_158, %c0_159] : memref<2x16x32xf32, #tpu.memory_space<vmem>>, vector<1x16x32xf32>
    %153 = vector.shape_cast %152 : vector<1x16x32xf32> to vector<16x32xf32>
    %cst_160 = arith.constant dense<0.000000e+00> : vector<8x32xf32>
    %154 = tpu.matmul %151, %153, %cst_160 {dimension_numbers = #tpu.dot_dimension_numbers<[1], [0], [0], [1], [0, 0, 1, 1], [], []>} : vector<8x16xf32>, vector<16x32xf32>, vector<8x32xf32> -> vector<8x32xf32>
    %c0_161 = arith.constant 0 : index
    %c0_162 = arith.constant 0 : index
    %155 = vector.load %arg3[%c0_161, %c0_162] : memref<8x16xf32, #tpu.memory_space<vmem>>, vector<8x8xf32>
    %cst_163 = arith.constant dense<0.000000e+00> : vector<8x32xf32>
    %156 = tpu.matmul %155, %154, %cst_163 {dimension_numbers = #tpu.dot_dimension_numbers<[1], [0], [0], [1], [0, 0, 1, 1], [], []>} : vector<8x8xf32>, vector<8x32xf32>, vector<8x32xf32> -> vector<8x32xf32>
    %c1_164 = arith.constant 1 : index
    %c0_165 = arith.constant 0 : index
    %c0_166 = arith.constant 0 : index
    %157 = vector.load %arg5[%c1_164, %c0_165, %c0_166] : memref<2x16x32xf32, #tpu.memory_space<vmem>>, vector<1x16x32xf32>
    %158 = vector.shape_cast %157 : vector<1x16x32xf32> to vector<16x32xf32>
    %cst_167 = arith.constant dense<0.000000e+00> : vector<8x32xf32>
    %159 = tpu.matmul %151, %158, %cst_167 {dimension_numbers = #tpu.dot_dimension_numbers<[1], [0], [0], [1], [0, 0, 1, 1], [], []>} : vector<8x16xf32>, vector<16x32xf32>, vector<8x32xf32> -> vector<8x32xf32>
    %c0_168 = arith.constant 0 : index
    %c8_169 = arith.constant 8 : index
    %160 = vector.load %arg3[%c0_168, %c8_169] : memref<8x16xf32, #tpu.memory_space<vmem>>, vector<8x8xf32>
    %cst_170 = arith.constant dense<0.000000e+00> : vector<8x32xf32>
    %161 = tpu.matmul %160, %159, %cst_170 {dimension_numbers = #tpu.dot_dimension_numbers<[1], [0], [0], [1], [0, 0, 1, 1], [], []>} : vector<8x8xf32>, vector<8x32xf32>, vector<8x32xf32> -> vector<8x32xf32>
    %162 = arith.addf %156, %161 : vector<8x32xf32>
    %c0_171 = arith.constant 0 : index
    %c0_172 = arith.constant 0 : index
    %163 = vector.load %arg4[%c0_171, %c0_172] : memref<8x32xf32, #tpu.memory_space<vmem>>, vector<8x32xf32>
    %164 = arith.addf %162, %163 : vector<8x32xf32>
    %cst_173 = arith.constant 0.000000e+00 : f32
    %165 = vector.broadcast %cst_173 : f32 to vector<8x32xf32>
    %166 = arith.maximumf %164, %165 : vector<8x32xf32>
    %167 = vector.extract_strided_slice %166 {offsets = [0, 0], sizes = [4, 32], strides = [1, 1]} : vector<8x32xf32> to vector<4x32xf32>
    %c0_174 = arith.constant 0 : index
    %c0_175 = arith.constant 0 : index
    %c6 = arith.constant 6 : index
    %c0_176 = arith.constant 0 : index
    %168 = vector.load %arg6[%c0_174, %c0_175, %c6, %c0_176] : memref<1x4x16x64xf32, #tpu.memory_space<vmem>>, vector<1x4x1x32xf32>
    %169 = vector.shape_cast %168 : vector<1x4x1x32xf32> to vector<4x32xf32>
    %170 = vector.shape_cast %167 : vector<4x32xf32> to vector<1x4x1x32xf32>
    tpu.vector_store %arg6[%c0_174, %c0_175, %c6, %c0_176], %170 {strides = array<i32>} : memref<1x4x16x64xf32, #tpu.memory_space<vmem>>, vector<1x4x1x32xf32>,
    %171 = vector.extract_strided_slice %166 {offsets = [4, 0], sizes = [4, 32], strides = [1, 1]} : vector<8x32xf32> to vector<4x32xf32>
    %c0_177 = arith.constant 0 : index
    %c0_178 = arith.constant 0 : index
    %c6_179 = arith.constant 6 : index
    %c32_180 = arith.constant 32 : index
    %172 = vector.load %arg6[%c0_177, %c0_178, %c6_179, %c32_180] : memref<1x4x16x64xf32, #tpu.memory_space<vmem>>, vector<1x4x1x32xf32>
    %173 = vector.shape_cast %172 : vector<1x4x1x32xf32> to vector<4x32xf32>
    %174 = vector.shape_cast %171 : vector<4x32xf32> to vector<1x4x1x32xf32>
    tpu.vector_store %arg6[%c0_177, %c0_178, %c6_179, %c32_180], %174 {strides = array<i32>} : memref<1x4x16x64xf32, #tpu.memory_space<vmem>>, vector<1x4x1x32xf32>,
    %c0_181 = arith.constant 0 : index
    %c0_182 = arith.constant 0 : index
    %c112 = arith.constant 112 : index
    %175 = vector.load %arg2[%c0_181, %c0_182, %c112] : memref<1x8x256xf32, #tpu.memory_space<vmem>>, vector<1x8x16xf32>
    %176 = vector.shape_cast %175 : vector<1x8x16xf32> to vector<8x16xf32>
    %c0_183 = arith.constant 0 : index
    %c0_184 = arith.constant 0 : index
    %c0_185 = arith.constant 0 : index
    %177 = vector.load %arg5[%c0_183, %c0_184, %c0_185] : memref<2x16x32xf32, #tpu.memory_space<vmem>>, vector<1x16x32xf32>
    %178 = vector.shape_cast %177 : vector<1x16x32xf32> to vector<16x32xf32>
    %cst_186 = arith.constant dense<0.000000e+00> : vector<8x32xf32>
    %179 = tpu.matmul %176, %178, %cst_186 {dimension_numbers = #tpu.dot_dimension_numbers<[1], [0], [0], [1], [0, 0, 1, 1], [], []>} : vector<8x16xf32>, vector<16x32xf32>, vector<8x32xf32> -> vector<8x32xf32>
    %c0_187 = arith.constant 0 : index
    %c0_188 = arith.constant 0 : index
    %180 = vector.load %arg3[%c0_187, %c0_188] : memref<8x16xf32, #tpu.memory_space<vmem>>, vector<8x8xf32>
    %cst_189 = arith.constant dense<0.000000e+00> : vector<8x32xf32>
    %181 = tpu.matmul %180, %179, %cst_189 {dimension_numbers = #tpu.dot_dimension_numbers<[1], [0], [0], [1], [0, 0, 1, 1], [], []>} : vector<8x8xf32>, vector<8x32xf32>, vector<8x32xf32> -> vector<8x32xf32>
    %c1_190 = arith.constant 1 : index
    %c0_191 = arith.constant 0 : index
    %c0_192 = arith.constant 0 : index
    %182 = vector.load %arg5[%c1_190, %c0_191, %c0_192] : memref<2x16x32xf32, #tpu.memory_space<vmem>>, vector<1x16x32xf32>
    %183 = vector.shape_cast %182 : vector<1x16x32xf32> to vector<16x32xf32>
    %cst_193 = arith.constant dense<0.000000e+00> : vector<8x32xf32>
    %184 = tpu.matmul %176, %183, %cst_193 {dimension_numbers = #tpu.dot_dimension_numbers<[1], [0], [0], [1], [0, 0, 1, 1], [], []>} : vector<8x16xf32>, vector<16x32xf32>, vector<8x32xf32> -> vector<8x32xf32>
    %c0_194 = arith.constant 0 : index
    %c8_195 = arith.constant 8 : index
    %185 = vector.load %arg3[%c0_194, %c8_195] : memref<8x16xf32, #tpu.memory_space<vmem>>, vector<8x8xf32>
    %cst_196 = arith.constant dense<0.000000e+00> : vector<8x32xf32>
    %186 = tpu.matmul %185, %184, %cst_196 {dimension_numbers = #tpu.dot_dimension_numbers<[1], [0], [0], [1], [0, 0, 1, 1], [], []>} : vector<8x8xf32>, vector<8x32xf32>, vector<8x32xf32> -> vector<8x32xf32>
    %187 = arith.addf %181, %186 : vector<8x32xf32>
    %c0_197 = arith.constant 0 : index
    %c0_198 = arith.constant 0 : index
    %188 = vector.load %arg4[%c0_197, %c0_198] : memref<8x32xf32, #tpu.memory_space<vmem>>, vector<8x32xf32>
    %189 = arith.addf %187, %188 : vector<8x32xf32>
    %cst_199 = arith.constant 0.000000e+00 : f32
    %190 = vector.broadcast %cst_199 : f32 to vector<8x32xf32>
    %191 = arith.maximumf %189, %190 : vector<8x32xf32>
    %192 = vector.extract_strided_slice %191 {offsets = [0, 0], sizes = [4, 32], strides = [1, 1]} : vector<8x32xf32> to vector<4x32xf32>
    %c0_200 = arith.constant 0 : index
    %c0_201 = arith.constant 0 : index
    %c7 = arith.constant 7 : index
    %c0_202 = arith.constant 0 : index
    %193 = vector.load %arg6[%c0_200, %c0_201, %c7, %c0_202] : memref<1x4x16x64xf32, #tpu.memory_space<vmem>>, vector<1x4x1x32xf32>
    %194 = vector.shape_cast %193 : vector<1x4x1x32xf32> to vector<4x32xf32>
    %195 = vector.shape_cast %192 : vector<4x32xf32> to vector<1x4x1x32xf32>
    tpu.vector_store %arg6[%c0_200, %c0_201, %c7, %c0_202], %195 {strides = array<i32>} : memref<1x4x16x64xf32, #tpu.memory_space<vmem>>, vector<1x4x1x32xf32>,
    %196 = vector.extract_strided_slice %191 {offsets = [4, 0], sizes = [4, 32], strides = [1, 1]} : vector<8x32xf32> to vector<4x32xf32>
    %c0_203 = arith.constant 0 : index
    %c0_204 = arith.constant 0 : index
    %c7_205 = arith.constant 7 : index
    %c32_206 = arith.constant 32 : index
    %197 = vector.load %arg6[%c0_203, %c0_204, %c7_205, %c32_206] : memref<1x4x16x64xf32, #tpu.memory_space<vmem>>, vector<1x4x1x32xf32>
    %198 = vector.shape_cast %197 : vector<1x4x1x32xf32> to vector<4x32xf32>
    %199 = vector.shape_cast %196 : vector<4x32xf32> to vector<1x4x1x32xf32>
    tpu.vector_store %arg6[%c0_203, %c0_204, %c7_205, %c32_206], %199 {strides = array<i32>} : memref<1x4x16x64xf32, #tpu.memory_space<vmem>>, vector<1x4x1x32xf32>,
    %c0_207 = arith.constant 0 : index
    %c0_208 = arith.constant 0 : index
    %c128 = arith.constant 128 : index
    %200 = vector.load %arg2[%c0_207, %c0_208, %c128] : memref<1x8x256xf32, #tpu.memory_space<vmem>>, vector<1x8x16xf32>
    %201 = vector.shape_cast %200 : vector<1x8x16xf32> to vector<8x16xf32>
    %c0_209 = arith.constant 0 : index
    %c0_210 = arith.constant 0 : index
    %c0_211 = arith.constant 0 : index
    %202 = vector.load %arg5[%c0_209, %c0_210, %c0_211] : memref<2x16x32xf32, #tpu.memory_space<vmem>>, vector<1x16x32xf32>
    %203 = vector.shape_cast %202 : vector<1x16x32xf32> to vector<16x32xf32>
    %cst_212 = arith.constant dense<0.000000e+00> : vector<8x32xf32>
    %204 = tpu.matmul %201, %203, %cst_212 {dimension_numbers = #tpu.dot_dimension_numbers<[1], [0], [0], [1], [0, 0, 1, 1], [], []>} : vector<8x16xf32>, vector<16x32xf32>, vector<8x32xf32> -> vector<8x32xf32>
    %c0_213 = arith.constant 0 : index
    %c0_214 = arith.constant 0 : index
    %205 = vector.load %arg3[%c0_213, %c0_214] : memref<8x16xf32, #tpu.memory_space<vmem>>, vector<8x8xf32>
    %cst_215 = arith.constant dense<0.000000e+00> : vector<8x32xf32>
    %206 = tpu.matmul %205, %204, %cst_215 {dimension_numbers = #tpu.dot_dimension_numbers<[1], [0], [0], [1], [0, 0, 1, 1], [], []>} : vector<8x8xf32>, vector<8x32xf32>, vector<8x32xf32> -> vector<8x32xf32>
    %c1_216 = arith.constant 1 : index
    %c0_217 = arith.constant 0 : index
    %c0_218 = arith.constant 0 : index
    %207 = vector.load %arg5[%c1_216, %c0_217, %c0_218] : memref<2x16x32xf32, #tpu.memory_space<vmem>>, vector<1x16x32xf32>
    %208 = vector.shape_cast %207 : vector<1x16x32xf32> to vector<16x32xf32>
    %cst_219 = arith.constant dense<0.000000e+00> : vector<8x32xf32>
    %209 = tpu.matmul %201, %208, %cst_219 {dimension_numbers = #tpu.dot_dimension_numbers<[1], [0], [0], [1], [0, 0, 1, 1], [], []>} : vector<8x16xf32>, vector<16x32xf32>, vector<8x32xf32> -> vector<8x32xf32>
    %c0_220 = arith.constant 0 : index
    %c8_221 = arith.constant 8 : index
    %210 = vector.load %arg3[%c0_220, %c8_221] : memref<8x16xf32, #tpu.memory_space<vmem>>, vector<8x8xf32>
    %cst_222 = arith.constant dense<0.000000e+00> : vector<8x32xf32>
    %211 = tpu.matmul %210, %209, %cst_222 {dimension_numbers = #tpu.dot_dimension_numbers<[1], [0], [0], [1], [0, 0, 1, 1], [], []>} : vector<8x8xf32>, vector<8x32xf32>, vector<8x32xf32> -> vector<8x32xf32>
    %212 = arith.addf %206, %211 : vector<8x32xf32>
    %c0_223 = arith.constant 0 : index
    %c0_224 = arith.constant 0 : index
    %213 = vector.load %arg4[%c0_223, %c0_224] : memref<8x32xf32, #tpu.memory_space<vmem>>, vector<8x32xf32>
    %214 = arith.addf %212, %213 : vector<8x32xf32>
    %cst_225 = arith.constant 0.000000e+00 : f32
    %215 = vector.broadcast %cst_225 : f32 to vector<8x32xf32>
    %216 = arith.maximumf %214, %215 : vector<8x32xf32>
    %217 = vector.extract_strided_slice %216 {offsets = [0, 0], sizes = [4, 32], strides = [1, 1]} : vector<8x32xf32> to vector<4x32xf32>
    %c0_226 = arith.constant 0 : index
    %c0_227 = arith.constant 0 : index
    %c8_228 = arith.constant 8 : index
    %c0_229 = arith.constant 0 : index
    %218 = vector.load %arg6[%c0_226, %c0_227, %c8_228, %c0_229] : memref<1x4x16x64xf32, #tpu.memory_space<vmem>>, vector<1x4x1x32xf32>
    %219 = vector.shape_cast %218 : vector<1x4x1x32xf32> to vector<4x32xf32>
    %220 = vector.shape_cast %217 : vector<4x32xf32> to vector<1x4x1x32xf32>
    tpu.vector_store %arg6[%c0_226, %c0_227, %c8_228, %c0_229], %220 {strides = array<i32>} : memref<1x4x16x64xf32, #tpu.memory_space<vmem>>, vector<1x4x1x32xf32>,
    %221 = vector.extract_strided_slice %216 {offsets = [4, 0], sizes = [4, 32], strides = [1, 1]} : vector<8x32xf32> to vector<4x32xf32>
    %c0_230 = arith.constant 0 : index
    %c0_231 = arith.constant 0 : index
    %c8_232 = arith.constant 8 : index
    %c32_233 = arith.constant 32 : index
    %222 = vector.load %arg6[%c0_230, %c0_231, %c8_232, %c32_233] : memref<1x4x16x64xf32, #tpu.memory_space<vmem>>, vector<1x4x1x32xf32>
    %223 = vector.shape_cast %222 : vector<1x4x1x32xf32> to vector<4x32xf32>
    %224 = vector.shape_cast %221 : vector<4x32xf32> to vector<1x4x1x32xf32>
    tpu.vector_store %arg6[%c0_230, %c0_231, %c8_232, %c32_233], %224 {strides = array<i32>} : memref<1x4x16x64xf32, #tpu.memory_space<vmem>>, vector<1x4x1x32xf32>,
    %c0_234 = arith.constant 0 : index
    %c0_235 = arith.constant 0 : index
    %c144 = arith.constant 144 : index
    %225 = vector.load %arg2[%c0_234, %c0_235, %c144] : memref<1x8x256xf32, #tpu.memory_space<vmem>>, vector<1x8x16xf32>
    %226 = vector.shape_cast %225 : vector<1x8x16xf32> to vector<8x16xf32>
    %c0_236 = arith.constant 0 : index
    %c0_237 = arith.constant 0 : index
    %c0_238 = arith.constant 0 : index
    %227 = vector.load %arg5[%c0_236, %c0_237, %c0_238] : memref<2x16x32xf32, #tpu.memory_space<vmem>>, vector<1x16x32xf32>
    %228 = vector.shape_cast %227 : vector<1x16x32xf32> to vector<16x32xf32>
    %cst_239 = arith.constant dense<0.000000e+00> : vector<8x32xf32>
    %229 = tpu.matmul %226, %228, %cst_239 {dimension_numbers = #tpu.dot_dimension_numbers<[1], [0], [0], [1], [0, 0, 1, 1], [], []>} : vector<8x16xf32>, vector<16x32xf32>, vector<8x32xf32> -> vector<8x32xf32>
    %c0_240 = arith.constant 0 : index
    %c0_241 = arith.constant 0 : index
    %230 = vector.load %arg3[%c0_240, %c0_241] : memref<8x16xf32, #tpu.memory_space<vmem>>, vector<8x8xf32>
    %cst_242 = arith.constant dense<0.000000e+00> : vector<8x32xf32>
    %231 = tpu.matmul %230, %229, %cst_242 {dimension_numbers = #tpu.dot_dimension_numbers<[1], [0], [0], [1], [0, 0, 1, 1], [], []>} : vector<8x8xf32>, vector<8x32xf32>, vector<8x32xf32> -> vector<8x32xf32>
    %c1_243 = arith.constant 1 : index
    %c0_244 = arith.constant 0 : index
    %c0_245 = arith.constant 0 : index
    %232 = vector.load %arg5[%c1_243, %c0_244, %c0_245] : memref<2x16x32xf32, #tpu.memory_space<vmem>>, vector<1x16x32xf32>
    %233 = vector.shape_cast %232 : vector<1x16x32xf32> to vector<16x32xf32>
    %cst_246 = arith.constant dense<0.000000e+00> : vector<8x32xf32>
    %234 = tpu.matmul %226, %233, %cst_246 {dimension_numbers = #tpu.dot_dimension_numbers<[1], [0], [0], [1], [0, 0, 1, 1], [], []>} : vector<8x16xf32>, vector<16x32xf32>, vector<8x32xf32> -> vector<8x32xf32>
    %c0_247 = arith.constant 0 : index
    %c8_248 = arith.constant 8 : index
    %235 = vector.load %arg3[%c0_247, %c8_248] : memref<8x16xf32, #tpu.memory_space<vmem>>, vector<8x8xf32>
    %cst_249 = arith.constant dense<0.000000e+00> : vector<8x32xf32>
    %236 = tpu.matmul %235, %234, %cst_249 {dimension_numbers = #tpu.dot_dimension_numbers<[1], [0], [0], [1], [0, 0, 1, 1], [], []>} : vector<8x8xf32>, vector<8x32xf32>, vector<8x32xf32> -> vector<8x32xf32>
    %237 = arith.addf %231, %236 : vector<8x32xf32>
    %c0_250 = arith.constant 0 : index
    %c0_251 = arith.constant 0 : index
    %238 = vector.load %arg4[%c0_250, %c0_251] : memref<8x32xf32, #tpu.memory_space<vmem>>, vector<8x32xf32>
    %239 = arith.addf %237, %238 : vector<8x32xf32>
    %cst_252 = arith.constant 0.000000e+00 : f32
    %240 = vector.broadcast %cst_252 : f32 to vector<8x32xf32>
    %241 = arith.maximumf %239, %240 : vector<8x32xf32>
    %242 = vector.extract_strided_slice %241 {offsets = [0, 0], sizes = [4, 32], strides = [1, 1]} : vector<8x32xf32> to vector<4x32xf32>
    %c0_253 = arith.constant 0 : index
    %c0_254 = arith.constant 0 : index
    %c9 = arith.constant 9 : index
    %c0_255 = arith.constant 0 : index
    %243 = vector.load %arg6[%c0_253, %c0_254, %c9, %c0_255] : memref<1x4x16x64xf32, #tpu.memory_space<vmem>>, vector<1x4x1x32xf32>
    %244 = vector.shape_cast %243 : vector<1x4x1x32xf32> to vector<4x32xf32>
    %245 = vector.shape_cast %242 : vector<4x32xf32> to vector<1x4x1x32xf32>
    tpu.vector_store %arg6[%c0_253, %c0_254, %c9, %c0_255], %245 {strides = array<i32>} : memref<1x4x16x64xf32, #tpu.memory_space<vmem>>, vector<1x4x1x32xf32>,
    %246 = vector.extract_strided_slice %241 {offsets = [4, 0], sizes = [4, 32], strides = [1, 1]} : vector<8x32xf32> to vector<4x32xf32>
    %c0_256 = arith.constant 0 : index
    %c0_257 = arith.constant 0 : index
    %c9_258 = arith.constant 9 : index
    %c32_259 = arith.constant 32 : index
    %247 = vector.load %arg6[%c0_256, %c0_257, %c9_258, %c32_259] : memref<1x4x16x64xf32, #tpu.memory_space<vmem>>, vector<1x4x1x32xf32>
    %248 = vector.shape_cast %247 : vector<1x4x1x32xf32> to vector<4x32xf32>
    %249 = vector.shape_cast %246 : vector<4x32xf32> to vector<1x4x1x32xf32>
    tpu.vector_store %arg6[%c0_256, %c0_257, %c9_258, %c32_259], %249 {strides = array<i32>} : memref<1x4x16x64xf32, #tpu.memory_space<vmem>>, vector<1x4x1x32xf32>,
    %c0_260 = arith.constant 0 : index
    %c0_261 = arith.constant 0 : index
    %c160 = arith.constant 160 : index
    %250 = vector.load %arg2[%c0_260, %c0_261, %c160] : memref<1x8x256xf32, #tpu.memory_space<vmem>>, vector<1x8x16xf32>
    %251 = vector.shape_cast %250 : vector<1x8x16xf32> to vector<8x16xf32>
    %c0_262 = arith.constant 0 : index
    %c0_263 = arith.constant 0 : index
    %c0_264 = arith.constant 0 : index
    %252 = vector.load %arg5[%c0_262, %c0_263, %c0_264] : memref<2x16x32xf32, #tpu.memory_space<vmem>>, vector<1x16x32xf32>
    %253 = vector.shape_cast %252 : vector<1x16x32xf32> to vector<16x32xf32>
    %cst_265 = arith.constant dense<0.000000e+00> : vector<8x32xf32>
    %254 = tpu.matmul %251, %253, %cst_265 {dimension_numbers = #tpu.dot_dimension_numbers<[1], [0], [0], [1], [0, 0, 1, 1], [], []>} : vector<8x16xf32>, vector<16x32xf32>, vector<8x32xf32> -> vector<8x32xf32>
    %c0_266 = arith.constant 0 : index
    %c0_267 = arith.constant 0 : index
    %255 = vector.load %arg3[%c0_266, %c0_267] : memref<8x16xf32, #tpu.memory_space<vmem>>, vector<8x8xf32>
    %cst_268 = arith.constant dense<0.000000e+00> : vector<8x32xf32>
    %256 = tpu.matmul %255, %254, %cst_268 {dimension_numbers = #tpu.dot_dimension_numbers<[1], [0], [0], [1], [0, 0, 1, 1], [], []>} : vector<8x8xf32>, vector<8x32xf32>, vector<8x32xf32> -> vector<8x32xf32>
    %c1_269 = arith.constant 1 : index
    %c0_270 = arith.constant 0 : index
    %c0_271 = arith.constant 0 : index
    %257 = vector.load %arg5[%c1_269, %c0_270, %c0_271] : memref<2x16x32xf32, #tpu.memory_space<vmem>>, vector<1x16x32xf32>
    %258 = vector.shape_cast %257 : vector<1x16x32xf32> to vector<16x32xf32>
    %cst_272 = arith.constant dense<0.000000e+00> : vector<8x32xf32>
    %259 = tpu.matmul %251, %258, %cst_272 {dimension_numbers = #tpu.dot_dimension_numbers<[1], [0], [0], [1], [0, 0, 1, 1], [], []>} : vector<8x16xf32>, vector<16x32xf32>, vector<8x32xf32> -> vector<8x32xf32>
    %c0_273 = arith.constant 0 : index
    %c8_274 = arith.constant 8 : index
    %260 = vector.load %arg3[%c0_273, %c8_274] : memref<8x16xf32, #tpu.memory_space<vmem>>, vector<8x8xf32>
    %cst_275 = arith.constant dense<0.000000e+00> : vector<8x32xf32>
    %261 = tpu.matmul %260, %259, %cst_275 {dimension_numbers = #tpu.dot_dimension_numbers<[1], [0], [0], [1], [0, 0, 1, 1], [], []>} : vector<8x8xf32>, vector<8x32xf32>, vector<8x32xf32> -> vector<8x32xf32>
    %262 = arith.addf %256, %261 : vector<8x32xf32>
    %c0_276 = arith.constant 0 : index
    %c0_277 = arith.constant 0 : index
    %263 = vector.load %arg4[%c0_276, %c0_277] : memref<8x32xf32, #tpu.memory_space<vmem>>, vector<8x32xf32>
    %264 = arith.addf %262, %263 : vector<8x32xf32>
    %cst_278 = arith.constant 0.000000e+00 : f32
    %265 = vector.broadcast %cst_278 : f32 to vector<8x32xf32>
    %266 = arith.maximumf %264, %265 : vector<8x32xf32>
    %267 = vector.extract_strided_slice %266 {offsets = [0, 0], sizes = [4, 32], strides = [1, 1]} : vector<8x32xf32> to vector<4x32xf32>
    %c0_279 = arith.constant 0 : index
    %c0_280 = arith.constant 0 : index
    %c10 = arith.constant 10 : index
    %c0_281 = arith.constant 0 : index
    %268 = vector.load %arg6[%c0_279, %c0_280, %c10, %c0_281] : memref<1x4x16x64xf32, #tpu.memory_space<vmem>>, vector<1x4x1x32xf32>
    %269 = vector.shape_cast %268 : vector<1x4x1x32xf32> to vector<4x32xf32>
    %270 = vector.shape_cast %267 : vector<4x32xf32> to vector<1x4x1x32xf32>
    tpu.vector_store %arg6[%c0_279, %c0_280, %c10, %c0_281], %270 {strides = array<i32>} : memref<1x4x16x64xf32, #tpu.memory_space<vmem>>, vector<1x4x1x32xf32>,
    %271 = vector.extract_strided_slice %266 {offsets = [4, 0], sizes = [4, 32], strides = [1, 1]} : vector<8x32xf32> to vector<4x32xf32>
    %c0_282 = arith.constant 0 : index
    %c0_283 = arith.constant 0 : index
    %c10_284 = arith.constant 10 : index
    %c32_285 = arith.constant 32 : index
    %272 = vector.load %arg6[%c0_282, %c0_283, %c10_284, %c32_285] : memref<1x4x16x64xf32, #tpu.memory_space<vmem>>, vector<1x4x1x32xf32>
    %273 = vector.shape_cast %272 : vector<1x4x1x32xf32> to vector<4x32xf32>
    %274 = vector.shape_cast %271 : vector<4x32xf32> to vector<1x4x1x32xf32>
    tpu.vector_store %arg6[%c0_282, %c0_283, %c10_284, %c32_285], %274 {strides = array<i32>} : memref<1x4x16x64xf32, #tpu.memory_space<vmem>>, vector<1x4x1x32xf32>,
    %c0_286 = arith.constant 0 : index
    %c0_287 = arith.constant 0 : index
    %c176 = arith.constant 176 : index
    %275 = vector.load %arg2[%c0_286, %c0_287, %c176] : memref<1x8x256xf32, #tpu.memory_space<vmem>>, vector<1x8x16xf32>
    %276 = vector.shape_cast %275 : vector<1x8x16xf32> to vector<8x16xf32>
    %c0_288 = arith.constant 0 : index
    %c0_289 = arith.constant 0 : index
    %c0_290 = arith.constant 0 : index
    %277 = vector.load %arg5[%c0_288, %c0_289, %c0_290] : memref<2x16x32xf32, #tpu.memory_space<vmem>>, vector<1x16x32xf32>
    %278 = vector.shape_cast %277 : vector<1x16x32xf32> to vector<16x32xf32>
    %cst_291 = arith.constant dense<0.000000e+00> : vector<8x32xf32>
    %279 = tpu.matmul %276, %278, %cst_291 {dimension_numbers = #tpu.dot_dimension_numbers<[1], [0], [0], [1], [0, 0, 1, 1], [], []>} : vector<8x16xf32>, vector<16x32xf32>, vector<8x32xf32> -> vector<8x32xf32>
    %c0_292 = arith.constant 0 : index
    %c0_293 = arith.constant 0 : index
    %280 = vector.load %arg3[%c0_292, %c0_293] : memref<8x16xf32, #tpu.memory_space<vmem>>, vector<8x8xf32>
    %cst_294 = arith.constant dense<0.000000e+00> : vector<8x32xf32>
    %281 = tpu.matmul %280, %279, %cst_294 {dimension_numbers = #tpu.dot_dimension_numbers<[1], [0], [0], [1], [0, 0, 1, 1], [], []>} : vector<8x8xf32>, vector<8x32xf32>, vector<8x32xf32> -> vector<8x32xf32>
    %c1_295 = arith.constant 1 : index
    %c0_296 = arith.constant 0 : index
    %c0_297 = arith.constant 0 : index
    %282 = vector.load %arg5[%c1_295, %c0_296, %c0_297] : memref<2x16x32xf32, #tpu.memory_space<vmem>>, vector<1x16x32xf32>
    %283 = vector.shape_cast %282 : vector<1x16x32xf32> to vector<16x32xf32>
    %cst_298 = arith.constant dense<0.000000e+00> : vector<8x32xf32>
    %284 = tpu.matmul %276, %283, %cst_298 {dimension_numbers = #tpu.dot_dimension_numbers<[1], [0], [0], [1], [0, 0, 1, 1], [], []>} : vector<8x16xf32>, vector<16x32xf32>, vector<8x32xf32> -> vector<8x32xf32>
    %c0_299 = arith.constant 0 : index
    %c8_300 = arith.constant 8 : index
    %285 = vector.load %arg3[%c0_299, %c8_300] : memref<8x16xf32, #tpu.memory_space<vmem>>, vector<8x8xf32>
    %cst_301 = arith.constant dense<0.000000e+00> : vector<8x32xf32>
    %286 = tpu.matmul %285, %284, %cst_301 {dimension_numbers = #tpu.dot_dimension_numbers<[1], [0], [0], [1], [0, 0, 1, 1], [], []>} : vector<8x8xf32>, vector<8x32xf32>, vector<8x32xf32> -> vector<8x32xf32>
    %287 = arith.addf %281, %286 : vector<8x32xf32>
    %c0_302 = arith.constant 0 : index
    %c0_303 = arith.constant 0 : index
    %288 = vector.load %arg4[%c0_302, %c0_303] : memref<8x32xf32, #tpu.memory_space<vmem>>, vector<8x32xf32>
    %289 = arith.addf %287, %288 : vector<8x32xf32>
    %cst_304 = arith.constant 0.000000e+00 : f32
    %290 = vector.broadcast %cst_304 : f32 to vector<8x32xf32>
    %291 = arith.maximumf %289, %290 : vector<8x32xf32>
    %292 = vector.extract_strided_slice %291 {offsets = [0, 0], sizes = [4, 32], strides = [1, 1]} : vector<8x32xf32> to vector<4x32xf32>
    %c0_305 = arith.constant 0 : index
    %c0_306 = arith.constant 0 : index
    %c11 = arith.constant 11 : index
    %c0_307 = arith.constant 0 : index
    %293 = vector.load %arg6[%c0_305, %c0_306, %c11, %c0_307] : memref<1x4x16x64xf32, #tpu.memory_space<vmem>>, vector<1x4x1x32xf32>
    %294 = vector.shape_cast %293 : vector<1x4x1x32xf32> to vector<4x32xf32>
    %295 = vector.shape_cast %292 : vector<4x32xf32> to vector<1x4x1x32xf32>
    tpu.vector_store %arg6[%c0_305, %c0_306, %c11, %c0_307], %295 {strides = array<i32>} : memref<1x4x16x64xf32, #tpu.memory_space<vmem>>, vector<1x4x1x32xf32>,
    %296 = vector.extract_strided_slice %291 {offsets = [4, 0], sizes = [4, 32], strides = [1, 1]} : vector<8x32xf32> to vector<4x32xf32>
    %c0_308 = arith.constant 0 : index
    %c0_309 = arith.constant 0 : index
    %c11_310 = arith.constant 11 : index
    %c32_311 = arith.constant 32 : index
    %297 = vector.load %arg6[%c0_308, %c0_309, %c11_310, %c32_311] : memref<1x4x16x64xf32, #tpu.memory_space<vmem>>, vector<1x4x1x32xf32>
    %298 = vector.shape_cast %297 : vector<1x4x1x32xf32> to vector<4x32xf32>
    %299 = vector.shape_cast %296 : vector<4x32xf32> to vector<1x4x1x32xf32>
    tpu.vector_store %arg6[%c0_308, %c0_309, %c11_310, %c32_311], %299 {strides = array<i32>} : memref<1x4x16x64xf32, #tpu.memory_space<vmem>>, vector<1x4x1x32xf32>,
    %c0_312 = arith.constant 0 : index
    %c0_313 = arith.constant 0 : index
    %c192 = arith.constant 192 : index
    %300 = vector.load %arg2[%c0_312, %c0_313, %c192] : memref<1x8x256xf32, #tpu.memory_space<vmem>>, vector<1x8x16xf32>
    %301 = vector.shape_cast %300 : vector<1x8x16xf32> to vector<8x16xf32>
    %c0_314 = arith.constant 0 : index
    %c0_315 = arith.constant 0 : index
    %c0_316 = arith.constant 0 : index
    %302 = vector.load %arg5[%c0_314, %c0_315, %c0_316] : memref<2x16x32xf32, #tpu.memory_space<vmem>>, vector<1x16x32xf32>
    %303 = vector.shape_cast %302 : vector<1x16x32xf32> to vector<16x32xf32>
    %cst_317 = arith.constant dense<0.000000e+00> : vector<8x32xf32>
    %304 = tpu.matmul %301, %303, %cst_317 {dimension_numbers = #tpu.dot_dimension_numbers<[1], [0], [0], [1], [0, 0, 1, 1], [], []>} : vector<8x16xf32>, vector<16x32xf32>, vector<8x32xf32> -> vector<8x32xf32>
    %c0_318 = arith.constant 0 : index
    %c0_319 = arith.constant 0 : index
    %305 = vector.load %arg3[%c0_318, %c0_319] : memref<8x16xf32, #tpu.memory_space<vmem>>, vector<8x8xf32>
    %cst_320 = arith.constant dense<0.000000e+00> : vector<8x32xf32>
    %306 = tpu.matmul %305, %304, %cst_320 {dimension_numbers = #tpu.dot_dimension_numbers<[1], [0], [0], [1], [0, 0, 1, 1], [], []>} : vector<8x8xf32>, vector<8x32xf32>, vector<8x32xf32> -> vector<8x32xf32>
    %c1_321 = arith.constant 1 : index
    %c0_322 = arith.constant 0 : index
    %c0_323 = arith.constant 0 : index
    %307 = vector.load %arg5[%c1_321, %c0_322, %c0_323] : memref<2x16x32xf32, #tpu.memory_space<vmem>>, vector<1x16x32xf32>
    %308 = vector.shape_cast %307 : vector<1x16x32xf32> to vector<16x32xf32>
    %cst_324 = arith.constant dense<0.000000e+00> : vector<8x32xf32>
    %309 = tpu.matmul %301, %308, %cst_324 {dimension_numbers = #tpu.dot_dimension_numbers<[1], [0], [0], [1], [0, 0, 1, 1], [], []>} : vector<8x16xf32>, vector<16x32xf32>, vector<8x32xf32> -> vector<8x32xf32>
    %c0_325 = arith.constant 0 : index
    %c8_326 = arith.constant 8 : index
    %310 = vector.load %arg3[%c0_325, %c8_326] : memref<8x16xf32, #tpu.memory_space<vmem>>, vector<8x8xf32>
    %cst_327 = arith.constant dense<0.000000e+00> : vector<8x32xf32>
    %311 = tpu.matmul %310, %309, %cst_327 {dimension_numbers = #tpu.dot_dimension_numbers<[1], [0], [0], [1], [0, 0, 1, 1], [], []>} : vector<8x8xf32>, vector<8x32xf32>, vector<8x32xf32> -> vector<8x32xf32>
    %312 = arith.addf %306, %311 : vector<8x32xf32>
    %c0_328 = arith.constant 0 : index
    %c0_329 = arith.constant 0 : index
    %313 = vector.load %arg4[%c0_328, %c0_329] : memref<8x32xf32, #tpu.memory_space<vmem>>, vector<8x32xf32>
    %314 = arith.addf %312, %313 : vector<8x32xf32>
    %cst_330 = arith.constant 0.000000e+00 : f32
    %315 = vector.broadcast %cst_330 : f32 to vector<8x32xf32>
    %316 = arith.maximumf %314, %315 : vector<8x32xf32>
    %317 = vector.extract_strided_slice %316 {offsets = [0, 0], sizes = [4, 32], strides = [1, 1]} : vector<8x32xf32> to vector<4x32xf32>
    %c0_331 = arith.constant 0 : index
    %c0_332 = arith.constant 0 : index
    %c12 = arith.constant 12 : index
    %c0_333 = arith.constant 0 : index
    %318 = vector.load %arg6[%c0_331, %c0_332, %c12, %c0_333] : memref<1x4x16x64xf32, #tpu.memory_space<vmem>>, vector<1x4x1x32xf32>
    %319 = vector.shape_cast %318 : vector<1x4x1x32xf32> to vector<4x32xf32>
    %320 = vector.shape_cast %317 : vector<4x32xf32> to vector<1x4x1x32xf32>
    tpu.vector_store %arg6[%c0_331, %c0_332, %c12, %c0_333], %320 {strides = array<i32>} : memref<1x4x16x64xf32, #tpu.memory_space<vmem>>, vector<1x4x1x32xf32>,
    %321 = vector.extract_strided_slice %316 {offsets = [4, 0], sizes = [4, 32], strides = [1, 1]} : vector<8x32xf32> to vector<4x32xf32>
    %c0_334 = arith.constant 0 : index
    %c0_335 = arith.constant 0 : index
    %c12_336 = arith.constant 12 : index
    %c32_337 = arith.constant 32 : index
    %322 = vector.load %arg6[%c0_334, %c0_335, %c12_336, %c32_337] : memref<1x4x16x64xf32, #tpu.memory_space<vmem>>, vector<1x4x1x32xf32>
    %323 = vector.shape_cast %322 : vector<1x4x1x32xf32> to vector<4x32xf32>
    %324 = vector.shape_cast %321 : vector<4x32xf32> to vector<1x4x1x32xf32>
    tpu.vector_store %arg6[%c0_334, %c0_335, %c12_336, %c32_337], %324 {strides = array<i32>} : memref<1x4x16x64xf32, #tpu.memory_space<vmem>>, vector<1x4x1x32xf32>,
    %c0_338 = arith.constant 0 : index
    %c0_339 = arith.constant 0 : index
    %c208 = arith.constant 208 : index
    %325 = vector.load %arg2[%c0_338, %c0_339, %c208] : memref<1x8x256xf32, #tpu.memory_space<vmem>>, vector<1x8x16xf32>
    %326 = vector.shape_cast %325 : vector<1x8x16xf32> to vector<8x16xf32>
    %c0_340 = arith.constant 0 : index
    %c0_341 = arith.constant 0 : index
    %c0_342 = arith.constant 0 : index
    %327 = vector.load %arg5[%c0_340, %c0_341, %c0_342] : memref<2x16x32xf32, #tpu.memory_space<vmem>>, vector<1x16x32xf32>
    %328 = vector.shape_cast %327 : vector<1x16x32xf32> to vector<16x32xf32>
    %cst_343 = arith.constant dense<0.000000e+00> : vector<8x32xf32>
    %329 = tpu.matmul %326, %328, %cst_343 {dimension_numbers = #tpu.dot_dimension_numbers<[1], [0], [0], [1], [0, 0, 1, 1], [], []>} : vector<8x16xf32>, vector<16x32xf32>, vector<8x32xf32> -> vector<8x32xf32>
    %c0_344 = arith.constant 0 : index
    %c0_345 = arith.constant 0 : index
    %330 = vector.load %arg3[%c0_344, %c0_345] : memref<8x16xf32, #tpu.memory_space<vmem>>, vector<8x8xf32>
    %cst_346 = arith.constant dense<0.000000e+00> : vector<8x32xf32>
    %331 = tpu.matmul %330, %329, %cst_346 {dimension_numbers = #tpu.dot_dimension_numbers<[1], [0], [0], [1], [0, 0, 1, 1], [], []>} : vector<8x8xf32>, vector<8x32xf32>, vector<8x32xf32> -> vector<8x32xf32>
    %c1_347 = arith.constant 1 : index
    %c0_348 = arith.constant 0 : index
    %c0_349 = arith.constant 0 : index
    %332 = vector.load %arg5[%c1_347, %c0_348, %c0_349] : memref<2x16x32xf32, #tpu.memory_space<vmem>>, vector<1x16x32xf32>
    %333 = vector.shape_cast %332 : vector<1x16x32xf32> to vector<16x32xf32>
    %cst_350 = arith.constant dense<0.000000e+00> : vector<8x32xf32>
    %334 = tpu.matmul %326, %333, %cst_350 {dimension_numbers = #tpu.dot_dimension_numbers<[1], [0], [0], [1], [0, 0, 1, 1], [], []>} : vector<8x16xf32>, vector<16x32xf32>, vector<8x32xf32> -> vector<8x32xf32>
    %c0_351 = arith.constant 0 : index
    %c8_352 = arith.constant 8 : index
    %335 = vector.load %arg3[%c0_351, %c8_352] : memref<8x16xf32, #tpu.memory_space<vmem>>, vector<8x8xf32>
    %cst_353 = arith.constant dense<0.000000e+00> : vector<8x32xf32>
    %336 = tpu.matmul %335, %334, %cst_353 {dimension_numbers = #tpu.dot_dimension_numbers<[1], [0], [0], [1], [0, 0, 1, 1], [], []>} : vector<8x8xf32>, vector<8x32xf32>, vector<8x32xf32> -> vector<8x32xf32>
    %337 = arith.addf %331, %336 : vector<8x32xf32>
    %c0_354 = arith.constant 0 : index
    %c0_355 = arith.constant 0 : index
    %338 = vector.load %arg4[%c0_354, %c0_355] : memref<8x32xf32, #tpu.memory_space<vmem>>, vector<8x32xf32>
    %339 = arith.addf %337, %338 : vector<8x32xf32>
    %cst_356 = arith.constant 0.000000e+00 : f32
    %340 = vector.broadcast %cst_356 : f32 to vector<8x32xf32>
    %341 = arith.maximumf %339, %340 : vector<8x32xf32>
    %342 = vector.extract_strided_slice %341 {offsets = [0, 0], sizes = [4, 32], strides = [1, 1]} : vector<8x32xf32> to vector<4x32xf32>
    %c0_357 = arith.constant 0 : index
    %c0_358 = arith.constant 0 : index
    %c13 = arith.constant 13 : index
    %c0_359 = arith.constant 0 : index
    %343 = vector.load %arg6[%c0_357, %c0_358, %c13, %c0_359] : memref<1x4x16x64xf32, #tpu.memory_space<vmem>>, vector<1x4x1x32xf32>
    %344 = vector.shape_cast %343 : vector<1x4x1x32xf32> to vector<4x32xf32>
    %345 = vector.shape_cast %342 : vector<4x32xf32> to vector<1x4x1x32xf32>
    tpu.vector_store %arg6[%c0_357, %c0_358, %c13, %c0_359], %345 {strides = array<i32>} : memref<1x4x16x64xf32, #tpu.memory_space<vmem>>, vector<1x4x1x32xf32>,
    %346 = vector.extract_strided_slice %341 {offsets = [4, 0], sizes = [4, 32], strides = [1, 1]} : vector<8x32xf32> to vector<4x32xf32>
    %c0_360 = arith.constant 0 : index
    %c0_361 = arith.constant 0 : index
    %c13_362 = arith.constant 13 : index
    %c32_363 = arith.constant 32 : index
    %347 = vector.load %arg6[%c0_360, %c0_361, %c13_362, %c32_363] : memref<1x4x16x64xf32, #tpu.memory_space<vmem>>, vector<1x4x1x32xf32>
    %348 = vector.shape_cast %347 : vector<1x4x1x32xf32> to vector<4x32xf32>
    %349 = vector.shape_cast %346 : vector<4x32xf32> to vector<1x4x1x32xf32>
    tpu.vector_store %arg6[%c0_360, %c0_361, %c13_362, %c32_363], %349 {strides = array<i32>} : memref<1x4x16x64xf32, #tpu.memory_space<vmem>>, vector<1x4x1x32xf32>,
    %c0_364 = arith.constant 0 : index
    %c0_365 = arith.constant 0 : index
    %c224 = arith.constant 224 : index
    %350 = vector.load %arg2[%c0_364, %c0_365, %c224] : memref<1x8x256xf32, #tpu.memory_space<vmem>>, vector<1x8x16xf32>
    %351 = vector.shape_cast %350 : vector<1x8x16xf32> to vector<8x16xf32>
    %c0_366 = arith.constant 0 : index
    %c0_367 = arith.constant 0 : index
    %c0_368 = arith.constant 0 : index
    %352 = vector.load %arg5[%c0_366, %c0_367, %c0_368] : memref<2x16x32xf32, #tpu.memory_space<vmem>>, vector<1x16x32xf32>
    %353 = vector.shape_cast %352 : vector<1x16x32xf32> to vector<16x32xf32>
    %cst_369 = arith.constant dense<0.000000e+00> : vector<8x32xf32>
    %354 = tpu.matmul %351, %353, %cst_369 {dimension_numbers = #tpu.dot_dimension_numbers<[1], [0], [0], [1], [0, 0, 1, 1], [], []>} : vector<8x16xf32>, vector<16x32xf32>, vector<8x32xf32> -> vector<8x32xf32>
    %c0_370 = arith.constant 0 : index
    %c0_371 = arith.constant 0 : index
    %355 = vector.load %arg3[%c0_370, %c0_371] : memref<8x16xf32, #tpu.memory_space<vmem>>, vector<8x8xf32>
    %cst_372 = arith.constant dense<0.000000e+00> : vector<8x32xf32>
    %356 = tpu.matmul %355, %354, %cst_372 {dimension_numbers = #tpu.dot_dimension_numbers<[1], [0], [0], [1], [0, 0, 1, 1], [], []>} : vector<8x8xf32>, vector<8x32xf32>, vector<8x32xf32> -> vector<8x32xf32>
    %c1_373 = arith.constant 1 : index
    %c0_374 = arith.constant 0 : index
    %c0_375 = arith.constant 0 : index
    %357 = vector.load %arg5[%c1_373, %c0_374, %c0_375] : memref<2x16x32xf32, #tpu.memory_space<vmem>>, vector<1x16x32xf32>
    %358 = vector.shape_cast %357 : vector<1x16x32xf32> to vector<16x32xf32>
    %cst_376 = arith.constant dense<0.000000e+00> : vector<8x32xf32>
    %359 = tpu.matmul %351, %358, %cst_376 {dimension_numbers = #tpu.dot_dimension_numbers<[1], [0], [0], [1], [0, 0, 1, 1], [], []>} : vector<8x16xf32>, vector<16x32xf32>, vector<8x32xf32> -> vector<8x32xf32>
    %c0_377 = arith.constant 0 : index
    %c8_378 = arith.constant 8 : index
    %360 = vector.load %arg3[%c0_377, %c8_378] : memref<8x16xf32, #tpu.memory_space<vmem>>, vector<8x8xf32>
    %cst_379 = arith.constant dense<0.000000e+00> : vector<8x32xf32>
    %361 = tpu.matmul %360, %359, %cst_379 {dimension_numbers = #tpu.dot_dimension_numbers<[1], [0], [0], [1], [0, 0, 1, 1], [], []>} : vector<8x8xf32>, vector<8x32xf32>, vector<8x32xf32> -> vector<8x32xf32>
    %362 = arith.addf %356, %361 : vector<8x32xf32>
    %c0_380 = arith.constant 0 : index
    %c0_381 = arith.constant 0 : index
    %363 = vector.load %arg4[%c0_380, %c0_381] : memref<8x32xf32, #tpu.memory_space<vmem>>, vector<8x32xf32>
    %364 = arith.addf %362, %363 : vector<8x32xf32>
    %cst_382 = arith.constant 0.000000e+00 : f32
    %365 = vector.broadcast %cst_382 : f32 to vector<8x32xf32>
    %366 = arith.maximumf %364, %365 : vector<8x32xf32>
    %367 = vector.extract_strided_slice %366 {offsets = [0, 0], sizes = [4, 32], strides = [1, 1]} : vector<8x32xf32> to vector<4x32xf32>
    %c0_383 = arith.constant 0 : index
    %c0_384 = arith.constant 0 : index
    %c14 = arith.constant 14 : index
    %c0_385 = arith.constant 0 : index
    %368 = vector.load %arg6[%c0_383, %c0_384, %c14, %c0_385] : memref<1x4x16x64xf32, #tpu.memory_space<vmem>>, vector<1x4x1x32xf32>
    %369 = vector.shape_cast %368 : vector<1x4x1x32xf32> to vector<4x32xf32>
    %370 = vector.shape_cast %367 : vector<4x32xf32> to vector<1x4x1x32xf32>
    tpu.vector_store %arg6[%c0_383, %c0_384, %c14, %c0_385], %370 {strides = array<i32>} : memref<1x4x16x64xf32, #tpu.memory_space<vmem>>, vector<1x4x1x32xf32>,
    %371 = vector.extract_strided_slice %366 {offsets = [4, 0], sizes = [4, 32], strides = [1, 1]} : vector<8x32xf32> to vector<4x32xf32>
    %c0_386 = arith.constant 0 : index
    %c0_387 = arith.constant 0 : index
    %c14_388 = arith.constant 14 : index
    %c32_389 = arith.constant 32 : index
    %372 = vector.load %arg6[%c0_386, %c0_387, %c14_388, %c32_389] : memref<1x4x16x64xf32, #tpu.memory_space<vmem>>, vector<1x4x1x32xf32>
    %373 = vector.shape_cast %372 : vector<1x4x1x32xf32> to vector<4x32xf32>
    %374 = vector.shape_cast %371 : vector<4x32xf32> to vector<1x4x1x32xf32>
    tpu.vector_store %arg6[%c0_386, %c0_387, %c14_388, %c32_389], %374 {strides = array<i32>} : memref<1x4x16x64xf32, #tpu.memory_space<vmem>>, vector<1x4x1x32xf32>,
    %c0_390 = arith.constant 0 : index
    %c0_391 = arith.constant 0 : index
    %c240 = arith.constant 240 : index
    %375 = vector.load %arg2[%c0_390, %c0_391, %c240] : memref<1x8x256xf32, #tpu.memory_space<vmem>>, vector<1x8x16xf32>
    %376 = vector.shape_cast %375 : vector<1x8x16xf32> to vector<8x16xf32>
    %c0_392 = arith.constant 0 : index
    %c0_393 = arith.constant 0 : index
    %c0_394 = arith.constant 0 : index
    %377 = vector.load %arg5[%c0_392, %c0_393, %c0_394] : memref<2x16x32xf32, #tpu.memory_space<vmem>>, vector<1x16x32xf32>
    %378 = vector.shape_cast %377 : vector<1x16x32xf32> to vector<16x32xf32>
    %cst_395 = arith.constant dense<0.000000e+00> : vector<8x32xf32>
    %379 = tpu.matmul %376, %378, %cst_395 {dimension_numbers = #tpu.dot_dimension_numbers<[1], [0], [0], [1], [0, 0, 1, 1], [], []>} : vector<8x16xf32>, vector<16x32xf32>, vector<8x32xf32> -> vector<8x32xf32>
    %c0_396 = arith.constant 0 : index
    %c0_397 = arith.constant 0 : index
    %380 = vector.load %arg3[%c0_396, %c0_397] : memref<8x16xf32, #tpu.memory_space<vmem>>, vector<8x8xf32>
    %cst_398 = arith.constant dense<0.000000e+00> : vector<8x32xf32>
    %381 = tpu.matmul %380, %379, %cst_398 {dimension_numbers = #tpu.dot_dimension_numbers<[1], [0], [0], [1], [0, 0, 1, 1], [], []>} : vector<8x8xf32>, vector<8x32xf32>, vector<8x32xf32> -> vector<8x32xf32>
    %c1_399 = arith.constant 1 : index
    %c0_400 = arith.constant 0 : index
    %c0_401 = arith.constant 0 : index
    %382 = vector.load %arg5[%c1_399, %c0_400, %c0_401] : memref<2x16x32xf32, #tpu.memory_space<vmem>>, vector<1x16x32xf32>
    %383 = vector.shape_cast %382 : vector<1x16x32xf32> to vector<16x32xf32>
    %cst_402 = arith.constant dense<0.000000e+00> : vector<8x32xf32>
    %384 = tpu.matmul %376, %383, %cst_402 {dimension_numbers = #tpu.dot_dimension_numbers<[1], [0], [0], [1], [0, 0, 1, 1], [], []>} : vector<8x16xf32>, vector<16x32xf32>, vector<8x32xf32> -> vector<8x32xf32>
    %c0_403 = arith.constant 0 : index
    %c8_404 = arith.constant 8 : index
    %385 = vector.load %arg3[%c0_403, %c8_404] : memref<8x16xf32, #tpu.memory_space<vmem>>, vector<8x8xf32>
    %cst_405 = arith.constant dense<0.000000e+00> : vector<8x32xf32>
    %386 = tpu.matmul %385, %384, %cst_405 {dimension_numbers = #tpu.dot_dimension_numbers<[1], [0], [0], [1], [0, 0, 1, 1], [], []>} : vector<8x8xf32>, vector<8x32xf32>, vector<8x32xf32> -> vector<8x32xf32>
    %387 = arith.addf %381, %386 : vector<8x32xf32>
    %c0_406 = arith.constant 0 : index
    %c0_407 = arith.constant 0 : index
    %388 = vector.load %arg4[%c0_406, %c0_407] : memref<8x32xf32, #tpu.memory_space<vmem>>, vector<8x32xf32>
    %389 = arith.addf %387, %388 : vector<8x32xf32>
    %cst_408 = arith.constant 0.000000e+00 : f32
    %390 = vector.broadcast %cst_408 : f32 to vector<8x32xf32>
    %391 = arith.maximumf %389, %390 : vector<8x32xf32>
    %392 = vector.extract_strided_slice %391 {offsets = [0, 0], sizes = [4, 32], strides = [1, 1]} : vector<8x32xf32> to vector<4x32xf32>
    %c0_409 = arith.constant 0 : index
    %c0_410 = arith.constant 0 : index
    %c15 = arith.constant 15 : index
    %c0_411 = arith.constant 0 : index
    %393 = vector.load %arg6[%c0_409, %c0_410, %c15, %c0_411] : memref<1x4x16x64xf32, #tpu.memory_space<vmem>>, vector<1x4x1x32xf32>
    %394 = vector.shape_cast %393 : vector<1x4x1x32xf32> to vector<4x32xf32>
    %395 = vector.shape_cast %392 : vector<4x32xf32> to vector<1x4x1x32xf32>
    tpu.vector_store %arg6[%c0_409, %c0_410, %c15, %c0_411], %395 {strides = array<i32>} : memref<1x4x16x64xf32, #tpu.memory_space<vmem>>, vector<1x4x1x32xf32>,
    %396 = vector.extract_strided_slice %391 {offsets = [4, 0], sizes = [4, 32], strides = [1, 1]} : vector<8x32xf32> to vector<4x32xf32>
    %c0_412 = arith.constant 0 : index
    %c0_413 = arith.constant 0 : index
    %c15_414 = arith.constant 15 : index
    %c32_415 = arith.constant 32 : index
    %397 = vector.load %arg6[%c0_412, %c0_413, %c15_414, %c32_415] : memref<1x4x16x64xf32, #tpu.memory_space<vmem>>, vector<1x4x1x32xf32>
    %398 = vector.shape_cast %397 : vector<1x4x1x32xf32> to vector<4x32xf32>
    %399 = vector.shape_cast %396 : vector<4x32xf32> to vector<1x4x1x32xf32>
    tpu.vector_store %arg6[%c0_412, %c0_413, %c15_414, %c32_415], %399 {strides = array<i32>} : memref<1x4x16x64xf32, #tpu.memory_space<vmem>>, vector<1x4x1x32xf32>,
    return
  }
  func.func @transform_0(%arg0: i32, %arg1: i32) -> (i32, i32, i32) {
    %c0_i32 = arith.constant 0 : i32
    %c0_i32_0 = arith.constant 0 : i32
    return %arg0, %c0_i32, %arg1 : i32, i32, i32
  }
  func.func @transform_1(%arg0: i32, %arg1: i32) -> (i32, i32) {
    %c0_i32 = arith.constant 0 : i32
    %c0_i32_0 = arith.constant 0 : i32
    %c0_i32_1 = arith.constant 0 : i32
    return %c0_i32, %c0_i32_0 : i32, i32
  }
  func.func @transform_2(%arg0: i32, %arg1: i32) -> (i32, i32) {
    %c0_i32 = arith.constant 0 : i32
    %c0_i32_0 = arith.constant 0 : i32
    %c0_i32_1 = arith.constant 0 : i32
    return %c0_i32, %c0_i32_0 : i32, i32
  }
  func.func @transform_3(%arg0: i32, %arg1: i32) -> (i32, i32, i32) {
    %c0_i32 = arith.constant 0 : i32
    %c0_i32_0 = arith.constant 0 : i32
    %c0_i32_1 = arith.constant 0 : i32
    %c0_i32_2 = arith.constant 0 : i32
    return %c0_i32, %c0_i32_0, %c0_i32_1 : i32, i32, i32
  }
  func.func @transform_4(%arg0: i32, %arg1: i32) -> (i32, i32, i32, i32) {
    %c0_i32 = arith.constant 0 : i32
    %c0_i32_0 = arith.constant 0 : i32
    %c0_i32_1 = arith.constant 0 : i32
    return %arg0, %c0_i32, %arg1, %c0_i32_0 : i32, i32, i32, i32
  }
}

</mosaic_0001>

<bundles_post_ra>
// kernel: pixel_shuffle_v3.1
= control target key start
LH: loop header
LB: loop body
LE: loop exit
PB: predicated region body
PF: predicated region fallthrough
CT: control target
= control target key end

     0   :  { %s7428_s15 = smov 0   ;;  %s7430_s16 = smov 0   ;;  %s8467_s0 = inlined_call_operand.vmem [shape: f32[2,8,256], index: 0, kind: input, shape index: {}]   ;;  %s8468_s1 = inlined_call_operand.vmem [shape: f32[8,16], index: 1, kind: input, shape index: {}]   ;;  %s8469_s2 = inlined_call_operand.vmem [shape: f32[8,32], index: 2, kind: input, shape index: {}]   ;;  %s8470_s3 = inlined_call_operand.vmem [shape: f32[2,16,32], index: 3, kind: input, shape index: {}]   ;;  %s8471_s4 = inlined_call_operand.vmem [shape: f32[2,4,16,64], index: 4, kind: output, shape index: {}]  }
   0x1   :  { %s7432_s17 = smov 0  }
   0x2 LB: > { %s26_s18 = sadd.s32 1, %s7385_s16  ;;  %p6585_p0 = scmp.ge.s32.totalorder %s7389_s17, 1  ;;  %s7389_s17 = sphi %s7432_s17, %s14_s17   ;;  %s7385_s16 = sphi %s7430_s16, %s8473_s16   ;;  %s7381_s15 = sphi %s7428_s15, %s8472_s15  }
   0x3   : > { %p28_p1 = scmp.ge.s32.totalorder %s26_s18, 2  ;;  %p183_p2 = scmp.lt.s32.totalorder %s7389_s17, 3 }
   0x5   : > { %s8475_s18 = smov (%p28_p1, %s26_s18), 0  ;;  %p184_p3 = pnand %p6585_p0, %p183_p2 }
   0x6   : > { %v238_v0 = vld [vmem:[%s8470_s3] sm:$0xff] (!%p184_p3)  ;;  %v239_v1 = vld [vmem:[%s8470_s3 + $0x8] sm:$0xff] (!%p184_p3)  ;;  %v6591_v2 = vld [vmem:[%s8470_s3 + $0x10] sm:$0xff] (!%p184_p3)  ;;  %v7391_v3 = vmov (!%p184_p3), 0.0|0.0   ;;  %p218_p4 = scmp.lt.s32.totalorder (!%p184_p3), %s7381_s15, 1  ;;  %vm7392_vm0 = vmmov (!%p184_p3), 0   ;;  %v543_v19 = vlaneseq (!%p184_p3) }
   0x7   : > { %187 = sbr.rel (%p184_p3) target bundleno = 3854 (0xf0e), region = 36  ;;  %7234 = vmatprep.subr.bf16.mxu0 (!%p184_p3), %v7391_v3  ;;  %7237 = vmatprep.subr.bf16.mxu1 (!%p184_p3), %v7391_v3  ;;  %v7457_v4 = vpack.c.bf16 (!%p184_p3), %v239_v1, %v238_v0  ;;  %v6592_v5 = vld [vmem:[%s8470_s3 + $0x18] sm:$0xff] (!%p184_p3)  ;;  %v7465_v6 = vld [vmem:[%s8468_s1] sm:$0xff] (!%p184_p3)  ;;  %v7393_v8 = vmov (!%p184_p3), 0.0   ;;  %s7394_s29 = smov (!%p184_p3), 120   ;;  %vm240_vm1 = vcmask (!%p184_p3), 130048  }
   0x8   : > { %v7467_v7 = vpack.c.bf16 (!%p184_p3), %v6592_v5, %v6591_v2  ;;  %6854 = vmatprep.mubr.msk.f32.mxu0 (!%p184_p3), %vm7392_vm0, %v7393_v8  ;;  %6861 = vmatprep.mubr.msk.f32.mxu1 (!%p184_p3), %vm7392_vm0, %v7393_v8  ;;  %s7395_s8 = smov (!%p184_p3), 112   ;;  %s7396_s9 = smov (!%p184_p3), 96   ;;  %vm391_vm2 = vcmask (!%p184_p3), 64512   ;;  %v7402_v17 = vmov (!%p184_p3), 1966171168   ;;  %v544_v21 = vshrl.u32 (!%p184_p3), %v543_v19, 7 }
   0x9   : > { %7236 = vmatpush3.bf16.msra.mxu0 (!%p184_p3), %v7457_v4  ;;  %389 = vrot.lane.b32.xlu0 (!%p184_p3), %v7465_v6, %s7394_s29  ;;  %s7397_s10 = smov (!%p184_p3), 80   ;;  %s7398_s11 = smov (!%p184_p3), 64   ;;  %v541_v18 = vunpack.c.l.s4 (!%p184_p3), %v7402_v17  ;;  %v7554_v24 = vld [vmem:[%s8469_s2] sm:$0xff] (!%p184_p3)  ;;  %vm568_vm3 = vcmask (!%p184_p3), 253952   ;;  %vm626_vm4 = vcmask (!%p184_p3), 516352  }
   0xa   : > { %7239 = vmatpush3.bf16.msra.mxu1 (!%p184_p3), %v7467_v7  ;;  %6864 = vmatprep.subr.mxu0 (!%p184_p3), %v7393_v8  ;;  %s7399_s12 = smov (!%p184_p3), 48   ;;  %s7400_s13 = smov (!%p184_p3), 32   ;;  %v7575_v42 = vsub.s32 (!%p184_p3), 0, %v544_v21 }
   0xb   : > { %6869 = vmatprep.subr.mxu1 (!%p184_p3), %v7393_v8  ;;  %783 = vrot.lane.b32.xlu1 (!%p184_p3), %v7465_v6, %s7394_s29  ;;  %s7401_s14 = smov (!%p184_p3), 16   ;;  %v542_v20 = vunpack.c.0.s8 (!%p184_p3), %v541_v18 }
   0xd   : > { %v7557_v29 = vsub.s32 (!%p184_p3), %v542_v20, %v544_v21 }
   0xe   : > { %s8477_s15 = smov (!%p218_p4, %s7381_s15), 1 }
   0xf   : > { %s6688_s30 = sshll.u32 %s8477_s15, 4  ;;  %s6689_s21 = sshll.u32 %s8477_s15, 6 }
  0x10   : > { %s225_s7 = scalar_lea.vmem %s8467_s0, %s6688_s30  ;;  %s7567_s24 = scalar_lea.vmem %s8471_s4, %s6689_s21 }
  0x11   : > { %v237_v9 = vld [vmem:[%s225_s7] sm:$0xff]  ;;  %v7505_v10 = vld [vmem:[%s225_s7 + $0x8] sm:$0xff] }
  0x12   : > { %6855 = vmatmul.mubr.msk.f32.vlgmr.msra.gmra.mrb[0].mxu0 %vm240_vm1, %v237_v9  ;;  %6862 = vmatmul.mubr.msk.f32.vlgmr.msra.gmra.mrb[0].mxu1 %vm240_vm1, %v237_v9 }
  0x13   : > { %635 = vrot.lane.b32.xlu0 %v237_v9, %s7395_s8  ;;  %6866 = vmatprep.mubr.msk.f32.mxu0 %vm7392_vm0, %v7393_v8 }
  0x14   : > { %6871 = vmatprep.mubr.msk.f32.mxu1 %vm7392_vm0, %v7393_v8  ;;  %1026 = vrot.lane.b32.xlu1 %v237_v9, %s7396_s9 }
  0x17   : > { %1174 = vrot.lane.b32.xlu0 %v7465_v6, %s7394_s29 }
  0x18   : > { %1417 = vrot.lane.b32.xlu1 %v237_v9, %s7397_s10 }
  0x1b   : > { %1565 = vrot.lane.b32.xlu0 %v7465_v6, %s7394_s29 }
  0x1c   : > { %1808 = vrot.lane.b32.xlu1 %v237_v9, %s7398_s11 }
  0x1f   : > { %1956 = vrot.lane.b32.xlu0 %v7465_v6, %s7394_s29 }
  0x20   : > { %2199 = vrot.lane.b32.xlu1 %v237_v9, %s7399_s12 }
  0x23   : > { %2347 = vrot.lane.b32.xlu0 %v7465_v6, %s7394_s29 }
  0x24   : > { %2590 = vrot.lane.b32.xlu1 %v237_v9, %s7400_s13 }
  0x27   : > { %2738 = vrot.lane.b32.xlu0 %v7465_v6, %s7394_s29 }
  0x28   : > { %2981 = vrot.lane.b32.xlu1 %v237_v9, %s7401_s14 }
  0x2b   : > { %3129 = vrot.lane.b32.xlu0 %v7465_v6, %s7394_s29 }
  0x2c   : > { %3518 = vrot.lane.b32.xlu1 %v7465_v6, %s7394_s29 }
  0x2f   : > { %3761 = vrot.lane.b32.xlu0 %v7505_v10, %s7395_s8 }
  0x30   : > { %3909 = vrot.lane.b32.xlu1 %v7465_v6, %s7394_s29 }
  0x33   : > { %4152 = vrot.lane.b32.xlu0 %v7505_v10, %s7396_s9 }
  0x34   : > { %4300 = vrot.lane.b32.xlu1 %v7465_v6, %s7394_s29 }
  0x37   : > { %4543 = vrot.lane.b32.xlu0 %v7505_v10, %s7397_s10 }
  0x38   : > { %4691 = vrot.lane.b32.xlu1 %v7465_v6, %s7394_s29 }
  0x3b   : > { %4934 = vrot.lane.b32.xlu0 %v7505_v10, %s7398_s11 }
  0x3c   : > { %5082 = vrot.lane.b32.xlu1 %v7465_v6, %s7394_s29 }
  0x3f   : > { %5325 = vrot.lane.b32.xlu0 %v7505_v10, %s7399_s12 }
  0x40   : > { %5473 = vrot.lane.b32.xlu1 %v7465_v6, %s7394_s29 }
  0x43   : > { %5716 = vrot.lane.b32.xlu0 %v7505_v10, %s7400_s13 }
  0x44   : > { %5864 = vrot.lane.b32.xlu1 %v7465_v6, %s7394_s29 }
  0x47   : > { %6107 = vrot.lane.b32.xlu0 %v7505_v10, %s7401_s14 }
  0x48   : > { %6255 = vrot.lane.b32.xlu1 %v7465_v6, %s7394_s29 }
  0x7b   : > { %v390_v11 = vpop.permute.xlu0 %389 }
  0x7d   : > { %v784_v30 = vpop.permute.xlu1 %783 }
  0x85   : > { %v636_v16 = vpop.permute.xlu0 %635 }
  0x86   : > { %v1027_v41 = vpop.permute.xlu1 %1026 }
  0x89   : > { %v1175_v55 = vpop.permute.xlu0 %1174 }
  0x8a   : > { %v7608_v56 = vpop.permute.xlu1 %1417 }
  0x8d   : > { %v7610_v57 = vpop.permute.xlu0 %1565 }
  0x8e   : > { %v7612_v58 = vpop.permute.xlu1 %1808 }
  0x91   : > { %v7614_v59 = vpop.permute.xlu0 %1956 }
  0x92   : > { %v7616_v60 = vpop.permute.xlu1 %2199 }
  0x95   : > { %v7618_v61 = vpop.permute.xlu0 %2347 }
  0x96   : > { %v7620_v62 = vpop.permute.xlu1 %2590 }
  0x99   : > { %v7622_v63 = vpop.permute.xlu0 %2738 }
  0x9a   : > { %v7624_v0 = vpop.permute.xlu1 %2981 }
  0x9d   : > { %v7626_v1 = vpop.permute.xlu0 %3129 }
  0x9e   : > { %v7628_v2 = vpop.permute.xlu1 %3518 }
  0xa1   : > { %v7630_v5 = vpop.permute.xlu0 %3761 }
  0xa2   : > { %v7632_v9 = vpop.permute.xlu1 %3909 }
  0xe5   : > { %v310_v12 = vpop.f32.mrb[0].mxu0  ;;  %v384_v13 = vpop.f32.mrb[0].mxu1 }
  0xe6   : > { %v6856_v14 = vpop.f32.mrb[1].mxu0  ;;  %v6863_v15 = vpop.f32.mrb[1].mxu1  ;;  %6865 = vmatpush3.msra.mxu0 %v384_v13  ;;  %6870 = vmatpush3.msra.mxu1 %v310_v12 }
  0xe7   : > { %6867 = vmatmul.mubr.msk.f32.vlgmr.msra.gmra.mrb[2].mxu0 %vm391_vm2, %v390_v11  ;;  %6872 = vmatmul.mubr.msk.f32.vlgmr.msra.gmra.mrb[2].mxu1 %vm391_vm2, %v7465_v6  ;;  %v7634_v11 = vpop.permute.xlu0 %4152  ;;  %v7636_v12 = vpop.permute.xlu1 %4300 }
  0xe8   : > { %7240 = vmatprep.subr.bf16.mxu0 %v7391_v3  ;;  %7243 = vmatprep.subr.bf16.mxu1 %v7391_v3 }
  0xe9   : > { %7242 = vmatpush3.bf16.msra.mxu0 %v7457_v4  ;;  %7245 = vmatpush3.bf16.msra.mxu1 %v7467_v7 }
  0xea   : > { %6878 = vmatprep.mubr.msk.f32.mxu0 %vm7392_vm0, %v7393_v8  ;;  %6885 = vmatprep.mubr.msk.f32.mxu1 %vm7392_vm0, %v7393_v8 }
  0xeb   : > { %6888 = vmatprep.subr.mxu0 %v7393_v8  ;;  %6893 = vmatprep.subr.mxu1 %v7393_v8  ;;  %v7638_v13 = vpop.permute.xlu0 %4543  ;;  %v7640_v14 = vpop.permute.xlu1 %4691 }
  0xec   : > { %6879 = vmatmul.mubr.msk.f32.vlgmr.msra.gmra.mrb[4].mxu0 %vm240_vm1, %v636_v16  ;;  %6886 = vmatmul.mubr.msk.f32.vlgmr.msra.gmra.mrb[4].mxu1 %vm240_vm1, %v636_v16 }
  0xed   : > { %6890 = vmatprep.mubr.msk.f32.mxu0 %vm7392_vm0, %v7393_v8  ;;  %6895 = vmatprep.mubr.msk.f32.mxu1 %vm7392_vm0, %v7393_v8 }
  0xef   : > { %v7642_v15 = vpop.permute.xlu0 %4934  ;;  %v7644_v16 = vpop.permute.xlu1 %5082 }
  0xf3   : > { %v7646_v17 = vpop.permute.xlu0 %5325  ;;  %v7648_v18 = vpop.permute.xlu1 %5473 }
  0xf7   : > { %v7650_v19 = vpop.permute.xlu0 %5716  ;;  %v7652_v20 = vpop.permute.xlu1 %5864 }
  0xfb   : > { %v7654_v21 = vpop.permute.xlu0 %6107 }
 0x1ba   : > { %v460_v22 = vpop.f32.mrb[2].mxu0  ;;  %v532_v23 = vpop.f32.mrb[2].mxu1 }
 0x1bb   : > { %v533_v25 = vadd.f32 %v532_v23, %v460_v22  ;;  %v6868_v26 = vpop.f32.mrb[3].mxu0  ;;  %v6873_v27 = vpop.f32.mrb[3].mxu1 }
 0x1bc   : > { %v7656_v22 = vpop.permute.xlu1 %6255 }
 0x1bd   : > { %v537_v28 = vadd.f32 %v7554_v24, %v533_v25 }
 0x1bf   : > { %v538_v31 = vmax.f32 %v537_v28, 0.0  ;;  %v705_v32 = vpop.f32.mrb[4].mxu0  ;;  %v778_v33 = vpop.f32.mrb[4].mxu1 }
 0x1c0   : > { %v6880_v34 = vpop.f32.mrb[5].mxu0  ;;  %v6887_v35 = vpop.f32.mrb[5].mxu1  ;;  %6889 = vmatpush3.msra.mxu0 %v778_v33  ;;  %6894 = vmatpush3.msra.mxu1 %v705_v32 }
 0x1c1   : > { %v546_v36 = vrot.slane %v538_v31, %v7557_v29  ;;  %v573_v37 = vcombine.high %v538_v31, %v538_v31  ;;  %6891 = vmatmul.mubr.msk.f32.vlgmr.msra.gmra.mrb[6].mxu0 %vm391_vm2, %v784_v30  ;;  %6896 = vmatmul.mubr.msk.f32.vlgmr.msra.gmra.mrb[6].mxu1 %vm391_vm2, %v7465_v6 }
 0x1c2   : > { %7246 = vmatprep.subr.bf16.mxu0 %v7391_v3  ;;  %7249 = vmatprep.subr.bf16.mxu1 %v7391_v3 }
 0x1c3   : > { %v547_v38 = vcombine.high %v546_v36, %v546_v36  ;;  %v554_v39 = vrot.slane %v546_v36, %v7557_v29  ;;  %v580_v40 = vrot.slane %v573_v37, %v7557_v29  ;;  %7248 = vmatpush3.bf16.msra.mxu0 %v7457_v4  ;;  %7251 = vmatpush3.bf16.msra.mxu1 %v7467_v7 }
 0x1c4   : > { %6902 = vmatprep.mubr.msk.f32.mxu0 %vm7392_vm0, %v7393_v8  ;;  %6909 = vmatprep.mubr.msk.f32.mxu1 %vm7392_vm0, %v7393_v8 }
 0x1c5   : > { %v561_v43 = vrot.slane %v547_v38, %v7557_v29  ;;  %v562_v44 = vcombine.high %v554_v39, %v554_v39  ;;  %v588_v45 = vrot.slane %v580_v40, %v7557_v29  ;;  %v581_v46 = vcombine.high %v580_v40, %v580_v40  ;;  %569 = vst.msk [vmem:[%s7567_s24] sm:$0x1] %vm568_vm3, %v554_v39 }
 0x1c6   : > { %6912 = vmatprep.subr.mxu0 %v7393_v8  ;;  %6903 = vmatmul.mubr.msk.f32.vlgmr.msra.gmra.mrb[8].mxu0 %vm240_vm1, %v1027_v41 }
 0x1c7   : > { %6910 = vmatmul.mubr.msk.f32.vlgmr.msra.gmra.mrb[8].mxu1 %vm240_vm1, %v1027_v41  ;;  %v563_v47 = vcombine.high %v561_v43, %v561_v43  ;;  %v601_v48 = vrot.slane %v588_v45, %v7575_v42  ;;  %v595_v49 = vrot.slane %v581_v46, %v7557_v29  ;;  %v596_v50 = vcombine.high %v588_v45, %v588_v45 }
 0x1c8   : > { %570 = vst.msk [vmem:[%s7567_s24 + $0x10] sm:$0x1] %vm568_vm3, %v561_v43  ;;  %571 = vst.msk [vmem:[%s7567_s24 + $0x20] sm:$0x1] %vm568_vm3, %v562_v44  ;;  %6917 = vmatprep.subr.mxu1 %v7393_v8  ;;  %6914 = vmatprep.mubr.msk.f32.mxu0 %vm7392_vm0, %v7393_v8 }
 0x1c9   : > { %6919 = vmatprep.mubr.msk.f32.mxu1 %vm7392_vm0, %v7393_v8  ;;  %614 = vrot.lane.b32.xlu0 %v601_v48, %s7400_s13  ;;  %v605_v51 = vrot.slane %v595_v49, %v7575_v42  ;;  %v597_v52 = vcombine.high %v595_v49, %v595_v49  ;;  %572 = vst.msk [vmem:[%s7567_s24 + $0x30] sm:$0x1] %vm568_vm3, %v563_v47 }
 0x1ca   : > { %v609_v53 = vrot.slane %v596_v50, %v7575_v42 }
 0x1cb   : > { %616 = vrot.lane.b32.xlu1 %v605_v51, %s7400_s13  ;;  %v613_v54 = vrot.slane %v597_v52, %v7575_v42 }
 0x1cd   : > { %618 = vrot.lane.b32.xlu0 %v609_v53, %s7400_s13 }
 0x1cf   : > { %620 = vrot.lane.b32.xlu1 %v613_v54, %s7400_s13 }
 0x23b   : > { %v615_v23 = vpop.permute.xlu0 %614 }
 0x23c   : > { %627 = vst.msk [vmem:[%s7567_s24] sm:$0x1] %vm626_vm4, %v615_v23 }
 0x23d   : > { %v617_v25 = vpop.permute.xlu1 %616 }
 0x23e   : > { %628 = vst.msk [vmem:[%s7567_s24 + $0x10] sm:$0x1] %vm626_vm4, %v617_v25 }
 0x23f   : > { %v619_v26 = vpop.permute.xlu0 %618 }
 0x240   : > { %629 = vst.msk [vmem:[%s7567_s24 + $0x20] sm:$0x1] %vm626_vm4, %v619_v26 }
 0x241   : > { %v621_v27 = vpop.permute.xlu1 %620 }
 0x242   : > { %630 = vst.msk [vmem:[%s7567_s24 + $0x30] sm:$0x1] %vm626_vm4, %v621_v27 }
 0x294   : > { %v853_v28 = vpop.f32.mrb[6].mxu0  ;;  %v925_v30 = vpop.f32.mrb[6].mxu1 }
 0x295   : > { %v926_v31 = vadd.f32 %v925_v30, %v853_v28  ;;  %v6892_v32 = vpop.f32.mrb[7].mxu0  ;;  %v6897_v33 = vpop.f32.mrb[7].mxu1 }
 0x297   : > { %v930_v34 = vadd.f32 %v926_v31, %v7554_v24 }
 0x299   : > { %v931_v35 = vmax.f32 %v930_v34, 0.0  ;;  %v1096_v36 = vpop.f32.mrb[8].mxu0 }
 0x29a   : > { %v1169_v37 = vpop.f32.mrb[8].mxu1  ;;  %v6904_v38 = vpop.f32.mrb[9].mxu0  ;;  %6918 = vmatpush3.msra.mxu1 %v1096_v36 }
 0x29b   : > { %v6911_v39 = vpop.f32.mrb[9].mxu1  ;;  %6913 = vmatpush3.msra.mxu0 %v1169_v37  ;;  %v939_v40 = vrot.slane %v931_v35, %v7557_v29  ;;  %v965_v41 = vcombine.high %v931_v35, %v931_v35  ;;  %6920 = vmatmul.mubr.msk.f32.vlgmr.msra.gmra.mrb[10].mxu1 %vm391_vm2, %v7465_v6 }
 0x29c   : > { %6915 = vmatmul.mubr.msk.f32.vlgmr.msra.gmra.mrb[10].mxu0 %vm391_vm2, %v1175_v55  ;;  %7252 = vmatprep.subr.bf16.mxu0 %v7391_v3 }
 0x29d   : > { %7255 = vmatprep.subr.bf16.mxu1 %v7391_v3  ;;  %v940_v43 = vcombine.high %v939_v40, %v939_v40  ;;  %v947_v44 = vrot.slane %v939_v40, %v7557_v29  ;;  %v972_v45 = vrot.slane %v965_v41, %v7557_v29  ;;  %7254 = vmatpush3.bf16.msra.mxu0 %v7457_v4 }
 0x29e   : > { %7257 = vmatpush3.bf16.msra.mxu1 %v7467_v7  ;;  %6926 = vmatprep.mubr.msk.f32.mxu0 %vm7392_vm0, %v7393_v8 }
 0x29f   : > { %6933 = vmatprep.mubr.msk.f32.mxu1 %vm7392_vm0, %v7393_v8  ;;  %v954_v46 = vrot.slane %v940_v43, %v7557_v29  ;;  %v955_v47 = vcombine.high %v947_v44, %v947_v44  ;;  %961 = vst.msk [vmem:[%s7567_s24 + $0x1] sm:$0x1] %vm568_vm3, %v947_v44  ;;  %v980_v48 = vrot.slane %v972_v45, %v7557_v29 }
 0x2a0   : > { %v973_v49 = vcombine.high %v972_v45, %v972_v45  ;;  %6936 = vmatprep.subr.mxu0 %v7393_v8  ;;  %6927 = vmatmul.mubr.msk.f32.vlgmr.msra.gmra.mrb[12].mxu0 %vm240_vm1, %v7608_v56 }
 0x2a1   : > { %6934 = vmatmul.mubr.msk.f32.vlgmr.msra.gmra.mrb[12].mxu1 %vm240_vm1, %v7608_v56  ;;  %v956_v50 = vcombine.high %v954_v46, %v954_v46  ;;  %962 = vst.msk [vmem:[%s7567_s24 + $0x11] sm:$0x1] %vm568_vm3, %v954_v46  ;;  %963 = vst.msk [vmem:[%s7567_s24 + $0x21] sm:$0x1] %vm568_vm3, %v955_v47  ;;  %v993_v51 = vrot.slane %v980_v48, %v7575_v42  ;;  %v988_v53 = vcombine.high %v980_v48, %v980_v48 }
 0x2a2   : > { %v987_v52 = vrot.slane %v973_v49, %v7557_v29  ;;  %6941 = vmatprep.subr.mxu1 %v7393_v8  ;;  %6938 = vmatprep.mubr.msk.f32.mxu0 %vm7392_vm0, %v7393_v8 }
 0x2a3   : > { %6943 = vmatprep.mubr.msk.f32.mxu1 %vm7392_vm0, %v7393_v8  ;;  %964 = vst.msk [vmem:[%s7567_s24 + $0x31] sm:$0x1] %vm568_vm3, %v956_v50  ;;  %1006 = vrot.lane.b32.xlu0 %v993_v51, %s7400_s13  ;;  %v1001_v56 = vrot.slane %v988_v53, %v7575_v42 }
 0x2a4   : > { %v997_v54 = vrot.slane %v987_v52, %v7575_v42  ;;  %v989_v55 = vcombine.high %v987_v52, %v987_v52 }
 0x2a6   : > { %1008 = vrot.lane.b32.xlu1 %v997_v54, %s7400_s13  ;;  %v1005_v23 = vrot.slane %v989_v55, %v7575_v42 }
 0x2a7   : > { %1010 = vrot.lane.b32.xlu0 %v1001_v56, %s7400_s13 }
 0x2aa   : > { %1012 = vrot.lane.b32.xlu1 %v1005_v23, %s7400_s13 }
 0x315   : > { %v1007_v25 = vpop.permute.xlu0 %1006 }
 0x316   : > { %1018 = vst.msk [vmem:[%s7567_s24 + $0x1] sm:$0x1] %vm626_vm4, %v1007_v25 }
 0x318   : > { %v1009_v26 = vpop.permute.xlu1 %1008 }
 0x319   : > { %1019 = vst.msk [vmem:[%s7567_s24 + $0x11] sm:$0x1] %vm626_vm4, %v1009_v26  ;;  %v1011_v27 = vpop.permute.xlu0 %1010 }
 0x31a   : > { %1020 = vst.msk [vmem:[%s7567_s24 + $0x21] sm:$0x1] %vm626_vm4, %v1011_v27 }
 0x31c   : > { %v1013_v28 = vpop.permute.xlu1 %1012 }
 0x31d   : > { %1021 = vst.msk [vmem:[%s7567_s24 + $0x31] sm:$0x1] %vm626_vm4, %v1013_v28 }
 0x36e   : > { %v1316_v31 = vpop.f32.mrb[10].mxu1 }
 0x36f   : > { %v1244_v30 = vpop.f32.mrb[10].mxu0  ;;  %v6921_v34 = vpop.f32.mrb[11].mxu1 }
 0x370   : > { %v1317_v32 = vadd.f32 %v1316_v31, %v1244_v30  ;;  %v6916_v33 = vpop.f32.mrb[11].mxu0 }
 0x372   : > { %v1321_v35 = vadd.f32 %v1317_v32, %v7554_v24 }
 0x373   : > { %v1487_v37 = vpop.f32.mrb[12].mxu0 }
 0x374   : > { %v1322_v36 = vmax.f32 %v1321_v35, 0.0  ;;  %v1560_v38 = vpop.f32.mrb[12].mxu1  ;;  %v6928_v39 = vpop.f32.mrb[13].mxu0  ;;  %6942 = vmatpush3.msra.mxu1 %v1487_v37 }
 0x375   : > { %v6935_v40 = vpop.f32.mrb[13].mxu1  ;;  %6937 = vmatpush3.msra.mxu0 %v1560_v38  ;;  %6944 = vmatmul.mubr.msk.f32.vlgmr.msra.gmra.mrb[14].mxu1 %vm391_vm2, %v7465_v6 }
 0x376   : > { %v1330_v41 = vrot.slane %v1322_v36, %v7557_v29  ;;  %v1356_v43 = vcombine.high %v1322_v36, %v1322_v36  ;;  %6939 = vmatmul.mubr.msk.f32.vlgmr.msra.gmra.mrb[14].mxu0 %vm391_vm2, %v7610_v57  ;;  %7258 = vmatprep.subr.bf16.mxu0 %v7391_v3 }
 0x377   : > { %7261 = vmatprep.subr.bf16.mxu1 %v7391_v3  ;;  %7260 = vmatpush3.bf16.msra.mxu0 %v7457_v4 }
 0x378   : > { %v1331_v44 = vcombine.high %v1330_v41, %v1330_v41  ;;  %v1338_v45 = vrot.slane %v1330_v41, %v7557_v29  ;;  %v1363_v46 = vrot.slane %v1356_v43, %v7557_v29  ;;  %7263 = vmatpush3.bf16.msra.mxu1 %v7467_v7  ;;  %6950 = vmatprep.mubr.msk.f32.mxu0 %vm7392_vm0, %v7393_v8 }
 0x379   : > { %6957 = vmatprep.mubr.msk.f32.mxu1 %vm7392_vm0, %v7393_v8  ;;  %6960 = vmatprep.subr.mxu0 %v7393_v8 }
 0x37a   : > { %v1345_v57 = vrot.slane %v1331_v44, %v7557_v29  ;;  %v1346_v47 = vcombine.high %v1338_v45, %v1338_v45  ;;  %1352 = vst.msk [vmem:[%s7567_s24 + $0x2] sm:$0x1] %vm568_vm3, %v1338_v45  ;;  %v1371_v48 = vrot.slane %v1363_v46, %v7557_v29  ;;  %v1364_v49 = vcombine.high %v1363_v46, %v1363_v46 }
 0x37b   : > { %6951 = vmatmul.mubr.msk.f32.vlgmr.msra.gmra.mrb[16].mxu0 %vm240_vm1, %v7612_v58  ;;  %6958 = vmatmul.mubr.msk.f32.vlgmr.msra.gmra.mrb[16].mxu1 %vm240_vm1, %v7612_v58 }
 0x37c   : > { %v1347_v50 = vcombine.high %v1345_v57, %v1345_v57  ;;  %1353 = vst.msk [vmem:[%s7567_s24 + $0x12] sm:$0x1] %vm568_vm3, %v1345_v57  ;;  %1354 = vst.msk [vmem:[%s7567_s24 + $0x22] sm:$0x1] %vm568_vm3, %v1346_v47  ;;  %v1384_v51 = vrot.slane %v1371_v48, %v7575_v42  ;;  %v1378_v52 = vrot.slane %v1364_v49, %v7557_v29  ;;  %6965 = vmatprep.subr.mxu1 %v7393_v8 }
 0x37d   : > { %v1379_v53 = vcombine.high %v1371_v48, %v1371_v48  ;;  %6962 = vmatprep.mubr.msk.f32.mxu0 %vm7392_vm0, %v7393_v8  ;;  %6967 = vmatprep.mubr.msk.f32.mxu1 %vm7392_vm0, %v7393_v8 }
 0x37e   : > { %1355 = vst.msk [vmem:[%s7567_s24 + $0x32] sm:$0x1] %vm568_vm3, %v1347_v50  ;;  %1397 = vrot.lane.b32.xlu0 %v1384_v51, %s7400_s13  ;;  %v1388_v58 = vrot.slane %v1378_v52, %v7575_v42  ;;  %v1380_v54 = vcombine.high %v1378_v52, %v1378_v52 }
 0x37f   : > { %v1392_v55 = vrot.slane %v1379_v53, %v7575_v42 }
 0x380   : > { %1399 = vrot.lane.b32.xlu1 %v1388_v58, %s7400_s13  ;;  %v1396_v56 = vrot.slane %v1380_v54, %v7575_v42 }
 0x382   : > { %1401 = vrot.lane.b32.xlu0 %v1392_v55, %s7400_s13 }
 0x384   : > { %1403 = vrot.lane.b32.xlu1 %v1396_v56, %s7400_s13 }
 0x3f0   : > { %v1398_v23 = vpop.permute.xlu0 %1397 }
 0x3f1   : > { %1409 = vst.msk [vmem:[%s7567_s24 + $0x2] sm:$0x1] %vm626_vm4, %v1398_v23 }
 0x3f2   : > { %v1400_v25 = vpop.permute.xlu1 %1399 }
 0x3f3   : > { %1410 = vst.msk [vmem:[%s7567_s24 + $0x12] sm:$0x1] %vm626_vm4, %v1400_v25 }
 0x3f4   : > { %v1402_v26 = vpop.permute.xlu0 %1401 }
 0x3f5   : > { %1411 = vst.msk [vmem:[%s7567_s24 + $0x22] sm:$0x1] %vm626_vm4, %v1402_v26 }
 0x3f6   : > { %v1404_v27 = vpop.permute.xlu1 %1403 }
 0x3f7   : > { %1412 = vst.msk [vmem:[%s7567_s24 + $0x32] sm:$0x1] %vm626_vm4, %v1404_v27 }
 0x448   : > { %v1707_v30 = vpop.f32.mrb[14].mxu1 }
 0x449   : > { %v1635_v28 = vpop.f32.mrb[14].mxu0  ;;  %v6945_v33 = vpop.f32.mrb[15].mxu1 }
 0x44a   : > { %v1708_v31 = vadd.f32 %v1707_v30, %v1635_v28  ;;  %v6940_v32 = vpop.f32.mrb[15].mxu0 }
 0x44c   : > { %v1712_v34 = vadd.f32 %v1708_v31, %v7554_v24 }
 0x44e   : > { %v1713_v35 = vmax.f32 %v1712_v34, 0.0  ;;  %v1878_v36 = vpop.f32.mrb[16].mxu0  ;;  %v1951_v37 = vpop.f32.mrb[16].mxu1 }
 0x44f   : > { %v6952_v38 = vpop.f32.mrb[17].mxu0  ;;  %v6959_v39 = vpop.f32.mrb[17].mxu1  ;;  %6961 = vmatpush3.msra.mxu0 %v1951_v37  ;;  %6966 = vmatpush3.msra.mxu1 %v1878_v36 }
 0x450   : > { %v1721_v40 = vrot.slane %v1713_v35, %v7557_v29  ;;  %v1747_v41 = vcombine.high %v1713_v35, %v1713_v35  ;;  %6963 = vmatmul.mubr.msk.f32.vlgmr.msra.gmra.mrb[18].mxu0 %vm391_vm2, %v7614_v59  ;;  %6968 = vmatmul.mubr.msk.f32.vlgmr.msra.gmra.mrb[18].mxu1 %vm391_vm2, %v7465_v6 }
 0x451   : > { %7264 = vmatprep.subr.bf16.mxu0 %v7391_v3  ;;  %7267 = vmatprep.subr.bf16.mxu1 %v7391_v3 }
 0x452   : > { %v1722_v43 = vcombine.high %v1721_v40, %v1721_v40  ;;  %v1729_v44 = vrot.slane %v1721_v40, %v7557_v29  ;;  %v1754_v45 = vrot.slane %v1747_v41, %v7557_v29  ;;  %7266 = vmatpush3.bf16.msra.mxu0 %v7457_v4  ;;  %7269 = vmatpush3.bf16.msra.mxu1 %v7467_v7 }
 0x453   : > { %6974 = vmatprep.mubr.msk.f32.mxu0 %vm7392_vm0, %v7393_v8  ;;  %6981 = vmatprep.mubr.msk.f32.mxu1 %vm7392_vm0, %v7393_v8 }
 0x454   : > { %v1736_v59 = vrot.slane %v1722_v43, %v7557_v29  ;;  %v1737_v46 = vcombine.high %v1729_v44, %v1729_v44  ;;  %1743 = vst.msk [vmem:[%s7567_s24 + $0x3] sm:$0x1] %vm568_vm3, %v1729_v44  ;;  %v1762_v57 = vrot.slane %v1754_v45, %v7557_v29  ;;  %v1755_v47 = vcombine.high %v1754_v45, %v1754_v45 }
 0x455   : > { %6984 = vmatprep.subr.mxu0 %v7393_v8  ;;  %6975 = vmatmul.mubr.msk.f32.vlgmr.msra.gmra.mrb[20].mxu0 %vm240_vm1, %v7616_v60 }
 0x456   : > { %6982 = vmatmul.mubr.msk.f32.vlgmr.msra.gmra.mrb[20].mxu1 %vm240_vm1, %v7616_v60  ;;  %v1738_v48 = vcombine.high %v1736_v59, %v1736_v59  ;;  %1744 = vst.msk [vmem:[%s7567_s24 + $0x13] sm:$0x1] %vm568_vm3, %v1736_v59  ;;  %1745 = vst.msk [vmem:[%s7567_s24 + $0x23] sm:$0x1] %vm568_vm3, %v1737_v46  ;;  %v1775_v49 = vrot.slane %v1762_v57, %v7575_v42  ;;  %v1769_v50 = vrot.slane %v1755_v47, %v7557_v29 }
 0x457   : > { %v1770_v51 = vcombine.high %v1762_v57, %v1762_v57  ;;  %6989 = vmatprep.subr.mxu1 %v7393_v8  ;;  %6986 = vmatprep.mubr.msk.f32.mxu0 %vm7392_vm0, %v7393_v8 }
 0x458   : > { %6991 = vmatprep.mubr.msk.f32.mxu1 %vm7392_vm0, %v7393_v8  ;;  %1746 = vst.msk [vmem:[%s7567_s24 + $0x33] sm:$0x1] %vm568_vm3, %v1738_v48  ;;  %1788 = vrot.lane.b32.xlu0 %v1775_v49, %s7400_s13  ;;  %v1779_v60 = vrot.slane %v1769_v50, %v7575_v42  ;;  %v1771_v52 = vcombine.high %v1769_v50, %v1769_v50 }
 0x459   : > { %v1783_v53 = vrot.slane %v1770_v51, %v7575_v42 }
 0x45a   : > { %1790 = vrot.lane.b32.xlu1 %v1779_v60, %s7400_s13  ;;  %v1787_v58 = vrot.slane %v1771_v52, %v7575_v42 }
 0x45c   : > { %1792 = vrot.lane.b32.xlu0 %v1783_v53, %s7400_s13 }
 0x45e   : > { %1794 = vrot.lane.b32.xlu1 %v1787_v58, %s7400_s13 }
 0x4ca   : > { %v1789_v54 = vpop.permute.xlu0 %1788 }
 0x4cb   : > { %1800 = vst.msk [vmem:[%s7567_s24 + $0x3] sm:$0x1] %vm626_vm4, %v1789_v54 }
 0x4cc   : > { %v1791_v55 = vpop.permute.xlu1 %1790 }
 0x4cd   : > { %1801 = vst.msk [vmem:[%s7567_s24 + $0x13] sm:$0x1] %vm626_vm4, %v1791_v55 }
 0x4ce   : > { %v1793_v56 = vpop.permute.xlu0 %1792 }
 0x4cf   : > { %1802 = vst.msk [vmem:[%s7567_s24 + $0x23] sm:$0x1] %vm626_vm4, %v1793_v56  ;;  %v2978_v56 = vld [vmem:[%s8470_s3] sm:$0xff] }
 0x4d0   : > { %v1795_v23 = vpop.permute.xlu1 %1794 }
 0x4d1   : > { %1803 = vst.msk [vmem:[%s7567_s24 + $0x33] sm:$0x1] %vm626_vm4, %v1795_v23  ;;  %v2979_v23 = vld [vmem:[%s8470_s3 + $0x8] sm:$0xff] }
 0x523   : > { %v2026_v25 = vpop.f32.mrb[18].mxu0  ;;  %v2098_v26 = vpop.f32.mrb[18].mxu1 }
 0x524   : > { %v2099_v27 = vadd.f32 %v2098_v26, %v2026_v25  ;;  %v6964_v28 = vpop.f32.mrb[19].mxu0  ;;  %v6969_v30 = vpop.f32.mrb[19].mxu1  ;;  %v6633_v25 = vld [vmem:[%s8470_s3 + $0x10] sm:$0xff]  ;;  %v6634_v26 = vld [vmem:[%s8470_s3 + $0x18] sm:$0xff] }
 0x526   : > { %v2103_v31 = vadd.f32 %v2099_v27, %v7554_v24 }
 0x528   : > { %v2104_v32 = vmax.f32 %v2103_v31, 0.0  ;;  %v2269_v33 = vpop.f32.mrb[20].mxu0 }
 0x529   : > { %v2342_v34 = vpop.f32.mrb[20].mxu1  ;;  %v6976_v35 = vpop.f32.mrb[21].mxu0  ;;  %6990 = vmatpush3.msra.mxu1 %v2269_v33  ;;  %v7892_v33 = vpack.c.bf16 %v6634_v26, %v6633_v25 }
 0x52a   : > { %v6983_v36 = vpop.f32.mrb[21].mxu1  ;;  %6985 = vmatpush3.msra.mxu0 %v2342_v34  ;;  %v2112_v37 = vrot.slane %v2104_v32, %v7557_v29  ;;  %v2138_v38 = vcombine.high %v2104_v32, %v2104_v32  ;;  %6992 = vmatmul.mubr.msk.f32.vlgmr.msra.gmra.mrb[22].mxu1 %vm391_vm2, %v7465_v6  ;;  %v7890_v32 = vpack.c.bf16 %v2979_v23, %v2978_v56 }
 0x52b   : > { %6987 = vmatmul.mubr.msk.f32.vlgmr.msra.gmra.mrb[22].mxu0 %vm391_vm2, %v7618_v61  ;;  %7270 = vmatprep.subr.bf16.mxu0 %v7391_v3 }
 0x52c   : > { %7273 = vmatprep.subr.bf16.mxu1 %v7391_v3  ;;  %v2113_v39 = vcombine.high %v2112_v37, %v2112_v37  ;;  %v2120_v40 = vrot.slane %v2112_v37, %v7557_v29  ;;  %v2145_v41 = vrot.slane %v2138_v38, %v7557_v29  ;;  %7272 = vmatpush3.bf16.msra.mxu0 %v7457_v4 }
 0x52d   : > { %7275 = vmatpush3.bf16.msra.mxu1 %v7467_v7  ;;  %6998 = vmatprep.mubr.msk.f32.mxu0 %vm7392_vm0, %v7393_v8 }
 0x52e   : > { %7005 = vmatprep.mubr.msk.f32.mxu1 %vm7392_vm0, %v7393_v8  ;;  %v2127_v61 = vrot.slane %v2113_v39, %v7557_v29  ;;  %v2128_v43 = vcombine.high %v2120_v40, %v2120_v40  ;;  %2134 = vst.msk [vmem:[%s7567_s24 + $0x4] sm:$0x1] %vm568_vm3, %v2120_v40  ;;  %v2153_v44 = vrot.slane %v2145_v41, %v7557_v29 }
 0x52f   : > { %v2146_v45 = vcombine.high %v2145_v41, %v2145_v41  ;;  %7008 = vmatprep.subr.mxu0 %v7393_v8  ;;  %6999 = vmatmul.mubr.msk.f32.vlgmr.msra.gmra.mrb[24].mxu0 %vm240_vm1, %v7620_v62 }
 0x530   : > { %7006 = vmatmul.mubr.msk.f32.vlgmr.msra.gmra.mrb[24].mxu1 %vm240_vm1, %v7620_v62  ;;  %v2129_v4 = vcombine.high %v2127_v61, %v2127_v61  ;;  %2135 = vst.msk [vmem:[%s7567_s24 + $0x14] sm:$0x1] %vm568_vm3, %v2127_v61  ;;  %2136 = vst.msk [vmem:[%s7567_s24 + $0x24] sm:$0x1] %vm568_vm3, %v2128_v43  ;;  %v2166_v7 = vrot.slane %v2153_v44, %v7575_v42  ;;  %v2161_v46 = vcombine.high %v2153_v44, %v2153_v44 }
 0x531   : > { %v2160_v59 = vrot.slane %v2146_v45, %v7557_v29  ;;  %7013 = vmatprep.subr.mxu1 %v7393_v8  ;;  %7010 = vmatprep.mubr.msk.f32.mxu0 %vm7392_vm0, %v7393_v8 }
 0x532   : > { %7015 = vmatprep.mubr.msk.f32.mxu1 %vm7392_vm0, %v7393_v8  ;;  %2137 = vst.msk [vmem:[%s7567_s24 + $0x34] sm:$0x1] %vm568_vm3, %v2129_v4  ;;  %2179 = vrot.lane.b32.xlu0 %v2166_v7, %s7400_s13  ;;  %v2174_v47 = vrot.slane %v2161_v46, %v7575_v42 }
 0x533   : > { %v2170_v62 = vrot.slane %v2160_v59, %v7575_v42  ;;  %v2162_v57 = vcombine.high %v2160_v59, %v2160_v59 }
 0x535   : > { %2181 = vrot.lane.b32.xlu1 %v2170_v62, %s7400_s13  ;;  %v2178_v48 = vrot.slane %v2162_v57, %v7575_v42 }
 0x536   : > { %2183 = vrot.lane.b32.xlu0 %v2174_v47, %s7400_s13 }
 0x539   : > { %2185 = vrot.lane.b32.xlu1 %v2178_v48, %s7400_s13 }
 0x5a4   : > { %v2180_v49 = vpop.permute.xlu0 %2179 }
 0x5a5   : > { %2191 = vst.msk [vmem:[%s7567_s24 + $0x4] sm:$0x1] %vm626_vm4, %v2180_v49 }
 0x5a7   : > { %v2182_v50 = vpop.permute.xlu1 %2181 }
 0x5a8   : > { %2192 = vst.msk [vmem:[%s7567_s24 + $0x14] sm:$0x1] %vm626_vm4, %v2182_v50  ;;  %v2184_v51 = vpop.permute.xlu0 %2183 }
 0x5a9   : > { %2193 = vst.msk [vmem:[%s7567_s24 + $0x24] sm:$0x1] %vm626_vm4, %v2184_v51 }
 0x5ab   : > { %v2186_v60 = vpop.permute.xlu1 %2185 }
 0x5ac   : > { %2194 = vst.msk [vmem:[%s7567_s24 + $0x34] sm:$0x1] %vm626_vm4, %v2186_v60 }
 0x5fd   : > { %v2489_v53 = vpop.f32.mrb[22].mxu1 }
 0x5fe   : > { %v2417_v52 = vpop.f32.mrb[22].mxu0  ;;  %v6993_v55 = vpop.f32.mrb[23].mxu1 }
 0x5ff   : > { %v2490_v58 = vadd.f32 %v2489_v53, %v2417_v52  ;;  %v6988_v54 = vpop.f32.mrb[23].mxu0 }
 0x601   : > { %v2494_v27 = vadd.f32 %v2490_v58, %v7554_v24 }
 0x602   : > { %v2660_v30 = vpop.f32.mrb[24].mxu0 }
 0x603   : > { %v2495_v28 = vmax.f32 %v2494_v27, 0.0  ;;  %v2733_v31 = vpop.f32.mrb[24].mxu1  ;;  %v7000_v34 = vpop.f32.mrb[25].mxu0  ;;  %7014 = vmatpush3.msra.mxu1 %v2660_v30 }
 0x604   : > { %v7007_v35 = vpop.f32.mrb[25].mxu1  ;;  %7009 = vmatpush3.msra.mxu0 %v2733_v31  ;;  %7016 = vmatmul.mubr.msk.f32.vlgmr.msra.gmra.mrb[26].mxu1 %vm391_vm2, %v7465_v6 }
 0x605   : > { %v2503_v36 = vrot.slane %v2495_v28, %v7557_v29  ;;  %v2529_v37 = vcombine.high %v2495_v28, %v2495_v28  ;;  %7011 = vmatmul.mubr.msk.f32.vlgmr.msra.gmra.mrb[26].mxu0 %vm391_vm2, %v7622_v63  ;;  %7276 = vmatprep.subr.bf16.mxu0 %v7391_v3 }
 0x606   : > { %7279 = vmatprep.subr.bf16.mxu1 %v7391_v3  ;;  %7278 = vmatpush3.bf16.msra.mxu0 %v7890_v32 }
 0x607   : > { %v2504_v38 = vcombine.high %v2503_v36, %v2503_v36  ;;  %v2511_v39 = vrot.slane %v2503_v36, %v7557_v29  ;;  %v2536_v40 = vrot.slane %v2529_v37, %v7557_v29  ;;  %7281 = vmatpush3.bf16.msra.mxu1 %v7892_v33  ;;  %7022 = vmatprep.mubr.msk.f32.mxu0 %vm7392_vm0, %v7393_v8 }
 0x608   : > { %7029 = vmatprep.mubr.msk.f32.mxu1 %vm7392_vm0, %v7393_v8  ;;  %7032 = vmatprep.subr.mxu0 %v7393_v8 }
 0x609   : > { %v2518_v63 = vrot.slane %v2504_v38, %v7557_v29  ;;  %v2519_v41 = vcombine.high %v2511_v39, %v2511_v39  ;;  %2525 = vst.msk [vmem:[%s7567_s24 + $0x5] sm:$0x1] %vm568_vm3, %v2511_v39  ;;  %v2544_v61 = vrot.slane %v2536_v40, %v7557_v29  ;;  %v2537_v43 = vcombine.high %v2536_v40, %v2536_v40 }
 0x60a   : > { %7023 = vmatmul.mubr.msk.f32.vlgmr.msra.gmra.mrb[28].mxu0 %vm240_vm1, %v7624_v0  ;;  %7030 = vmatmul.mubr.msk.f32.vlgmr.msra.gmra.mrb[28].mxu1 %vm240_vm1, %v7624_v0 }
 0x60b   : > { %v2520_v44 = vcombine.high %v2518_v63, %v2518_v63  ;;  %2526 = vst.msk [vmem:[%s7567_s24 + $0x15] sm:$0x1] %vm568_vm3, %v2518_v63  ;;  %2527 = vst.msk [vmem:[%s7567_s24 + $0x25] sm:$0x1] %vm568_vm3, %v2519_v41  ;;  %v2557_v45 = vrot.slane %v2544_v61, %v7575_v42  ;;  %v2551_v4 = vrot.slane %v2537_v43, %v7557_v29  ;;  %7037 = vmatprep.subr.mxu1 %v7393_v8 }
 0x60c   : > { %v2552_v7 = vcombine.high %v2544_v61, %v2544_v61  ;;  %7034 = vmatprep.mubr.msk.f32.mxu0 %vm7392_vm0, %v7393_v8  ;;  %7039 = vmatprep.mubr.msk.f32.mxu1 %vm7392_vm0, %v7393_v8 }
 0x60d   : > { %2528 = vst.msk [vmem:[%s7567_s24 + $0x35] sm:$0x1] %vm568_vm3, %v2520_v44  ;;  %2570 = vrot.lane.b32.xlu0 %v2557_v45, %s7400_s13  ;;  %v2561_v0 = vrot.slane %v2551_v4, %v7575_v42  ;;  %v2553_v59 = vcombine.high %v2551_v4, %v2551_v4 }
 0x60e   : > { %v2565_v46 = vrot.slane %v2552_v7, %v7575_v42  ;;  %v8002_v7 = vld [vmem:[%s8469_s2] sm:$0xff] }
 0x60f   : > { %2572 = vrot.lane.b32.xlu1 %v2561_v0, %s7400_s13  ;;  %v2569_v62 = vrot.slane %v2553_v59, %v7575_v42 }
 0x611   : > { %2574 = vrot.lane.b32.xlu0 %v2565_v46, %s7400_s13 }
 0x613   : > { %2576 = vrot.lane.b32.xlu1 %v2569_v62, %s7400_s13 }
 0x67f   : > { %v2571_v57 = vpop.permute.xlu0 %2570 }
 0x680   : > { %2582 = vst.msk [vmem:[%s7567_s24 + $0x5] sm:$0x1] %vm626_vm4, %v2571_v57 }
 0x681   : > { %v2573_v47 = vpop.permute.xlu1 %2572 }
 0x682   : > { %2583 = vst.msk [vmem:[%s7567_s24 + $0x15] sm:$0x1] %vm626_vm4, %v2573_v47 }
 0x683   : > { %v2575_v48 = vpop.permute.xlu0 %2574 }
 0x684   : > { %2584 = vst.msk [vmem:[%s7567_s24 + $0x25] sm:$0x1] %vm626_vm4, %v2575_v48 }
 0x685   : > { %v2577_v49 = vpop.permute.xlu1 %2576 }
 0x686   : > { %2585 = vst.msk [vmem:[%s7567_s24 + $0x35] sm:$0x1] %vm626_vm4, %v2577_v49 }
 0x6d7   : > { %v2880_v51 = vpop.f32.mrb[26].mxu1 }
 0x6d8   : > { %v2808_v50 = vpop.f32.mrb[26].mxu0  ;;  %v7017_v53 = vpop.f32.mrb[27].mxu1 }
 0x6d9   : > { %v2881_v60 = vadd.f32 %v2880_v51, %v2808_v50  ;;  %v7012_v52 = vpop.f32.mrb[27].mxu0 }
 0x6da   : > { %v8011_v52 = vld [vmem:[%s8468_s1] sm:$0xff] }
 0x6db   : > { %v2885_v58 = vadd.f32 %v2881_v60, %v7554_v24 }
 0x6dd   : > { %v2886_v54 = vmax.f32 %v2885_v58, 0.0  ;;  %v3051_v55 = vpop.f32.mrb[28].mxu0  ;;  %v3124_v56 = vpop.f32.mrb[28].mxu1 }
 0x6de   : > { %v7024_v23 = vpop.f32.mrb[29].mxu0  ;;  %v7031_v25 = vpop.f32.mrb[29].mxu1  ;;  %7033 = vmatpush3.msra.mxu0 %v3124_v56  ;;  %7038 = vmatpush3.msra.mxu1 %v3051_v55 }
 0x6df   : > { %v2894_v26 = vrot.slane %v2886_v54, %v7557_v29  ;;  %v2920_v27 = vcombine.high %v2886_v54, %v2886_v54  ;;  %7035 = vmatmul.mubr.msk.f32.vlgmr.msra.gmra.mrb[30].mxu0 %vm391_vm2, %v7626_v1  ;;  %7040 = vmatmul.mubr.msk.f32.vlgmr.msra.gmra.mrb[30].mxu1 %vm391_vm2, %v7465_v6 }
 0x6e0   : > { %7282 = vmatprep.subr.bf16.mxu0 %v7391_v3  ;;  %7285 = vmatprep.subr.bf16.mxu1 %v7391_v3 }
 0x6e1   : > { %v2895_v24 = vcombine.high %v2894_v26, %v2894_v26  ;;  %v2902_v28 = vrot.slane %v2894_v26, %v7557_v29  ;;  %v2927_v30 = vrot.slane %v2920_v27, %v7557_v29  ;;  %7284 = vmatpush3.bf16.msra.mxu0 %v7890_v32  ;;  %7287 = vmatpush3.bf16.msra.mxu1 %v7892_v33 }
 0x6e2   : > { %7046 = vmatprep.mubr.msk.f32.mxu0 %vm7392_vm0, %v7393_v8  ;;  %7053 = vmatprep.mubr.msk.f32.mxu1 %vm7392_vm0, %v7393_v8 }
 0x6e3   : > { %v2909_v6 = vrot.slane %v2895_v24, %v7557_v29  ;;  %v2910_v1 = vcombine.high %v2902_v28, %v2902_v28  ;;  %2916 = vst.msk [vmem:[%s7567_s24 + $0x6] sm:$0x1] %vm568_vm3, %v2902_v28  ;;  %v2935_v31 = vrot.slane %v2927_v30, %v7557_v29  ;;  %v2928_v34 = vcombine.high %v2927_v30, %v2927_v30 }
 0x6e4   : > { %7056 = vmatprep.subr.mxu0 %v7393_v8  ;;  %7047 = vmatmul.mubr.msk.f32.vlgmr.msra.gmra.mrb[32].mxu0 %vm240_vm1, %v7505_v10 }
 0x6e5   : > { %7054 = vmatmul.mubr.msk.f32.vlgmr.msra.gmra.mrb[32].mxu1 %vm240_vm1, %v7505_v10  ;;  %v2911_v35 = vcombine.high %v2909_v6, %v2909_v6  ;;  %2917 = vst.msk [vmem:[%s7567_s24 + $0x16] sm:$0x1] %vm568_vm3, %v2909_v6  ;;  %2918 = vst.msk [vmem:[%s7567_s24 + $0x26] sm:$0x1] %vm568_vm3, %v2910_v1  ;;  %v2948_v36 = vrot.slane %v2935_v31, %v7575_v42  ;;  %v2942_v37 = vrot.slane %v2928_v34, %v7557_v29 }
 0x6e6   : > { %v2943_v38 = vcombine.high %v2935_v31, %v2935_v31  ;;  %7061 = vmatprep.subr.mxu1 %v7393_v8  ;;  %7058 = vmatprep.mubr.msk.f32.mxu0 %vm7392_vm0, %v7393_v8 }
 0x6e7   : > { %7063 = vmatprep.mubr.msk.f32.mxu1 %vm7392_vm0, %v7393_v8  ;;  %2919 = vst.msk [vmem:[%s7567_s24 + $0x36] sm:$0x1] %vm568_vm3, %v2911_v35  ;;  %2961 = vrot.lane.b32.xlu0 %v2948_v36, %s7400_s13  ;;  %v2952_v10 = vrot.slane %v2942_v37, %v7575_v42  ;;  %v2944_v39 = vcombine.high %v2942_v37, %v2942_v37 }
 0x6e8   : > { %v2956_v40 = vrot.slane %v2943_v38, %v7575_v42 }
 0x6e9   : > { %2963 = vrot.lane.b32.xlu1 %v2952_v10, %s7400_s13  ;;  %v2960_v63 = vrot.slane %v2944_v39, %v7575_v42 }
 0x6eb   : > { %2965 = vrot.lane.b32.xlu0 %v2956_v40, %s7400_s13 }
 0x6ed   : > { %2967 = vrot.lane.b32.xlu1 %v2960_v63, %s7400_s13 }
 0x759   : > { %v2962_v41 = vpop.permute.xlu0 %2961 }
 0x75a   : > { %2973 = vst.msk [vmem:[%s7567_s24 + $0x6] sm:$0x1] %vm626_vm4, %v2962_v41 }
 0x75b   : > { %v2964_v61 = vpop.permute.xlu1 %2963 }
 0x75c   : > { %2974 = vst.msk [vmem:[%s7567_s24 + $0x16] sm:$0x1] %vm626_vm4, %v2964_v61 }
 0x75d   : > { %v2966_v43 = vpop.permute.xlu0 %2965 }
 0x75e   : > { %2975 = vst.msk [vmem:[%s7567_s24 + $0x26] sm:$0x1] %vm626_vm4, %v2966_v43 }
 0x75f   : > { %v2968_v44 = vpop.permute.xlu1 %2967 }
 0x760   : > { %2976 = vst.msk [vmem:[%s7567_s24 + $0x36] sm:$0x1] %vm626_vm4, %v2968_v44 }
 0x7b2   : > { %v3199_v45 = vpop.f32.mrb[30].mxu0  ;;  %v3271_v4 = vpop.f32.mrb[30].mxu1 }
 0x7b3   : > { %v3272_v0 = vadd.f32 %v3271_v4, %v3199_v45  ;;  %v7036_v59 = vpop.f32.mrb[31].mxu0  ;;  %v7041_v46 = vpop.f32.mrb[31].mxu1 }
 0x7b5   : > { %v3276_v62 = vadd.f32 %v8002_v7, %v3272_v0 }
 0x7b7   : > { %v3277_v57 = vmax.f32 %v3276_v62, 0.0  ;;  %v3440_v47 = vpop.f32.mrb[32].mxu0 }
 0x7b8   : > { %v3513_v48 = vpop.f32.mrb[32].mxu1  ;;  %v7048_v49 = vpop.f32.mrb[33].mxu0  ;;  %7062 = vmatpush3.msra.mxu1 %v3440_v47 }
 0x7b9   : > { %v7055_v50 = vpop.f32.mrb[33].mxu1  ;;  %7057 = vmatpush3.msra.mxu0 %v3513_v48  ;;  %v3285_v51 = vrot.slane %v3277_v57, %v7557_v29  ;;  %v3311_v60 = vcombine.high %v3277_v57, %v3277_v57  ;;  %7064 = vmatmul.mubr.msk.f32.vlgmr.msra.gmra.mrb[34].mxu1 %vm391_vm2, %v8011_v52 }
 0x7ba   : > { %7059 = vmatmul.mubr.msk.f32.vlgmr.msra.gmra.mrb[34].mxu0 %vm391_vm2, %v7628_v2  ;;  %7288 = vmatprep.subr.bf16.mxu0 %v7391_v3 }
 0x7bb   : > { %7291 = vmatprep.subr.bf16.mxu1 %v7391_v3  ;;  %v3286_v53 = vcombine.high %v3285_v51, %v3285_v51  ;;  %v3293_v58 = vrot.slane %v3285_v51, %v7557_v29  ;;  %v3318_v54 = vrot.slane %v3311_v60, %v7557_v29  ;;  %7290 = vmatpush3.bf16.msra.mxu0 %v7890_v32 }
 0x7bc   : > { %7293 = vmatpush3.bf16.msra.mxu1 %v7892_v33  ;;  %7070 = vmatprep.mubr.msk.f32.mxu0 %vm7392_vm0, %v7393_v8 }
 0x7bd   : > { %7077 = vmatprep.mubr.msk.f32.mxu1 %vm7392_vm0, %v7393_v8  ;;  %v3300_v2 = vrot.slane %v3286_v53, %v7557_v29  ;;  %v3301_v55 = vcombine.high %v3293_v58, %v3293_v58  ;;  %3307 = vst.msk [vmem:[%s7567_s24 + $0x7] sm:$0x1] %vm568_vm3, %v3293_v58  ;;  %v3326_v56 = vrot.slane %v3318_v54, %v7557_v29 }
 0x7be   : > { %v3319_v23 = vcombine.high %v3318_v54, %v3318_v54  ;;  %7080 = vmatprep.subr.mxu0 %v7393_v8  ;;  %7071 = vmatmul.mubr.msk.f32.vlgmr.msra.gmra.mrb[36].mxu0 %vm240_vm1, %v7630_v5 }
 0x7bf   : > { %7078 = vmatmul.mubr.msk.f32.vlgmr.msra.gmra.mrb[36].mxu1 %vm240_vm1, %v7630_v5  ;;  %v3302_v25 = vcombine.high %v3300_v2, %v3300_v2  ;;  %3308 = vst.msk [vmem:[%s7567_s24 + $0x17] sm:$0x1] %vm568_vm3, %v3300_v2  ;;  %3309 = vst.msk [vmem:[%s7567_s24 + $0x27] sm:$0x1] %vm568_vm3, %v3301_v55  ;;  %v3339_v26 = vrot.slane %v3326_v56, %v7575_v42  ;;  %v3334_v24 = vcombine.high %v3326_v56, %v3326_v56 }
 0x7c0   : > { %v3333_v27 = vrot.slane %v3319_v23, %v7557_v29  ;;  %7085 = vmatprep.subr.mxu1 %v7393_v8  ;;  %7082 = vmatprep.mubr.msk.f32.mxu0 %vm7392_vm0, %v7393_v8 }
 0x7c1   : > { %7087 = vmatprep.mubr.msk.f32.mxu1 %vm7392_vm0, %v7393_v8  ;;  %3310 = vst.msk [vmem:[%s7567_s24 + $0x37] sm:$0x1] %vm568_vm3, %v3302_v25  ;;  %3352 = vrot.lane.b32.xlu0 %v3339_v26, %s7400_s13  ;;  %v3347_v30 = vrot.slane %v3334_v24, %v7575_v42 }
 0x7c2   : > { %v3343_v5 = vrot.slane %v3333_v27, %v7575_v42  ;;  %v3335_v28 = vcombine.high %v3333_v27, %v3333_v27 }
 0x7c4   : > { %3354 = vrot.lane.b32.xlu1 %v3343_v5, %s7400_s13  ;;  %v3351_v6 = vrot.slane %v3335_v28, %v7575_v42 }
 0x7c5   : > { %3356 = vrot.lane.b32.xlu0 %v3347_v30, %s7400_s13 }
 0x7c8   : > { %3358 = vrot.lane.b32.xlu1 %v3351_v6, %s7400_s13 }
 0x833   : > { %v3353_v1 = vpop.permute.xlu0 %3352 }
 0x834   : > { %3364 = vst.msk [vmem:[%s7567_s24 + $0x7] sm:$0x1] %vm626_vm4, %v3353_v1 }
 0x836   : > { %v3355_v31 = vpop.permute.xlu1 %3354 }
 0x837   : > { %3365 = vst.msk [vmem:[%s7567_s24 + $0x17] sm:$0x1] %vm626_vm4, %v3355_v31  ;;  %v3357_v34 = vpop.permute.xlu0 %3356 }
 0x838   : > { %3366 = vst.msk [vmem:[%s7567_s24 + $0x27] sm:$0x1] %vm626_vm4, %v3357_v34 }
 0x83a   : > { %v3359_v35 = vpop.permute.xlu1 %3358 }
 0x83b   : > { %3367 = vst.msk [vmem:[%s7567_s24 + $0x37] sm:$0x1] %vm626_vm4, %v3359_v35 }
 0x88c   : > { %v3660_v37 = vpop.f32.mrb[34].mxu1 }
 0x88d   : > { %v3588_v36 = vpop.f32.mrb[34].mxu0  ;;  %v7065_v39 = vpop.f32.mrb[35].mxu1 }
 0x88e   : > { %v3661_v38 = vadd.f32 %v3660_v37, %v3588_v36  ;;  %v7060_v10 = vpop.f32.mrb[35].mxu0 }
 0x890   : > { %v3665_v40 = vadd.f32 %v3661_v38, %v8002_v7 }
 0x891   : > { %v3831_v41 = vpop.f32.mrb[36].mxu0 }
 0x892   : > { %v3666_v63 = vmax.f32 %v3665_v40, 0.0  ;;  %v3904_v61 = vpop.f32.mrb[36].mxu1  ;;  %v7072_v43 = vpop.f32.mrb[37].mxu0  ;;  %7086 = vmatpush3.msra.mxu1 %v3831_v41 }
 0x893   : > { %v7079_v44 = vpop.f32.mrb[37].mxu1  ;;  %7081 = vmatpush3.msra.mxu0 %v3904_v61  ;;  %7088 = vmatmul.mubr.msk.f32.vlgmr.msra.gmra.mrb[38].mxu1 %vm391_vm2, %v8011_v52 }
 0x894   : > { %v3674_v45 = vrot.slane %v3666_v63, %v7557_v29  ;;  %v3700_v4 = vcombine.high %v3666_v63, %v3666_v63  ;;  %7083 = vmatmul.mubr.msk.f32.vlgmr.msra.gmra.mrb[38].mxu0 %vm391_vm2, %v7632_v9  ;;  %7294 = vmatprep.subr.bf16.mxu0 %v7391_v3 }
 0x895   : > { %7297 = vmatprep.subr.bf16.mxu1 %v7391_v3  ;;  %7296 = vmatpush3.bf16.msra.mxu0 %v7890_v32 }
 0x896   : > { %v3675_v0 = vcombine.high %v3674_v45, %v3674_v45  ;;  %v3682_v59 = vrot.slane %v3674_v45, %v7557_v29  ;;  %v3707_v46 = vrot.slane %v3700_v4, %v7557_v29  ;;  %7299 = vmatpush3.bf16.msra.mxu1 %v7892_v33  ;;  %7094 = vmatprep.mubr.msk.f32.mxu0 %vm7392_vm0, %v7393_v8 }
 0x897   : > { %7101 = vmatprep.mubr.msk.f32.mxu1 %vm7392_vm0, %v7393_v8  ;;  %7104 = vmatprep.subr.mxu0 %v7393_v8 }
 0x898   : > { %v3689_v9 = vrot.slane %v3675_v0, %v7557_v29  ;;  %v3690_v62 = vcombine.high %v3682_v59, %v3682_v59  ;;  %3696 = vst.msk [vmem:[%s7567_s24 + $0x8] sm:$0x1] %vm568_vm3, %v3682_v59  ;;  %v3715_v57 = vrot.slane %v3707_v46, %v7557_v29  ;;  %v3708_v47 = vcombine.high %v3707_v46, %v3707_v46 }
 0x899   : > { %7095 = vmatmul.mubr.msk.f32.vlgmr.msra.gmra.mrb[40].mxu0 %vm240_vm1, %v7634_v11  ;;  %7102 = vmatmul.mubr.msk.f32.vlgmr.msra.gmra.mrb[40].mxu1 %vm240_vm1, %v7634_v11 }
 0x89a   : > { %v3691_v48 = vcombine.high %v3689_v9, %v3689_v9  ;;  %3697 = vst.msk [vmem:[%s7567_s24 + $0x18] sm:$0x1] %vm568_vm3, %v3689_v9  ;;  %3698 = vst.msk [vmem:[%s7567_s24 + $0x28] sm:$0x1] %vm568_vm3, %v3690_v62  ;;  %v3728_v49 = vrot.slane %v3715_v57, %v7575_v42  ;;  %v3722_v50 = vrot.slane %v3708_v47, %v7557_v29  ;;  %7109 = vmatprep.subr.mxu1 %v7393_v8 }
 0x89b   : > { %v3723_v51 = vcombine.high %v3715_v57, %v3715_v57  ;;  %7106 = vmatprep.mubr.msk.f32.mxu0 %vm7392_vm0, %v7393_v8  ;;  %7111 = vmatprep.mubr.msk.f32.mxu1 %vm7392_vm0, %v7393_v8 }
 0x89c   : > { %3699 = vst.msk [vmem:[%s7567_s24 + $0x38] sm:$0x1] %vm568_vm3, %v3691_v48  ;;  %3741 = vrot.lane.b32.xlu0 %v3728_v49, %s7400_s13  ;;  %v3732_v11 = vrot.slane %v3722_v50, %v7575_v42  ;;  %v3724_v60 = vcombine.high %v3722_v50, %v3722_v50 }
 0x89d   : > { %v3736_v53 = vrot.slane %v3723_v51, %v7575_v42 }
 0x89e   : > { %3743 = vrot.lane.b32.xlu1 %v3732_v11, %s7400_s13  ;;  %v3740_v58 = vrot.slane %v3724_v60, %v7575_v42 }
 0x8a0   : > { %3745 = vrot.lane.b32.xlu0 %v3736_v53, %s7400_s13 }
 0x8a2   : > { %3747 = vrot.lane.b32.xlu1 %v3740_v58, %s7400_s13 }
 0x90e   : > { %v3742_v54 = vpop.permute.xlu0 %3741 }
 0x90f   : > { %3753 = vst.msk [vmem:[%s7567_s24 + $0x8] sm:$0x1] %vm626_vm4, %v3742_v54 }
 0x910   : > { %v3744_v2 = vpop.permute.xlu1 %3743 }
 0x911   : > { %3754 = vst.msk [vmem:[%s7567_s24 + $0x18] sm:$0x1] %vm626_vm4, %v3744_v2 }
 0x912   : > { %v3746_v55 = vpop.permute.xlu0 %3745 }
 0x913   : > { %3755 = vst.msk [vmem:[%s7567_s24 + $0x28] sm:$0x1] %vm626_vm4, %v3746_v55 }
 0x914   : > { %v3748_v56 = vpop.permute.xlu1 %3747 }
 0x915   : > { %3756 = vst.msk [vmem:[%s7567_s24 + $0x38] sm:$0x1] %vm626_vm4, %v3748_v56 }
 0x966   : > { %v4051_v25 = vpop.f32.mrb[38].mxu1 }
 0x967   : > { %v3979_v23 = vpop.f32.mrb[38].mxu0  ;;  %v7089_v24 = vpop.f32.mrb[39].mxu1 }
 0x968   : > { %v4052_v26 = vadd.f32 %v4051_v25, %v3979_v23  ;;  %v7084_v27 = vpop.f32.mrb[39].mxu0 }
 0x96a   : > { %v4056_v5 = vadd.f32 %v4052_v26, %v8002_v7 }
 0x96c   : > { %v4057_v28 = vmax.f32 %v4056_v5, 0.0  ;;  %v4222_v30 = vpop.f32.mrb[40].mxu0  ;;  %v4295_v6 = vpop.f32.mrb[40].mxu1 }
 0x96d   : > { %v7096_v1 = vpop.f32.mrb[41].mxu0  ;;  %v7103_v31 = vpop.f32.mrb[41].mxu1  ;;  %7105 = vmatpush3.msra.mxu0 %v4295_v6  ;;  %7110 = vmatpush3.msra.mxu1 %v4222_v30 }
 0x96e   : > { %v4065_v34 = vrot.slane %v4057_v28, %v7557_v29  ;;  %v4091_v35 = vcombine.high %v4057_v28, %v4057_v28  ;;  %7107 = vmatmul.mubr.msk.f32.vlgmr.msra.gmra.mrb[42].mxu0 %vm391_vm2, %v7636_v12  ;;  %7112 = vmatmul.mubr.msk.f32.vlgmr.msra.gmra.mrb[42].mxu1 %vm391_vm2, %v8011_v52 }
 0x96f   : > { %7300 = vmatprep.subr.bf16.mxu0 %v7391_v3  ;;  %7303 = vmatprep.subr.bf16.mxu1 %v7391_v3 }
 0x970   : > { %v4066_v36 = vcombine.high %v4065_v34, %v4065_v34  ;;  %v4073_v37 = vrot.slane %v4065_v34, %v7557_v29  ;;  %v4098_v38 = vrot.slane %v4091_v35, %v7557_v29  ;;  %7302 = vmatpush3.bf16.msra.mxu0 %v7890_v32  ;;  %7305 = vmatpush3.bf16.msra.mxu1 %v7892_v33 }
 0x971   : > { %7118 = vmatprep.mubr.msk.f32.mxu0 %vm7392_vm0, %v7393_v8  ;;  %7125 = vmatprep.mubr.msk.f32.mxu1 %vm7392_vm0, %v7393_v8 }
 0x972   : > { %v4080_v12 = vrot.slane %v4066_v36, %v7557_v29  ;;  %v4081_v10 = vcombine.high %v4073_v37, %v4073_v37  ;;  %4087 = vst.msk [vmem:[%s7567_s24 + $0x9] sm:$0x1] %vm568_vm3, %v4073_v37  ;;  %v4106_v39 = vrot.slane %v4098_v38, %v7557_v29  ;;  %v4099_v40 = vcombine.high %v4098_v38, %v4098_v38 }
 0x973   : > { %7128 = vmatprep.subr.mxu0 %v7393_v8  ;;  %7119 = vmatmul.mubr.msk.f32.vlgmr.msra.gmra.mrb[44].mxu0 %vm240_vm1, %v7638_v13 }
 0x974   : > { %7126 = vmatmul.mubr.msk.f32.vlgmr.msra.gmra.mrb[44].mxu1 %vm240_vm1, %v7638_v13  ;;  %v4082_v63 = vcombine.high %v4080_v12, %v4080_v12  ;;  %4088 = vst.msk [vmem:[%s7567_s24 + $0x19] sm:$0x1] %vm568_vm3, %v4080_v12  ;;  %4089 = vst.msk [vmem:[%s7567_s24 + $0x29] sm:$0x1] %vm568_vm3, %v4081_v10  ;;  %v4119_v41 = vrot.slane %v4106_v39, %v7575_v42  ;;  %v4113_v61 = vrot.slane %v4099_v40, %v7557_v29 }
 0x975   : > { %v4114_v43 = vcombine.high %v4106_v39, %v4106_v39  ;;  %7133 = vmatprep.subr.mxu1 %v7393_v8  ;;  %7130 = vmatprep.mubr.msk.f32.mxu0 %vm7392_vm0, %v7393_v8 }
 0x976   : > { %7135 = vmatprep.mubr.msk.f32.mxu1 %vm7392_vm0, %v7393_v8  ;;  %4090 = vst.msk [vmem:[%s7567_s24 + $0x39] sm:$0x1] %vm568_vm3, %v4082_v63  ;;  %4132 = vrot.lane.b32.xlu0 %v4119_v41, %s7400_s13  ;;  %v4123_v13 = vrot.slane %v4113_v61, %v7575_v42  ;;  %v4115_v44 = vcombine.high %v4113_v61, %v4113_v61 }
 0x977   : > { %v4127_v45 = vrot.slane %v4114_v43, %v7575_v42 }
 0x978   : > { %4134 = vrot.lane.b32.xlu1 %v4123_v13, %s7400_s13  ;;  %v4131_v4 = vrot.slane %v4115_v44, %v7575_v42 }
 0x97a   : > { %4136 = vrot.lane.b32.xlu0 %v4127_v45, %s7400_s13 }
 0x97c   : > { %4138 = vrot.lane.b32.xlu1 %v4131_v4, %s7400_s13 }
 0x9e8   : > { %v4133_v0 = vpop.permute.xlu0 %4132 }
 0x9e9   : > { %4144 = vst.msk [vmem:[%s7567_s24 + $0x9] sm:$0x1] %vm626_vm4, %v4133_v0 }
 0x9ea   : > { %v4135_v59 = vpop.permute.xlu1 %4134 }
 0x9eb   : > { %4145 = vst.msk [vmem:[%s7567_s24 + $0x19] sm:$0x1] %vm626_vm4, %v4135_v59 }
 0x9ec   : > { %v4137_v46 = vpop.permute.xlu0 %4136 }
 0x9ed   : > { %4146 = vst.msk [vmem:[%s7567_s24 + $0x29] sm:$0x1] %vm626_vm4, %v4137_v46 }
 0x9ee   : > { %v4139_v9 = vpop.permute.xlu1 %4138 }
 0x9ef   : > { %4147 = vst.msk [vmem:[%s7567_s24 + $0x39] sm:$0x1] %vm626_vm4, %v4139_v9 }
 0xa41   : > { %v4370_v62 = vpop.f32.mrb[42].mxu0  ;;  %v4442_v57 = vpop.f32.mrb[42].mxu1 }
 0xa42   : > { %v4443_v47 = vadd.f32 %v4442_v57, %v4370_v62  ;;  %v7108_v48 = vpop.f32.mrb[43].mxu0  ;;  %v7113_v49 = vpop.f32.mrb[43].mxu1 }
 0xa44   : > { %v4447_v50 = vadd.f32 %v4443_v47, %v8002_v7 }
 0xa46   : > { %v4448_v51 = vmax.f32 %v4447_v50, 0.0  ;;  %v4613_v11 = vpop.f32.mrb[44].mxu0 }
 0xa47   : > { %v4686_v60 = vpop.f32.mrb[44].mxu1  ;;  %v7120_v53 = vpop.f32.mrb[45].mxu0  ;;  %7134 = vmatpush3.msra.mxu1 %v4613_v11 }
 0xa48   : > { %v7127_v58 = vpop.f32.mrb[45].mxu1  ;;  %7129 = vmatpush3.msra.mxu0 %v4686_v60  ;;  %v4456_v54 = vrot.slane %v4448_v51, %v7557_v29  ;;  %v4482_v2 = vcombine.high %v4448_v51, %v4448_v51  ;;  %7136 = vmatmul.mubr.msk.f32.vlgmr.msra.gmra.mrb[46].mxu1 %vm391_vm2, %v8011_v52 }
 0xa49   : > { %7131 = vmatmul.mubr.msk.f32.vlgmr.msra.gmra.mrb[46].mxu0 %vm391_vm2, %v7640_v14  ;;  %7306 = vmatprep.subr.bf16.mxu0 %v7391_v3 }
 0xa4a   : > { %7309 = vmatprep.subr.bf16.mxu1 %v7391_v3  ;;  %v4457_v55 = vcombine.high %v4456_v54, %v4456_v54  ;;  %v4464_v56 = vrot.slane %v4456_v54, %v7557_v29  ;;  %v4489_v23 = vrot.slane %v4482_v2, %v7557_v29  ;;  %7308 = vmatpush3.bf16.msra.mxu0 %v7890_v32 }
 0xa4b   : > { %7311 = vmatpush3.bf16.msra.mxu1 %v7892_v33  ;;  %7142 = vmatprep.mubr.msk.f32.mxu0 %vm7392_vm0, %v7393_v8 }
 0xa4c   : > { %7149 = vmatprep.mubr.msk.f32.mxu1 %vm7392_vm0, %v7393_v8  ;;  %v4471_v14 = vrot.slane %v4457_v55, %v7557_v29  ;;  %v4472_v25 = vcombine.high %v4464_v56, %v4464_v56  ;;  %4478 = vst.msk [vmem:[%s7567_s24 + $0xa] sm:$0x1] %vm568_vm3, %v4464_v56  ;;  %v4497_v26 = vrot.slane %v4489_v23, %v7557_v29 }
 0xa4d   : > { %v4490_v27 = vcombine.high %v4489_v23, %v4489_v23  ;;  %7152 = vmatprep.subr.mxu0 %v7393_v8  ;;  %7143 = vmatmul.mubr.msk.f32.vlgmr.msra.gmra.mrb[48].mxu0 %vm240_vm1, %v7642_v15 }
 0xa4e   : > { %7150 = vmatmul.mubr.msk.f32.vlgmr.msra.gmra.mrb[48].mxu1 %vm240_vm1, %v7642_v15  ;;  %v4473_v24 = vcombine.high %v4471_v14, %v4471_v14  ;;  %4479 = vst.msk [vmem:[%s7567_s24 + $0x1a] sm:$0x1] %vm568_vm3, %v4471_v14  ;;  %4480 = vst.msk [vmem:[%s7567_s24 + $0x2a] sm:$0x1] %vm568_vm3, %v4472_v25  ;;  %v4510_v5 = vrot.slane %v4497_v26, %v7575_v42  ;;  %v4505_v30 = vcombine.high %v4497_v26, %v4497_v26 }
 0xa4f   : > { %v4504_v28 = vrot.slane %v4490_v27, %v7557_v29  ;;  %7157 = vmatprep.subr.mxu1 %v7393_v8  ;;  %7154 = vmatprep.mubr.msk.f32.mxu0 %vm7392_vm0, %v7393_v8 }
 0xa50   : > { %7159 = vmatprep.mubr.msk.f32.mxu1 %vm7392_vm0, %v7393_v8  ;;  %4481 = vst.msk [vmem:[%s7567_s24 + $0x3a] sm:$0x1] %vm568_vm3, %v4473_v24  ;;  %4523 = vrot.lane.b32.xlu0 %v4510_v5, %s7400_s13  ;;  %v4518_v1 = vrot.slane %v4505_v30, %v7575_v42 }
 0xa51   : > { %v4514_v15 = vrot.slane %v4504_v28, %v7575_v42  ;;  %v4506_v6 = vcombine.high %v4504_v28, %v4504_v28 }
 0xa53   : > { %4525 = vrot.lane.b32.xlu1 %v4514_v15, %s7400_s13  ;;  %v4522_v31 = vrot.slane %v4506_v6, %v7575_v42 }
 0xa54   : > { %4527 = vrot.lane.b32.xlu0 %v4518_v1, %s7400_s13 }
 0xa57   : > { %4529 = vrot.lane.b32.xlu1 %v4522_v31, %s7400_s13 }
 0xac2   : > { %v4524_v34 = vpop.permute.xlu0 %4523 }
 0xac3   : > { %4535 = vst.msk [vmem:[%s7567_s24 + $0xa] sm:$0x1] %vm626_vm4, %v4524_v34 }
 0xac5   : > { %v4526_v35 = vpop.permute.xlu1 %4525 }
 0xac6   : > { %4536 = vst.msk [vmem:[%s7567_s24 + $0x1a] sm:$0x1] %vm626_vm4, %v4526_v35  ;;  %v4528_v36 = vpop.permute.xlu0 %4527 }
 0xac7   : > { %4537 = vst.msk [vmem:[%s7567_s24 + $0x2a] sm:$0x1] %vm626_vm4, %v4528_v36 }
 0xac9   : > { %v4530_v37 = vpop.permute.xlu1 %4529 }
 0xaca   : > { %4538 = vst.msk [vmem:[%s7567_s24 + $0x3a] sm:$0x1] %vm626_vm4, %v4530_v37 }
 0xb1b   : > { %v4833_v12 = vpop.f32.mrb[46].mxu1 }
 0xb1c   : > { %v4761_v38 = vpop.f32.mrb[46].mxu0  ;;  %v7137_v40 = vpop.f32.mrb[47].mxu1 }
 0xb1d   : > { %v4834_v10 = vadd.f32 %v4833_v12, %v4761_v38  ;;  %v7132_v39 = vpop.f32.mrb[47].mxu0 }
 0xb1f   : > { %v4838_v63 = vadd.f32 %v4834_v10, %v8002_v7 }
 0xb20   : > { %v5004_v61 = vpop.f32.mrb[48].mxu0 }
 0xb21   : > { %v4839_v41 = vmax.f32 %v4838_v63, 0.0  ;;  %v5077_v43 = vpop.f32.mrb[48].mxu1  ;;  %v7144_v13 = vpop.f32.mrb[49].mxu0  ;;  %7158 = vmatpush3.msra.mxu1 %v5004_v61 }
 0xb22   : > { %v7151_v44 = vpop.f32.mrb[49].mxu1  ;;  %7153 = vmatpush3.msra.mxu0 %v5077_v43  ;;  %7160 = vmatmul.mubr.msk.f32.vlgmr.msra.gmra.mrb[50].mxu1 %vm391_vm2, %v8011_v52 }
 0xb23   : > { %v4847_v45 = vrot.slane %v4839_v41, %v7557_v29  ;;  %v4873_v4 = vcombine.high %v4839_v41, %v4839_v41  ;;  %7155 = vmatmul.mubr.msk.f32.vlgmr.msra.gmra.mrb[50].mxu0 %vm391_vm2, %v7644_v16  ;;  %7312 = vmatprep.subr.bf16.mxu0 %v7391_v3 }
 0xb24   : > { %7315 = vmatprep.subr.bf16.mxu1 %v7391_v3  ;;  %7314 = vmatpush3.bf16.msra.mxu0 %v7890_v32 }
 0xb25   : > { %v4848_v0 = vcombine.high %v4847_v45, %v4847_v45  ;;  %v4855_v59 = vrot.slane %v4847_v45, %v7557_v29  ;;  %v4880_v46 = vrot.slane %v4873_v4, %v7557_v29  ;;  %7317 = vmatpush3.bf16.msra.mxu1 %v7892_v33  ;;  %7166 = vmatprep.mubr.msk.f32.mxu0 %vm7392_vm0, %v7393_v8 }
 0xb26   : > { %7173 = vmatprep.mubr.msk.f32.mxu1 %vm7392_vm0, %v7393_v8  ;;  %7176 = vmatprep.subr.mxu0 %v7393_v8 }
 0xb27   : > { %v4862_v16 = vrot.slane %v4848_v0, %v7557_v29  ;;  %v4863_v9 = vcombine.high %v4855_v59, %v4855_v59  ;;  %4869 = vst.msk [vmem:[%s7567_s24 + $0xb] sm:$0x1] %vm568_vm3, %v4855_v59  ;;  %v4888_v62 = vrot.slane %v4880_v46, %v7557_v29  ;;  %v4881_v57 = vcombine.high %v4880_v46, %v4880_v46  ;;  %v6104_v59 = vld [vmem:[%s8470_s3] sm:$0xff]  ;;  %v6105_v46 = vld [vmem:[%s8470_s3 + $0x8] sm:$0xff] }
 0xb28   : > { %7167 = vmatmul.mubr.msk.f32.vlgmr.msra.gmra.mrb[52].mxu0 %vm240_vm1, %v7646_v17  ;;  %7174 = vmatmul.mubr.msk.f32.vlgmr.msra.gmra.mrb[52].mxu1 %vm240_vm1, %v7646_v17 }
 0xb29   : > { %v4864_v47 = vcombine.high %v4862_v16, %v4862_v16  ;;  %4870 = vst.msk [vmem:[%s7567_s24 + $0x1b] sm:$0x1] %vm568_vm3, %v4862_v16  ;;  %4871 = vst.msk [vmem:[%s7567_s24 + $0x2b] sm:$0x1] %vm568_vm3, %v4863_v9  ;;  %v4901_v48 = vrot.slane %v4888_v62, %v7575_v42  ;;  %v4895_v49 = vrot.slane %v4881_v57, %v7557_v29  ;;  %7181 = vmatprep.subr.mxu1 %v7393_v8  ;;  %v6681_v16 = vld [vmem:[%s8470_s3 + $0x10] sm:$0xff]  ;;  %v6682_v9 = vld [vmem:[%s8470_s3 + $0x18] sm:$0xff] }
 0xb2a   : > { %v4896_v50 = vcombine.high %v4888_v62, %v4888_v62  ;;  %7178 = vmatprep.mubr.msk.f32.mxu0 %vm7392_vm0, %v7393_v8  ;;  %7183 = vmatprep.mubr.msk.f32.mxu1 %vm7392_vm0, %v7393_v8 }
 0xb2b   : > { %4872 = vst.msk [vmem:[%s7567_s24 + $0x3b] sm:$0x1] %vm568_vm3, %v4864_v47  ;;  %4914 = vrot.lane.b32.xlu0 %v4901_v48, %s7400_s13  ;;  %v4905_v17 = vrot.slane %v4895_v49, %v7575_v42  ;;  %v4897_v51 = vcombine.high %v4895_v49, %v4895_v49  ;;  %v7325_v49 = vpack.c.bf16 %v6105_v46, %v6104_v59 }
 0xb2c   : > { %v4909_v11 = vrot.slane %v4896_v50, %v7575_v42  ;;  %v7328_v50 = vpack.c.bf16 %v6682_v9, %v6681_v16 }
 0xb2d   : > { %4916 = vrot.lane.b32.xlu1 %v4905_v17, %s7400_s13  ;;  %v4913_v60 = vrot.slane %v4897_v51, %v7575_v42 }
 0xb2f   : > { %4918 = vrot.lane.b32.xlu0 %v4909_v11, %s7400_s13 }
 0xb31   : > { %4920 = vrot.lane.b32.xlu1 %v4913_v60, %s7400_s13 }
 0xb9d   : > { %v4915_v53 = vpop.permute.xlu0 %4914 }
 0xb9e   : > { %4926 = vst.msk [vmem:[%s7567_s24 + $0xb] sm:$0x1] %vm626_vm4, %v4915_v53 }
 0xb9f   : > { %v4917_v58 = vpop.permute.xlu1 %4916 }
 0xba0   : > { %4927 = vst.msk [vmem:[%s7567_s24 + $0x1b] sm:$0x1] %vm626_vm4, %v4917_v58 }
 0xba1   : > { %v4919_v54 = vpop.permute.xlu0 %4918 }
 0xba2   : > { %4928 = vst.msk [vmem:[%s7567_s24 + $0x2b] sm:$0x1] %vm626_vm4, %v4919_v54 }
 0xba3   : > { %v4921_v2 = vpop.permute.xlu1 %4920 }
 0xba4   : > { %4929 = vst.msk [vmem:[%s7567_s24 + $0x3b] sm:$0x1] %vm626_vm4, %v4921_v2 }
 0xbf5   : > { %v5224_v56 = vpop.f32.mrb[50].mxu1 }
 0xbf6   : > { %v5152_v55 = vpop.f32.mrb[50].mxu0  ;;  %v7161_v25 = vpop.f32.mrb[51].mxu1 }
 0xbf7   : > { %v5225_v23 = vadd.f32 %v5224_v56, %v5152_v55  ;;  %v7156_v14 = vpop.f32.mrb[51].mxu0 }
 0xbf9   : > { %v5229_v26 = vadd.f32 %v5225_v23, %v8002_v7 }
 0xbfb   : > { %v5230_v27 = vmax.f32 %v5229_v26, 0.0  ;;  %v5395_v24 = vpop.f32.mrb[52].mxu0  ;;  %v5468_v5 = vpop.f32.mrb[52].mxu1 }
 0xbfc   : > { %v7168_v28 = vpop.f32.mrb[53].mxu0  ;;  %v7175_v30 = vpop.f32.mrb[53].mxu1  ;;  %7177 = vmatpush3.msra.mxu0 %v5468_v5  ;;  %7182 = vmatpush3.msra.mxu1 %v5395_v24 }
 0xbfd   : > { %v5238_v15 = vrot.slane %v5230_v27, %v7557_v29  ;;  %v5264_v6 = vcombine.high %v5230_v27, %v5230_v27  ;;  %7179 = vmatmul.mubr.msk.f32.vlgmr.msra.gmra.mrb[54].mxu0 %vm391_vm2, %v7648_v18  ;;  %7184 = vmatmul.mubr.msk.f32.vlgmr.msra.gmra.mrb[54].mxu1 %vm391_vm2, %v8011_v52 }
 0xbfe   : > { %7318 = vmatprep.subr.bf16.mxu0 %v7391_v3  ;;  %7321 = vmatprep.subr.bf16.mxu1 %v7391_v3 }
 0xbff   : > { %v5239_v1 = vcombine.high %v5238_v15, %v5238_v15  ;;  %v5246_v31 = vrot.slane %v5238_v15, %v7557_v29  ;;  %v5271_v34 = vrot.slane %v5264_v6, %v7557_v29  ;;  %7320 = vmatpush3.bf16.msra.mxu0 %v7890_v32  ;;  %7323 = vmatpush3.bf16.msra.mxu1 %v7892_v33 }
 0xc00   : > { %7190 = vmatprep.mubr.msk.f32.mxu0 %vm7392_vm0, %v7393_v8  ;;  %7197 = vmatprep.mubr.msk.f32.mxu1 %vm7392_vm0, %v7393_v8 }
 0xc01   : > { %v5253_v18 = vrot.slane %v5239_v1, %v7557_v29  ;;  %v5254_v35 = vcombine.high %v5246_v31, %v5246_v31  ;;  %5260 = vst.msk [vmem:[%s7567_s24 + $0xc] sm:$0x1] %vm568_vm3, %v5246_v31  ;;  %v5279_v36 = vrot.slane %v5271_v34, %v7557_v29  ;;  %v5272_v37 = vcombine.high %v5271_v34, %v5271_v34 }
 0xc02   : > { %7200 = vmatprep.subr.mxu0 %v7393_v8  ;;  %7191 = vmatmul.mubr.msk.f32.vlgmr.msra.gmra.mrb[56].mxu0 %vm240_vm1, %v7650_v19 }
 0xc03   : > { %7198 = vmatmul.mubr.msk.f32.vlgmr.msra.gmra.mrb[56].mxu1 %vm240_vm1, %v7650_v19  ;;  %v5255_v32 = vcombine.high %v5253_v18, %v5253_v18  ;;  %5261 = vst.msk [vmem:[%s7567_s24 + $0x1c] sm:$0x1] %vm568_vm3, %v5253_v18  ;;  %5262 = vst.msk [vmem:[%s7567_s24 + $0x2c] sm:$0x1] %vm568_vm3, %v5254_v35  ;;  %v5292_v33 = vrot.slane %v5279_v36, %v7575_v42  ;;  %v5286_v38 = vrot.slane %v5272_v37, %v7557_v29 }
 0xc04   : > { %v5287_v12 = vcombine.high %v5279_v36, %v5279_v36  ;;  %7205 = vmatprep.subr.mxu1 %v7393_v8  ;;  %7202 = vmatprep.mubr.msk.f32.mxu0 %vm7392_vm0, %v7393_v8 }
 0xc05   : > { %7207 = vmatprep.mubr.msk.f32.mxu1 %vm7392_vm0, %v7393_v8  ;;  %5263 = vst.msk [vmem:[%s7567_s24 + $0x3c] sm:$0x1] %vm568_vm3, %v5255_v32  ;;  %5305 = vrot.lane.b32.xlu0 %v5292_v33, %s7400_s13  ;;  %v5296_v19 = vrot.slane %v5286_v38, %v7575_v42  ;;  %v5288_v10 = vcombine.high %v5286_v38, %v5286_v38 }
 0xc06   : > { %v5300_v39 = vrot.slane %v5287_v12, %v7575_v42 }
 0xc07   : > { %5307 = vrot.lane.b32.xlu1 %v5296_v19, %s7400_s13  ;;  %v5304_v40 = vrot.slane %v5288_v10, %v7575_v42 }
 0xc09   : > { %5309 = vrot.lane.b32.xlu0 %v5300_v39, %s7400_s13 }
 0xc0b   : > { %5311 = vrot.lane.b32.xlu1 %v5304_v40, %s7400_s13 }
 0xc77   : > { %v5306_v63 = vpop.permute.xlu0 %5305 }
 0xc78   : > { %5317 = vst.msk [vmem:[%s7567_s24 + $0xc] sm:$0x1] %vm626_vm4, %v5306_v63 }
 0xc79   : > { %v5308_v41 = vpop.permute.xlu1 %5307 }
 0xc7a   : > { %5318 = vst.msk [vmem:[%s7567_s24 + $0x1c] sm:$0x1] %vm626_vm4, %v5308_v41 }
 0xc7b   : > { %v5310_v61 = vpop.permute.xlu0 %5309 }
 0xc7c   : > { %5319 = vst.msk [vmem:[%s7567_s24 + $0x2c] sm:$0x1] %vm626_vm4, %v5310_v61 }
 0xc7d   : > { %v5312_v43 = vpop.permute.xlu1 %5311 }
 0xc7e   : > { %5320 = vst.msk [vmem:[%s7567_s24 + $0x3c] sm:$0x1] %vm626_vm4, %v5312_v43 }
 0xcd0   : > { %v5543_v13 = vpop.f32.mrb[54].mxu0  ;;  %v5615_v44 = vpop.f32.mrb[54].mxu1 }
 0xcd1   : > { %v5616_v45 = vadd.f32 %v5615_v44, %v5543_v13  ;;  %v7180_v4 = vpop.f32.mrb[55].mxu0  ;;  %v7185_v0 = vpop.f32.mrb[55].mxu1 }
 0xcd3   : > { %v5620_v62 = vadd.f32 %v5616_v45, %v8002_v7 }
 0xcd5   : > { %v5621_v57 = vmax.f32 %v5620_v62, 0.0  ;;  %v5786_v47 = vpop.f32.mrb[56].mxu0 }
 0xcd6   : > { %v5859_v48 = vpop.f32.mrb[56].mxu1  ;;  %v7192_v17 = vpop.f32.mrb[57].mxu0  ;;  %7206 = vmatpush3.msra.mxu1 %v5786_v47 }
 0xcd7   : > { %v7199_v51 = vpop.f32.mrb[57].mxu1  ;;  %7201 = vmatpush3.msra.mxu0 %v5859_v48  ;;  %v5629_v11 = vrot.slane %v5621_v57, %v7557_v29  ;;  %v5655_v60 = vcombine.high %v5621_v57, %v5621_v57  ;;  %7208 = vmatmul.mubr.msk.f32.vlgmr.msra.gmra.mrb[58].mxu1 %vm391_vm2, %v8011_v52  ;;  %v6401_v57 = vld [vmem:[%s8469_s2] sm:$0xff] }
 0xcd8   : > { %7203 = vmatmul.mubr.msk.f32.vlgmr.msra.gmra.mrb[58].mxu0 %vm391_vm2, %v7652_v20  ;;  %7324 = vmatprep.subr.bf16.mxu0 %v7391_v3 }
 0xcd9   : > { %7327 = vmatprep.subr.bf16.mxu1 %v7391_v3  ;;  %v5630_v53 = vcombine.high %v5629_v11, %v5629_v11  ;;  %v5637_v58 = vrot.slane %v5629_v11, %v7557_v29  ;;  %v5662_v54 = vrot.slane %v5655_v60, %v7557_v29  ;;  %7326 = vmatpush3.bf16.msra.mxu0 %v7325_v49 }
 0xcda   : > { %7329 = vmatpush3.bf16.msra.mxu1 %v7328_v50  ;;  %7214 = vmatprep.mubr.msk.f32.mxu0 %vm7392_vm0, %v7393_v8 }
 0xcdb   : > { %7221 = vmatprep.mubr.msk.f32.mxu1 %vm7392_vm0, %v7393_v8  ;;  %v5644_v20 = vrot.slane %v5630_v53, %v7557_v29  ;;  %v5645_v2 = vcombine.high %v5637_v58, %v5637_v58  ;;  %5651 = vst.msk [vmem:[%s7567_s24 + $0xd] sm:$0x1] %vm568_vm3, %v5637_v58  ;;  %v5670_v3 = vrot.slane %v5662_v54, %v7557_v29 }
 0xcdc   : > { %v5663_v55 = vcombine.high %v5662_v54, %v5662_v54  ;;  %7224 = vmatprep.subr.mxu0 %v7393_v8  ;;  %7215 = vmatmul.mubr.msk.f32.vlgmr.msra.gmra.mrb[60].mxu0 %vm240_vm1, %v7654_v21 }
 0xcdd   : > { %7222 = vmatmul.mubr.msk.f32.vlgmr.msra.gmra.mrb[60].mxu1 %vm240_vm1, %v7654_v21  ;;  %v5646_v56 = vcombine.high %v5644_v20, %v5644_v20  ;;  %5652 = vst.msk [vmem:[%s7567_s24 + $0x1d] sm:$0x1] %vm568_vm3, %v5644_v20  ;;  %5653 = vst.msk [vmem:[%s7567_s24 + $0x2d] sm:$0x1] %vm568_vm3, %v5645_v2  ;;  %v5683_v23 = vrot.slane %v5670_v3, %v7575_v42  ;;  %v5678_v25 = vcombine.high %v5670_v3, %v5670_v3 }
 0xcde   : > { %v5677_v14 = vrot.slane %v5663_v55, %v7557_v29  ;;  %7229 = vmatprep.subr.mxu1 %v7393_v8  ;;  %7226 = vmatprep.mubr.msk.f32.mxu0 %vm7392_vm0, %v7393_v8 }
 0xcdf   : > { %7231 = vmatprep.mubr.msk.f32.mxu1 %vm7392_vm0, %v7393_v8  ;;  %5654 = vst.msk [vmem:[%s7567_s24 + $0x3d] sm:$0x1] %vm568_vm3, %v5646_v56  ;;  %5696 = vrot.lane.b32.xlu0 %v5683_v23, %s7400_s13  ;;  %v5691_v27 = vrot.slane %v5678_v25, %v7575_v42 }
 0xce0   : > { %v5687_v21 = vrot.slane %v5677_v14, %v7575_v42  ;;  %v5679_v26 = vcombine.high %v5677_v14, %v5677_v14 }
 0xce2   : > { %5698 = vrot.lane.b32.xlu1 %v5687_v21, %s7400_s13  ;;  %v5695_v24 = vrot.slane %v5679_v26, %v7575_v42 }
 0xce3   : > { %5700 = vrot.lane.b32.xlu0 %v5691_v27, %s7400_s13 }
 0xce6   : > { %5702 = vrot.lane.b32.xlu1 %v5695_v24, %s7400_s13 }
 0xd51   : > { %v5697_v5 = vpop.permute.xlu0 %5696 }
 0xd52   : > { %5708 = vst.msk [vmem:[%s7567_s24 + $0xd] sm:$0x1] %vm626_vm4, %v5697_v5 }
 0xd54   : > { %v5699_v8 = vpop.permute.xlu1 %5698 }
 0xd55   : > { %5709 = vst.msk [vmem:[%s7567_s24 + $0x1d] sm:$0x1] %vm626_vm4, %v5699_v8  ;;  %v5701_v28 = vpop.permute.xlu0 %5700 }
 0xd56   : > { %5710 = vst.msk [vmem:[%s7567_s24 + $0x2d] sm:$0x1] %vm626_vm4, %v5701_v28 }
 0xd58   : > { %v5703_v30 = vpop.permute.xlu1 %5702 }
 0xd59   : > { %5711 = vst.msk [vmem:[%s7567_s24 + $0x3d] sm:$0x1] %vm626_vm4, %v5703_v30 }
 0xdaa   : > { %v6006_v6 = vpop.f32.mrb[58].mxu1 }
 0xdab   : > { %v5934_v15 = vpop.f32.mrb[58].mxu0  ;;  %v7209_v34 = vpop.f32.mrb[59].mxu1 }
 0xdac   : > { %v6007_v1 = vadd.f32 %v6006_v6, %v5934_v15  ;;  %v7204_v31 = vpop.f32.mrb[59].mxu0 }
 0xdae   : > { %v6011_v18 = vadd.f32 %v6007_v1, %v8002_v7 }
 0xdaf   : > { %v6177_v36 = vpop.f32.mrb[60].mxu0 }
 0xdb0   : > { %v6012_v35 = vmax.f32 %v6011_v18, 0.0  ;;  %v6250_v37 = vpop.f32.mrb[60].mxu1  ;;  %v7216_v32 = vpop.f32.mrb[61].mxu0  ;;  %7230 = vmatpush3.msra.mxu1 %v6177_v36 }
 0xdb1   : > { %v7223_v33 = vpop.f32.mrb[61].mxu1  ;;  %7225 = vmatpush3.msra.mxu0 %v6250_v37  ;;  %7232 = vmatmul.mubr.msk.f32.vlgmr.msra.gmra.mrb[62].mxu1 %vm391_vm2, %v8011_v52 }
 0xdb2   : > { %v6020_v38 = vrot.slane %v6012_v35, %v7557_v29  ;;  %v6046_v12 = vcombine.high %v6012_v35, %v6012_v35  ;;  %7227 = vmatmul.mubr.msk.f32.vlgmr.msra.gmra.mrb[62].mxu0 %vm391_vm2, %v7656_v22 }
 0xdb4   : > { %v6021_v7 = vcombine.high %v6020_v38, %v6020_v38  ;;  %v6028_v19 = vrot.slane %v6020_v38, %v7557_v29  ;;  %v6053_v10 = vrot.slane %v6046_v12, %v7557_v29 }
 0xdb6   : > { %v6035_v39 = vrot.slane %v6021_v7, %v7557_v29  ;;  %v6036_v40 = vcombine.high %v6028_v19, %v6028_v19  ;;  %6042 = vst.msk [vmem:[%s7567_s24 + $0xe] sm:$0x1] %vm568_vm3, %v6028_v19  ;;  %v6061_v63 = vrot.slane %v6053_v10, %v7557_v29  ;;  %v6054_v41 = vcombine.high %v6053_v10, %v6053_v10 }
 0xdb8   : > { %v6037_v61 = vcombine.high %v6035_v39, %v6035_v39  ;;  %6043 = vst.msk [vmem:[%s7567_s24 + $0x1e] sm:$0x1] %vm568_vm3, %v6035_v39  ;;  %6044 = vst.msk [vmem:[%s7567_s24 + $0x2e] sm:$0x1] %vm568_vm3, %v6036_v40  ;;  %v6074_v22 = vrot.slane %v6061_v63, %v7575_v42  ;;  %v6068_v52 = vrot.slane %v6054_v41, %v7557_v29 }
 0xdb9   : > { %v6069_v43 = vcombine.high %v6061_v63, %v6061_v63 }
 0xdba   : > { %6045 = vst.msk [vmem:[%s7567_s24 + $0x3e] sm:$0x1] %vm568_vm3, %v6037_v61  ;;  %6087 = vrot.lane.b32.xlu0 %v6074_v22, %s7400_s13  ;;  %v6078_v13 = vrot.slane %v6068_v52, %v7575_v42  ;;  %v6070_v44 = vcombine.high %v6068_v52, %v6068_v52 }
 0xdbb   : > { %v6082_v45 = vrot.slane %v6069_v43, %v7575_v42 }
 0xdbc   : > { %6089 = vrot.lane.b32.xlu1 %v6078_v13, %s7400_s13  ;;  %v6086_v4 = vrot.slane %v6070_v44, %v7575_v42 }
 0xdbe   : > { %6091 = vrot.lane.b32.xlu0 %v6082_v45, %s7400_s13 }
 0xdc0   : > { %6093 = vrot.lane.b32.xlu1 %v6086_v4, %s7400_s13 }
 0xe2c   : > { %v6088_v0 = vpop.permute.xlu0 %6087 }
 0xe2d   : > { %6099 = vst.msk [vmem:[%s7567_s24 + $0xe] sm:$0x1] %vm626_vm4, %v6088_v0 }
 0xe2e   : > { %v6090_v59 = vpop.permute.xlu1 %6089 }
 0xe2f   : > { %6100 = vst.msk [vmem:[%s7567_s24 + $0x1e] sm:$0x1] %vm626_vm4, %v6090_v59 }
 0xe30   : > { %v6092_v46 = vpop.permute.xlu0 %6091 }
 0xe31   : > { %6101 = vst.msk [vmem:[%s7567_s24 + $0x2e] sm:$0x1] %vm626_vm4, %v6092_v46 }
 0xe32   : > { %v6094_v16 = vpop.permute.xlu1 %6093 }
 0xe33   : > { %6102 = vst.msk [vmem:[%s7567_s24 + $0x3e] sm:$0x1] %vm626_vm4, %v6094_v16 }
 0xe84   : > { %v6397_v62 = vpop.f32.mrb[62].mxu1 }
 0xe85   : > { %v6325_v9 = vpop.f32.mrb[62].mxu0  ;;  %v7233_v49 = vpop.f32.mrb[63].mxu1 }
 0xe86   : > { %v6398_v47 = vadd.f32 %v6397_v62, %v6325_v9  ;;  %v7228_v48 = vpop.f32.mrb[63].mxu0 }
 0xe88   : > { %v6402_v50 = vadd.f32 %v6401_v57, %v6398_v47 }
 0xe8a   : > { %v6403_v17 = vmax.f32 %v6402_v50, 0.0 }
 0xe8c   : > { %v6411_v51 = vrot.slane %v6403_v17, %v7557_v29  ;;  %v6437_v11 = vcombine.high %v6403_v17, %v6403_v17 }
 0xe8e   : > { %v6412_v60 = vcombine.high %v6411_v51, %v6411_v51  ;;  %v6419_v53 = vrot.slane %v6411_v51, %v7557_v29  ;;  %v6444_v58 = vrot.slane %v6437_v11, %v7557_v29 }
 0xe90   : > { %v6426_v54 = vrot.slane %v6412_v60, %v7557_v29  ;;  %v6427_v20 = vcombine.high %v6419_v53, %v6419_v53  ;;  %6433 = vst.msk [vmem:[%s7567_s24 + $0xf] sm:$0x1] %vm568_vm3, %v6419_v53  ;;  %v6452_v2 = vrot.slane %v6444_v58, %v7557_v29  ;;  %v6445_v3 = vcombine.high %v6444_v58, %v6444_v58 }
 0xe92   : > { %v6428_v55 = vcombine.high %v6426_v54, %v6426_v54  ;;  %6434 = vst.msk [vmem:[%s7567_s24 + $0x1f] sm:$0x1] %vm568_vm3, %v6426_v54  ;;  %6435 = vst.msk [vmem:[%s7567_s24 + $0x2f] sm:$0x1] %vm568_vm3, %v6427_v20  ;;  %v6465_v56 = vrot.slane %v6452_v2, %v7575_v42  ;;  %v6459_v23 = vrot.slane %v6445_v3, %v7557_v29 }
 0xe93   : > { %v6460_v14 = vcombine.high %v6452_v2, %v6452_v2 }
 0xe94   : > { %6436 = vst.msk [vmem:[%s7567_s24 + $0x3f] sm:$0x1] %vm568_vm3, %v6428_v55  ;;  %6478 = vrot.lane.b32.xlu0 %v6465_v56, %s7400_s13  ;;  %v6469_v25 = vrot.slane %v6459_v23, %v7575_v42  ;;  %v6461_v21 = vcombine.high %v6459_v23, %v6459_v23 }
 0xe95   : > { %v6473_v26 = vrot.slane %v6460_v14, %v7575_v42 }
 0xe96   : > { %6480 = vrot.lane.b32.xlu1 %v6469_v25, %s7400_s13  ;;  %v6477_v27 = vrot.slane %v6461_v21, %v7575_v42 }
 0xe98   : > { %6482 = vrot.lane.b32.xlu0 %v6473_v26, %s7400_s13 }
 0xe9a   : > { %6484 = vrot.lane.b32.xlu1 %v6477_v27, %s7400_s13 }
 0xf06   : > { %v6479_v29 = vpop.permute.xlu0 %6478 }
 0xf07   : > { %6490 = vst.msk [vmem:[%s7567_s24 + $0xf] sm:$0x1] %vm626_vm4, %v6479_v29 }
 0xf08   : > { %v6481_v24 = vpop.permute.xlu1 %6480 }
 0xf09   : > { %6491 = vst.msk [vmem:[%s7567_s24 + $0x1f] sm:$0x1] %vm626_vm4, %v6481_v24 }
 0xf0a   : > { %v6483_v5 = vpop.permute.xlu0 %6482 }
 0xf0b   : > { %6492 = vst.msk [vmem:[%s7567_s24 + $0x2f] sm:$0x1] %vm626_vm4, %v6483_v5 }
 0xf0c   : > { %v6485_v8 = vpop.permute.xlu1 %6484 }
 0xf0d   : > { %6493 = vst.msk [vmem:[%s7567_s24 + $0x3f] sm:$0x1] %vm626_vm4, %v6485_v8 }
 0xf0e PF: > { %s14_s17 = sadd.s32 1, %s7389_s17   ;;  %s8472_s15 = smov %s7385_s16 }
 0xf0f   : > { %p11_p5 = scmp.ge.s32.totalorder %s14_s17, 4   ;;  %s8473_s16 = smov %s8475_s18 }
 0xf11   :  { %13 = sbr.rel (!%p11_p5) target bundleno = 2 (0x2), region = 67 }

</bundles_post_ra>
